<compile_context>
chip_gen: v7x
topology: tpu7x:2x2x1
jax: 0.10.0
libtpu: 0.0.40
codegen_flags: <defaults>
</compile_context>

<pallas_src>
import jax
import jax.numpy as jnp
from jax.experimental import pallas as pl
from jax.experimental.pallas import tpu as pltpu


def residual_block_kernel(xpad_ref, w_ref, out_ref):
    # xpad_ref: (1, H+2, W+2, C) bf16  zero-padded NHWC input block (one sample)
    # w_ref   : (3, 3*C, C)      bf16  conv weights; rows within each kh slab
    #                                   ordered (kw, cin)
    # out_ref : (1, H, W, C)     f32   output block
    _, Hp, Wp, C = xpad_ref.shape
    H, W = Hp - 2, Wp - 2
    inv_hw = 1.0 / (H * W)

    # --- conv as 3 row-chunked im2col matmuls, f32 accumulation on the MXU.
    acc = jnp.zeros((H * W, C), jnp.float32)
    resid = None
    for kh in range(3):
        taps = [
            xpad_ref[0, kh:kh + H, kw:kw + W, :].reshape(H * W, C)
            for kw in range(3)
        ]
        if kh == 1:
            resid = taps[1]                                   # centre tap == x
        slab = jnp.concatenate(taps, axis=1)                  # (H*W, 3C) bf16
        acc = acc + jnp.dot(slab, w_ref[kh],
                            preferred_element_type=jnp.float32)
    # Conv bias intentionally omitted: InstanceNorm's mean subtraction cancels it.

    # --- InstanceNorm2d (affine=False, eps=1e-5): one-pass per-channel stats
    # over H*W, biased variance, all in f32.
    mean = jnp.sum(acc, axis=0, keepdims=True) * inv_hw       # (1, C)
    ex2 = jnp.sum(acc * acc, axis=0, keepdims=True) * inv_hw  # (1, C)
    var = jnp.maximum(ex2 - mean * mean, 0.0)
    normed = (acc - mean) * jax.lax.rsqrt(var + 1e-5)

    # --- ReLU + residual add (residual = centre tap, cast to f32)
    y = jnp.maximum(normed, 0.0)
    out_ref[0] = (resid.astype(jnp.float32) + y).reshape(H, W, C).astype(
        out_ref.dtype)


def residual_block(x_nchw, weight, bias=None):
    """x_nchw: (N, C, H, W) f32; weight: (C, C, 3, 3) OIHW; bias: (C,) (unused —
    it is mathematically cancelled by the InstanceNorm mean subtraction).

    Kernel assumes channels sit densely on the 128-wide lane axis; C not a
    multiple of 128 is zero-padded here (zero channels stay exactly zero
    through conv/IN/ReLU/residual and are sliced off afterwards).
    """
    del bias  # cancelled by InstanceNorm; kept in the signature for API parity
    N, C, H, W = x_nchw.shape
    Cp = ((C + 127) // 128) * 128

    # NHWC, bf16 on the matmul/DMA path; spatial 1-px halo + channel pad fused
    # into this single relayout pass by XLA.
    x = jnp.transpose(x_nchw, (0, 2, 3, 1)).astype(jnp.bfloat16)
    xpad = jnp.pad(x, ((0, 0), (1, 1), (1, 1), (0, Cp - C)))

    # (cout, cin, kh, kw) -> (kh, kw, cin, cout) -> channel pad -> (3, 3*Cp, Cp)
    w = jnp.transpose(weight, (2, 3, 1, 0)).astype(jnp.bfloat16)
    w = jnp.pad(w, ((0, 0), (0, 0), (0, Cp - C), (0, Cp - C)))
    w3d = w.reshape(3, 3 * Cp, Cp)

    out_nhwc = pl.pallas_call(
        residual_block_kernel,
        out_shape=jax.ShapeDtypeStruct((N, H, W, Cp), jnp.float32),
        grid_spec=pltpu.PrefetchScalarGridSpec(
            num_scalar_prefetch=0,
            grid=(N,),
            in_specs=[
                pl.BlockSpec((1, H + 2, W + 2, Cp), lambda n: (n, 0, 0, 0)),
                # Weight block index is constant across the grid, so it is only
                # DMA'd once; at ~1.2 MiB (C=256) double-buffering it is cheap.
                pl.BlockSpec((3, 3 * Cp, Cp), lambda n: (0, 0, 0)),
            ],
            out_specs=pl.BlockSpec((1, H, W, Cp), lambda n: (n, 0, 0, 0)),
        ),
        compiler_params=pltpu.CompilerParams(
            dimension_semantics=("parallel",),
            # Production StarGAN size (C=256, H=W=64) peaks around ~25 MiB
            # resident with the kh-chunked im2col; 48 MiB leaves slack while
            # staying under v7x's 64 MiB physical VMEM.
            vmem_limit_bytes=48 * 1024 * 1024,
        ),
    )(xpad, w3d)

    out_nhwc = out_nhwc[..., :C]                         # drop lane padding
    return jnp.transpose(out_nhwc, (0, 3, 1, 2))         # back to NCHW


def _reference(x_nchw, weight, bias):
    """Pure-JAX f32 reference mirroring the PyTorch module (bias included)."""
    conv = jax.lax.conv_general_dilated(
        x_nchw, weight, window_strides=(1, 1), padding=((1, 1), (1, 1)),
        dimension_numbers=("NCHW", "OIHW", "NCHW"))
    conv = conv + bias[None, :, None, None]
    mean = jnp.mean(conv, axis=(2, 3), keepdims=True)
    var = jnp.mean((conv - mean) ** 2, axis=(2, 3), keepdims=True)
    normed = (conv - mean) * jax.lax.rsqrt(var + 1e-5)
    return x_nchw + jnp.maximum(normed, 0.0)


if __name__ == "__main__":
    key = jax.random.PRNGKey(0)
    kx, kw, kb = jax.random.split(key, 3)

    N, C, H, W = 2, 4, 16, 16
    x = jax.random.normal(kx, (N, C, H, W), dtype=jnp.float32)
    weight = jax.random.normal(kw, (C, C, 3, 3), dtype=jnp.float32) * 0.1
    bias = jax.random.normal(kb, (C,), dtype=jnp.float32) * 0.1

    out = jax.block_until_ready(residual_block(x, weight, bias))
    assert out.shape == (N, C, H, W)

    # Tight check: reference fed the same bf16-quantized inputs the kernel sees
    # (isolates the kernel's own math; also proves the bias cancellation since
    # the reference still adds the bias while the kernel never sees it).
    xq = x.astype(jnp.bfloat16).astype(jnp.float32)
    wq = weight.astype(jnp.bfloat16).astype(jnp.float32)
    ref_q = _reference(xq, wq, bias)
    assert jnp.allclose(out, ref_q, atol=2e-2, rtol=2e-2), "mismatch vs bf16-input reference"

    # Looser check vs the exact f32 PyTorch-equivalent reference; the slack is
    # the sanctioned bf16 quantization of x / w on the matmul + residual path.
    ref = _reference(x, weight, bias)
    assert jnp.allclose(out, ref, atol=5e-2, rtol=5e-2), "mismatch vs f32 reference"

    print("KERNEL_OK")
</pallas_src>

<mosaic_0001>
module attributes {stable_mosaic.version = 11 : i64} {
  func.func @residual_block_kernel(%arg0: i32, %arg1: memref<1x18x18x128xbf16, #tpu.memory_space<vmem>>, %arg2: memref<3x384x128xbf16, #tpu.memory_space<vmem>>, %arg3: memref<1x16x16x128xf32, #tpu.memory_space<vmem>>) attributes {dimension_semantics = [#tpu.dimension_semantics<parallel>], iteration_bounds = array<i64: 2>, scalar_prefetch = 0 : i64, scratch_operands = 0 : i64, tpu.core_type = #tpu.core_type<tc>, window_params = [{transform_indices = @transform_0, window_bounds = array<i64: 1, 18, 18, 128>}, {pipeline_mode = #tpu.pipeline_mode<synchronous>, transform_indices = @transform_1, window_bounds = array<i64: 3, 384, 128>}, {transform_indices = @transform_2, window_bounds = array<i64: 1, 16, 16, 128>}]} {
    %cst = arith.constant 0.000000e+00 : f32
    %0 = vector.broadcast %cst : f32 to vector<256x128xf32>
    %c0 = arith.constant 0 : index
    %c0_0 = arith.constant 0 : index
    %c0_1 = arith.constant 0 : index
    %c0_2 = arith.constant 0 : index
    %1 = vector.load %arg1[%c0, %c0_0, %c0_1, %c0_2] : memref<1x18x18x128xbf16, #tpu.memory_space<vmem>>, vector<1x16x16x128xbf16>
    %2 = vector.shape_cast %1 : vector<1x16x16x128xbf16> to vector<16x16x128xbf16>
    %3 = vector.shape_cast %2 : vector<16x16x128xbf16> to vector<256x128xbf16>
    %c0_3 = arith.constant 0 : index
    %c0_4 = arith.constant 0 : index
    %c1 = arith.constant 1 : index
    %c0_5 = arith.constant 0 : index
    %4 = vector.load %arg1[%c0_3, %c0_4, %c1, %c0_5] : memref<1x18x18x128xbf16, #tpu.memory_space<vmem>>, vector<1x16x16x128xbf16>
    %5 = vector.shape_cast %4 : vector<1x16x16x128xbf16> to vector<16x16x128xbf16>
    %6 = vector.shape_cast %5 : vector<16x16x128xbf16> to vector<256x128xbf16>
    %c0_6 = arith.constant 0 : index
    %c0_7 = arith.constant 0 : index
    %c2 = arith.constant 2 : index
    %c0_8 = arith.constant 0 : index
    %7 = vector.load %arg1[%c0_6, %c0_7, %c2, %c0_8] : memref<1x18x18x128xbf16, #tpu.memory_space<vmem>>, vector<1x16x16x128xbf16>
    %8 = vector.shape_cast %7 : vector<1x16x16x128xbf16> to vector<16x16x128xbf16>
    %9 = vector.shape_cast %8 : vector<16x16x128xbf16> to vector<256x128xbf16>
    %10 = tpu.concatenate %3, %6, %9 in 1 : vector<256x128xbf16>, vector<256x128xbf16>, vector<256x128xbf16> -> vector<256x384xbf16>
    %c0_9 = arith.constant 0 : index
    %c0_10 = arith.constant 0 : index
    %c0_11 = arith.constant 0 : index
    %11 = vector.load %arg2[%c0_9, %c0_10, %c0_11] : memref<3x384x128xbf16, #tpu.memory_space<vmem>>, vector<1x384x128xbf16>
    %12 = vector.shape_cast %11 : vector<1x384x128xbf16> to vector<384x128xbf16>
    %cst_12 = arith.constant dense<0.000000e+00> : vector<256x128xf32>
    %13 = tpu.matmul %10, %12, %cst_12 {dimension_numbers = #tpu.dot_dimension_numbers<[1], [0], [0], [1], [0, 0, 1, 1], [], []>} : vector<256x384xbf16>, vector<384x128xbf16>, vector<256x128xf32> -> vector<256x128xf32>
    %14 = arith.addf %0, %13 : vector<256x128xf32>
    %c0_13 = arith.constant 0 : index
    %c1_14 = arith.constant 1 : index
    %c0_15 = arith.constant 0 : index
    %c0_16 = arith.constant 0 : index
    %15 = vector.load %arg1[%c0_13, %c1_14, %c0_15, %c0_16] : memref<1x18x18x128xbf16, #tpu.memory_space<vmem>>, vector<1x16x16x128xbf16>
    %16 = vector.shape_cast %15 : vector<1x16x16x128xbf16> to vector<16x16x128xbf16>
    %17 = vector.shape_cast %16 : vector<16x16x128xbf16> to vector<256x128xbf16>
    %c0_17 = arith.constant 0 : index
    %c1_18 = arith.constant 1 : index
    %c1_19 = arith.constant 1 : index
    %c0_20 = arith.constant 0 : index
    %18 = vector.load %arg1[%c0_17, %c1_18, %c1_19, %c0_20] : memref<1x18x18x128xbf16, #tpu.memory_space<vmem>>, vector<1x16x16x128xbf16>
    %19 = vector.shape_cast %18 : vector<1x16x16x128xbf16> to vector<16x16x128xbf16>
    %20 = vector.shape_cast %19 : vector<16x16x128xbf16> to vector<256x128xbf16>
    %c0_21 = arith.constant 0 : index
    %c1_22 = arith.constant 1 : index
    %c2_23 = arith.constant 2 : index
    %c0_24 = arith.constant 0 : index
    %21 = vector.load %arg1[%c0_21, %c1_22, %c2_23, %c0_24] : memref<1x18x18x128xbf16, #tpu.memory_space<vmem>>, vector<1x16x16x128xbf16>
    %22 = vector.shape_cast %21 : vector<1x16x16x128xbf16> to vector<16x16x128xbf16>
    %23 = vector.shape_cast %22 : vector<16x16x128xbf16> to vector<256x128xbf16>
    %24 = tpu.concatenate %17, %20, %23 in 1 : vector<256x128xbf16>, vector<256x128xbf16>, vector<256x128xbf16> -> vector<256x384xbf16>
    %c1_25 = arith.constant 1 : index
    %c0_26 = arith.constant 0 : index
    %c0_27 = arith.constant 0 : index
    %25 = vector.load %arg2[%c1_25, %c0_26, %c0_27] : memref<3x384x128xbf16, #tpu.memory_space<vmem>>, vector<1x384x128xbf16>
    %26 = vector.shape_cast %25 : vector<1x384x128xbf16> to vector<384x128xbf16>
    %cst_28 = arith.constant dense<0.000000e+00> : vector<256x128xf32>
    %27 = tpu.matmul %24, %26, %cst_28 {dimension_numbers = #tpu.dot_dimension_numbers<[1], [0], [0], [1], [0, 0, 1, 1], [], []>} : vector<256x384xbf16>, vector<384x128xbf16>, vector<256x128xf32> -> vector<256x128xf32>
    %28 = arith.addf %14, %27 : vector<256x128xf32>
    %c0_29 = arith.constant 0 : index
    %c2_30 = arith.constant 2 : index
    %c0_31 = arith.constant 0 : index
    %c0_32 = arith.constant 0 : index
    %29 = vector.load %arg1[%c0_29, %c2_30, %c0_31, %c0_32] : memref<1x18x18x128xbf16, #tpu.memory_space<vmem>>, vector<1x16x16x128xbf16>
    %30 = vector.shape_cast %29 : vector<1x16x16x128xbf16> to vector<16x16x128xbf16>
    %31 = vector.shape_cast %30 : vector<16x16x128xbf16> to vector<256x128xbf16>
    %c0_33 = arith.constant 0 : index
    %c2_34 = arith.constant 2 : index
    %c1_35 = arith.constant 1 : index
    %c0_36 = arith.constant 0 : index
    %32 = vector.load %arg1[%c0_33, %c2_34, %c1_35, %c0_36] : memref<1x18x18x128xbf16, #tpu.memory_space<vmem>>, vector<1x16x16x128xbf16>
    %33 = vector.shape_cast %32 : vector<1x16x16x128xbf16> to vector<16x16x128xbf16>
    %34 = vector.shape_cast %33 : vector<16x16x128xbf16> to vector<256x128xbf16>
    %c0_37 = arith.constant 0 : index
    %c2_38 = arith.constant 2 : index
    %c2_39 = arith.constant 2 : index
    %c0_40 = arith.constant 0 : index
    %35 = vector.load %arg1[%c0_37, %c2_38, %c2_39, %c0_40] : memref<1x18x18x128xbf16, #tpu.memory_space<vmem>>, vector<1x16x16x128xbf16>
    %36 = vector.shape_cast %35 : vector<1x16x16x128xbf16> to vector<16x16x128xbf16>
    %37 = vector.shape_cast %36 : vector<16x16x128xbf16> to vector<256x128xbf16>
    %38 = tpu.concatenate %31, %34, %37 in 1 : vector<256x128xbf16>, vector<256x128xbf16>, vector<256x128xbf16> -> vector<256x384xbf16>
    %c2_41 = arith.constant 2 : index
    %c0_42 = arith.constant 0 : index
    %c0_43 = arith.constant 0 : index
    %39 = vector.load %arg2[%c2_41, %c0_42, %c0_43] : memref<3x384x128xbf16, #tpu.memory_space<vmem>>, vector<1x384x128xbf16>
    %40 = vector.shape_cast %39 : vector<1x384x128xbf16> to vector<384x128xbf16>
    %cst_44 = arith.constant dense<0.000000e+00> : vector<256x128xf32>
    %41 = tpu.matmul %38, %40, %cst_44 {dimension_numbers = #tpu.dot_dimension_numbers<[1], [0], [0], [1], [0, 0, 1, 1], [], []>} : vector<256x384xbf16>, vector<384x128xbf16>, vector<256x128xf32> -> vector<256x128xf32>
    %42 = arith.addf %28, %41 : vector<256x128xf32>
    %cst_45 = arith.constant dense<0.000000e+00> : vector<128xf32>
    %43 = vector.multi_reduction <add>, %42, %cst_45 [0] : vector<256x128xf32> to vector<128xf32>
    %44 = vector.shape_cast %43 : vector<128xf32> to vector<1x128xf32>
    %cst_46 = arith.constant 3.906250e-03 : f32
    %45 = vector.broadcast %cst_46 : f32 to vector<1x128xf32>
    %46 = arith.mulf %44, %45 : vector<1x128xf32>
    %47 = arith.mulf %42, %42 : vector<256x128xf32>
    %cst_47 = arith.constant dense<0.000000e+00> : vector<128xf32>
    %48 = vector.multi_reduction <add>, %47, %cst_47 [0] : vector<256x128xf32> to vector<128xf32>
    %49 = vector.shape_cast %48 : vector<128xf32> to vector<1x128xf32>
    %cst_48 = arith.constant 3.906250e-03 : f32
    %50 = vector.broadcast %cst_48 : f32 to vector<1x128xf32>
    %51 = arith.mulf %49, %50 : vector<1x128xf32>
    %52 = arith.mulf %46, %46 : vector<1x128xf32>
    %53 = arith.subf %51, %52 : vector<1x128xf32>
    %cst_49 = arith.constant 0.000000e+00 : f32
    %54 = vector.broadcast %cst_49 : f32 to vector<1x128xf32>
    %55 = arith.maximumf %53, %54 : vector<1x128xf32>
    %56 = vector.broadcast %46 : vector<1x128xf32> to vector<256x128xf32>
    %57 = arith.subf %42, %56 : vector<256x128xf32>
    %cst_50 = arith.constant 9.99999974E-6 : f32
    %58 = vector.broadcast %cst_50 : f32 to vector<1x128xf32>
    %59 = arith.addf %55, %58 : vector<1x128xf32>
    %60 = math.rsqrt %59 : vector<1x128xf32>
    %61 = vector.broadcast %60 : vector<1x128xf32> to vector<256x128xf32>
    %62 = arith.mulf %57, %61 : vector<256x128xf32>
    %cst_51 = arith.constant 0.000000e+00 : f32
    %63 = vector.broadcast %cst_51 : f32 to vector<256x128xf32>
    %64 = arith.maximumf %62, %63 : vector<256x128xf32>
    %65 = arith.extf %20 : vector<256x128xbf16> to vector<256x128xf32>
    %66 = arith.addf %65, %64 : vector<256x128xf32>
    %67 = vector.shape_cast %66 : vector<256x128xf32> to vector<16x16x128xf32>
    %c0_52 = arith.constant 0 : index
    %c0_53 = arith.constant 0 : index
    %c0_54 = arith.constant 0 : index
    %c0_55 = arith.constant 0 : index
    %68 = vector.load %arg3[%c0_52, %c0_53, %c0_54, %c0_55] : memref<1x16x16x128xf32, #tpu.memory_space<vmem>>, vector<1x16x16x128xf32>
    %69 = vector.shape_cast %68 : vector<1x16x16x128xf32> to vector<16x16x128xf32>
    %70 = vector.shape_cast %67 : vector<16x16x128xf32> to vector<1x16x16x128xf32>
    tpu.vector_store %arg3[%c0_52, %c0_53, %c0_54, %c0_55], %70 {strides = array<i32>} : memref<1x16x16x128xf32, #tpu.memory_space<vmem>>, vector<1x16x16x128xf32>,
    return
  }
  func.func @transform_0(%arg0: i32) -> (i32, i32, i32, i32) {
    %c0_i32 = arith.constant 0 : i32
    %c0_i32_0 = arith.constant 0 : i32
    %c0_i32_1 = arith.constant 0 : i32
    %c0_i32_2 = arith.constant 0 : i32
    return %arg0, %c0_i32, %c0_i32_0, %c0_i32_1 : i32, i32, i32, i32
  }
  func.func @transform_1(%arg0: i32) -> (i32, i32, i32) {
    %c0_i32 = arith.constant 0 : i32
    %c0_i32_0 = arith.constant 0 : i32
    %c0_i32_1 = arith.constant 0 : i32
    %c0_i32_2 = arith.constant 0 : i32
    return %c0_i32, %c0_i32_0, %c0_i32_1 : i32, i32, i32
  }
  func.func @transform_2(%arg0: i32) -> (i32, i32, i32, i32) {
    %c0_i32 = arith.constant 0 : i32
    %c0_i32_0 = arith.constant 0 : i32
    %c0_i32_1 = arith.constant 0 : i32
    %c0_i32_2 = arith.constant 0 : i32
    return %arg0, %c0_i32, %c0_i32_0, %c0_i32_1 : i32, i32, i32, i32
  }
}

</mosaic_0001>

<bundles_post_ra>
// kernel: tpu_custom_call.1
= control target key start
LH: loop header
LB: loop body
LE: loop exit
PB: predicated region body
PF: predicated region fallthrough
CT: control target
= control target key end

     0   :  { %7 = vsyncpa [#allocation3], 0  ;;  %s8650_s0 = inlined_call_operand.vmem [shape: bf16[2,18,18,128], index: 0, kind: input, shape index: {}]   ;;  %s8651_s1 = inlined_call_operand.vmem [shape: bf16[3,384,128], index: 1, kind: input, shape index: {}]   ;;  %s8652_s2 = inlined_call_operand.hbm [shape: f32[2,16,16,128], index: 2, kind: output, shape index: {}]  }
   0x1   :  { %9 = vsyncpa [#allocation3 + $0x1], 0  ;;  %s6113_s9 = smov 0   ;;  %s6115_s10 = smov 0  }
   0x2   :  { %s6117_s11 = smov 0   ;;  %s6119_s12 = smov 0  }
   0x3 LB: > { %s6134_s13 = sadd.s32 4294967295, %s6093_s12   ;;  %s4588_s14 = sadd.s32 4294967294, %s6093_s12   ;;  %s6093_s12 = sphi %s6119_s12, %s8858_s12   ;;  %s6089_s11 = sphi %s6117_s11, %s8857_s11   ;;  %s6085_s10 = sphi %s6115_s10, %s8856_s10   ;;  %s6081_s9 = sphi %s6113_s9, %s8855_s9  }
   0x4   : > { %s6138_s15 = sadd.s32 1, %s6093_s12   ;;  %s69_s16 = sadd.s32 1, %s6089_s11 }
   0x5   : > { %s66_s17 = ssub.s32 %s6093_s12, %s6138_s15  ;;  %p79_p0 = scmp.ne.s32.totalorder %s6089_s11, %s6085_s10 }
   0x6   : > { %p67_p1 = scmp.eq.s32.totalorder %s66_s17, 0  ;;  %p80_p2 = scmp.eq.s32.totalorder %s6134_s13, 1 }
   0x7   : > { %p85_p3 = scmp.ne.s32.totalorder %s6085_s10, %s6081_s9  ;;  %p86_p4 = scmp.eq.s32.totalorder %s4588_s14, 1 }
   0x8   : > { %s6149_s18 = scalar_select %p67_p1, %s6089_s11, %s69_s16  }
   0x9   : > { %p6151_p5 = por %p80_p2, %p79_p0  ;;  %p6155_p6 = por %p86_p4, %p85_p3 }
   0xa   : > { %p4591_p7 = scmp.ge.s32.totalorder %s6093_s12, 1  ;;  %p115_p8 = scmp.lt.s32.totalorder %s6093_s12, 3 }
   0xc   : > { %p116_p9 = pnand %p4591_p7, %p115_p8 }
   0xe   : > { %119 = sbr.rel (%p116_p9) target bundleno = 665 (0x299), region = 28 }
  0x15   : > { %v5858_v0 = vld [vmem:[%s8651_s1 + $0x100] sm:$0xff]   ;;  %v5861_v3 = vld [vmem:[%s8651_s1 + $0x108] sm:$0xff]   ;;  %v5864_v6 = vld [vmem:[%s8651_s1 + $0x110] sm:$0xff]   ;;  %p137_p10 = scmp.lt.s32.totalorder %s6134_s13, 1  ;;  %vm642_vm0 = vcmask 1042432   ;;  %vm643_vm1 = vcmask 1046532  }
  0x16   : > { %v6167_v1 = vld [vmem:[%s8651_s1 + $0x140] sm:$0xff]   ;;  %5088 = vmatprep.subr.bf16.mxu0 %v5858_v0  ;;  %v6180_v4 = vld [vmem:[%s8651_s1 + $0x148] sm:$0xff]   ;;  %v6192_v7 = vld [vmem:[%s8651_s1 + $0x150] sm:$0xff]   ;;  %vm191_vm2 = vsmask.f32 3328  ;;  %s5087_s28 = sshll.u32 %s6134_s13, 12 }
  0x17   : > { %v5860_v2 = vld [vmem:[%s8651_s1 + $0xc0] sm:$0xff]   ;;  %5640 = vmatprep.subr.bf16.mxu1 %v6167_v1  ;;  %v5863_v5 = vld [vmem:[%s8651_s1 + $0xc8] sm:$0xff]   ;;  %v5866_v8 = vld [vmem:[%s8651_s1 + $0xd0] sm:$0xff]   ;;  %s138_s30 = scalar_select %p137_p10, %s6134_s13, 1  ;;  %vm192_vm3 = vsmask.f32 7440 }
  0x18   : > { %5089 = vmatpush3.bf16.msra.mxu0 %v5860_v2  ;;  %5648 = vmatpush3.bf16.msra.mxu1 %v6167_v1  ;;  %v5867_v9 = vld [vmem:[%s8651_s1 + $0x118] sm:$0xff]   ;;  %v5870_v12 = vld [vmem:[%s8651_s1 + $0x120] sm:$0xff]   ;;  %v5873_v15 = vld [vmem:[%s8651_s1 + $0x128] sm:$0xff]   ;;  %s8583_s3 = scalar_lea.hbm %s8652_s2, %s5087_s28  ;;  %s6095_s6 = smov [#allocation2]  }
  0x19   : > { %5090 = vmatprep.subr.bf16.mxu0 %v5861_v3  ;;  %5641 = vmatprep.subr.bf16.mxu1 %v6180_v4  ;;  %v6206_v10 = vld [vmem:[%s8651_s1 + $0x158] sm:$0xff]   ;;  %v6219_v13 = vld [vmem:[%s8651_s1 + $0x160] sm:$0xff]   ;;  %v6233_v16 = vld [vmem:[%s8651_s1 + $0x168] sm:$0xff]   ;;  %s5816_s14 = smul.u32 216, %s138_s30  ;;  %s6035_s7 = sshll.u32 %s6095_s6, 4  ;;  %s6036_s7 = int_to_ptr.vmem [resolvable:$false] %s6035_s7 }
  0x1a   : > { %v5869_v11 = vld [vmem:[%s8651_s1 + $0xd8] sm:$0xff]   ;;  %v5872_v14 = vld [vmem:[%s8651_s1 + $0xe0] sm:$0xff]   ;;  %v5875_v17 = vld [vmem:[%s8651_s1 + $0xe8] sm:$0xff]   ;;  %s6037_s8 = scalar_lea.vmem %s6036_s7, 8192 }
  0x1b   : > { %v5876_v18 = vld [vmem:[%s8651_s1 + $0x130] sm:$0xff]   ;;  %s6251_s27 = scalar_lea.vmem %s8650_s0, %s5816_s14  ;;  %v5879_v21 = vld [vmem:[%s8651_s1 + $0x138] sm:$0xff]   ;;  %vm6290_vm4 = vmor %vm642_vm0, %vm643_vm1 }
  0x1c   : > { %5091 = vmatpush3.bf16.msra.mxu0 %v5863_v5  ;;  %5649 = vmatpush3.bf16.msra.mxu1 %v6180_v4  ;;  %v6246_v19 = vld [vmem:[%s8651_s1 + $0x170] sm:$0xff]   ;;  %v6262_v22 = vld [vmem:[%s8651_s1 + $0x178] sm:$0xff]   ;;  %v6266_v23 = vld [vmem:[%s6251_s27 + $0xc] sm:$0xf] }
  0x1d   : > { %5092 = vmatprep.subr.bf16.mxu0 %v5864_v6  ;;  %5642 = vmatprep.subr.bf16.mxu1 %v6192_v7  ;;  %v5878_v20 = vld [vmem:[%s8651_s1 + $0xf0] sm:$0xff]   ;;  %v1063_v26 = vshrl.u32 %v6266_v23, 16  ;;  %v1066_v27 = vshll.u32 %v6266_v23, 16  ;;  %v4714_v35 = vld [vmem:[%s6251_s27 + $0x6c] sm:$0xe]  ;;  %v5881_v36 = vld [vmem:[%s8651_s1 + $0xf8] sm:$0xff]  }
  0x1e   : > { %v6270_v24 = vld [vmem:[%s6251_s27 + $0x10] sm:$0xf]  ;;  %v4690_v25 = vld [vmem:[%s6251_s27 + $0x14] sm:$0x1]  ;;  %v6295_v40 = vld [vmem:[%s6251_s27 + $0x7c] sm:$0xf] }
  0x1f   : > { %v1072_v28 = vshll.u32 %v6270_v24, 16  ;;  %v1076_v29 = vshrl.u32 %v6270_v24, 16  ;;  %v1082_v30 = vshll.u32 %v4690_v25, 16  ;;  %v6278_v31 = vld [vmem:[%s6251_s27 + $0x70] sm:$0xf]  ;;  %v1065_v32 = vrot.slane %v1063_v26, 4  ;;  %vm6306_vm5 = vmor %vm191_vm2, %vm192_vm3 }
  0x20   : > { %5093 = vmatpush3.bf16.msra.mxu0 %v5866_v8  ;;  %5650 = vmatpush3.bf16.msra.mxu1 %v6192_v7  ;;  %v1068_v33 = vrot.slane %v1066_v27, 5  ;;  %v6281_v34 = vld [vmem:[%s6251_s27 + $0x74] sm:$0x1]  ;;  %v4730_v42 = vrot.slane %v4714_v35, 9  ;;  %v1600_v43 = vrot.slane %v6278_v31, 5  ;;  %v5883_v46 = vld [vmem:[%s8651_s1 + $0x40] sm:$0xff]   ;;  %v4738_v2 = vcombine.low %v6266_v23, %v6270_v24 }
  0x21   : > { %5094 = vmatprep.subr.bf16.mxu0 %v5867_v9  ;;  %5643 = vmatprep.subr.bf16.mxu1 %v6206_v10  ;;  %v1074_v37 = vrot.slane %v1072_v28, 5  ;;  %v1078_v38 = vrot.slane %v1076_v29, 4  ;;  %v1603_v44 = vrot.slane %v6281_v34, 5  ;;  %v4699_v45 = vld [vmem:[%s6251_s27 + $0x80] sm:$0x1]  ;;  %v1084_v49 = vrot.slane %v1082_v30, 5 }
  0x22   : > { %v1069_v41 = vor.u32 %v1068_v33, %v1065_v32  ;;  %v4715_v50 = vld [vmem:[%s6251_s27 + $0x78] sm:$0xe]  ;;  %v1607_v51 = vrot.slane %v6295_v40, 5  ;;  %v1610_v52 = vrot.slane %v4699_v45, 5  ;;  %v1601_v54 = vsel %vm6290_vm4, %v4730_v42, %v1600_v43  ;;  %v5884_v59 = vld [vmem:[%s8651_s1] sm:$0xff]   ;;  %v5885_v5 = vld [vmem:[%s8651_s1 + $0x48] sm:$0xff]  }
  0x23   : > { %v1079_v48 = vor.u32 %v1078_v38, %v1074_v37  ;;  %v1602_v55 = vrot.slane %v1600_v43, 4  ;;  %v4731_v56 = vrot.slane %v4715_v50, 9  ;;  %v6341_v9 = vld [vmem:[%s6251_s27 + $0x18] sm:$0xf]  ;;  %v4700_v24 = vld [vmem:[%s6251_s27 + $0x8c] sm:$0x1] }
  0x24   : > { %5095 = vmatpush3.bf16.msra.mxu0 %v5869_v11  ;;  %5651 = vmatpush3.bf16.msra.mxu1 %v6206_v10  ;;  %v1070_v53 = vrot.slane %v1069_v41, 4  ;;  %v1609_v58 = vrot.slane %v1607_v51, 4  ;;  %v6344_v11 = vld [vmem:[%s6251_s27 + $0x1c] sm:$0xf]  ;;  %v4716_v25 = vld [vmem:[%s6251_s27 + $0x84] sm:$0xe] }
  0x25   : > { %5096 = vmatprep.subr.bf16.mxu0 %v5870_v12  ;;  %5644 = vmatprep.subr.bf16.mxu1 %v6219_v13  ;;  %v1080_v57 = vrot.slane %v1079_v48, 4  ;;  %v1604_v61 = vsel %vm6290_vm4, %v1602_v55, %v1603_v44  ;;  %v1608_v62 = vsel %vm6290_vm4, %v4731_v56, %v1607_v51  ;;  %v4691_v12 = vld [vmem:[%s6251_s27 + $0x20] sm:$0x1]  ;;  %v4681_v30 = vld [vmem:[%s6251_s27 + $0x94] sm:$0xf]  ;;  %v4732_v33 = vrot.slane %v4716_v25, 9 }
  0x26   : > { %v6320_v60 = vsel %vm6306_vm5, %v1070_v53, %v1074_v37  ;;  %v4778_v0 = vcombine.low %v1601_v54, %v1604_v61  ;;  %v1611_v3 = vsel %vm6290_vm4, %v1609_v58, %v1610_v52  ;;  %v1106_v23 = vshll.u32 %v4691_v12, 16  ;;  %v4701_v37 = vld [vmem:[%s6251_s27 + $0x98] sm:$0x1]  ;;  %v4717_v42 = vld [vmem:[%s6251_s27 + $0x90] sm:$0xe] }
  0x27   : > { %8722 = vst [vmem:[#allocation5_spill] sm:$0xff] %v6320_v60  ;;  %v6329_v63 = vsel %vm6306_vm5, %v1080_v57, %v1084_v49  ;;  %v4779_v8 = vcombine.low %v1608_v62, %v1611_v3  ;;  %v1621_v43 = vrot.slane %v4681_v30, 5  ;;  %v1624_v44 = vrot.slane %v4701_v37, 5  ;;  %v5889_v49 = vld [vmem:[%s8651_s1 + $0x10] sm:$0xff]   ;;  %v5890_v53 = vld [vmem:[%s8651_s1 + $0x58] sm:$0xff]  }
  0x28   : > { %5097 = vmatpush3.bf16.msra.mxu0 %v5872_v14  ;;  %5652 = vmatpush3.bf16.msra.mxu1 %v6219_v13  ;;  %8723 = vst [vmem:[#allocation6_spill] sm:$0xff] %v6329_v63  ;;  %v4754_v6 = vcombine.low %v6320_v60, %v6329_v63  ;;  %v1087_v14 = vshrl.u32 %v6341_v9, 16  ;;  %v1108_v32 = vrot.slane %v1106_v23, 5  ;;  %v4733_v48 = vrot.slane %v4717_v42, 9  ;;  %v5891_v62 = vld [vmem:[%s8651_s1 + $0x18] sm:$0xff]  }
  0x29   : > { %5098 = vmatprep.subr.bf16.mxu0 %v5873_v15  ;;  %5645 = vmatprep.subr.bf16.mxu1 %v6233_v16  ;;  %v1090_v15 = vshll.u32 %v6341_v9, 16  ;;  %v1623_v52 = vrot.slane %v1621_v43, 4  ;;  %v4739_v55 = vcombine.low %v6341_v9, %v6344_v11  ;;  %v6400_v3 = vld [vmem:[%s6251_s27 + $0x28] sm:$0xf]  ;;  %v4683_v12 = vld [vmem:[%s6251_s27 + $0xa0] sm:$0xf] }
  0x2a   : > { %5528 = vmatprep.mubr.bf16.mxu1 %v4778_v0  ;;  %2087 = vmatprep.mubr.bf16.mxu0 %v4754_v6  ;;  %v1089_v26 = vrot.slane %v1087_v14, 4  ;;  %v1622_v56 = vsel %vm6290_vm4, %v4733_v48, %v1621_v43  ;;  %v1120_v9 = vshll.u32 %v6400_v3, 16  ;;  %v4685_v25 = vld [vmem:[%s6251_s27 + $0xac] sm:$0xf]  ;;  %v4703_v30 = vld [vmem:[%s6251_s27 + $0xb0] sm:$0x1] }
  0x2b   : > { %v1092_v27 = vrot.slane %v1090_v15, 5  ;;  %v1625_v61 = vsel %vm6290_vm4, %v1623_v52, %v1624_v44  ;;  %v4702_v15 = vld [vmem:[%s6251_s27 + $0xa4] sm:$0x1]  ;;  %v1638_v37 = vrot.slane %v4703_v30, 5 }
  0x2c   : > { %5099 = vmatpush3.bf16.msra.mxu0 %v5875_v17  ;;  %5653 = vmatpush3.bf16.msra.mxu1 %v6233_v16  ;;  %v1096_v17 = vshll.u32 %v6344_v11, 16  ;;  %v4781_v0 = vcombine.low %v1622_v56, %v1625_v61  ;;  %v1122_v23 = vrot.slane %v1120_v9, 5  ;;  %v5893_v43 = vld [vmem:[%s8651_s1 + $0x60] sm:$0xff]   ;;  %v6449_v56 = vld [vmem:[%s6251_s27 + $0x30] sm:$0xf] }
  0x2d   : > { %5100 = vmatprep.subr.bf16.mxu0 %v5876_v18  ;;  %5646 = vmatprep.subr.bf16.mxu1 %v6246_v19  ;;  %v1100_v18 = vshrl.u32 %v6344_v11, 16  ;;  %v1093_v38 = vor.u32 %v1092_v27, %v1089_v26  ;;  %v1124_v11 = vshrl.u32 %v6400_v3, 16  ;;  %v5894_v48 = vld [vmem:[%s8651_s1 + $0x20] sm:$0xff]   ;;  %v4693_v61 = vld [vmem:[%s6251_s27 + $0x38] sm:$0x1] }
  0x2e   : > { %v1098_v28 = vrot.slane %v1096_v17, 5  ;;  %v4718_v17 = vld [vmem:[%s6251_s27 + $0x9c] sm:$0xe] }
  0x2f   : > { %v1102_v29 = vrot.slane %v1100_v18, 4  ;;  %v1094_v50 = vrot.slane %v1093_v38, 4  ;;  %v1628_v18 = vrot.slane %v4683_v12, 5  ;;  %v4734_v27 = vrot.slane %v4718_v17, 9  ;;  %v4689_v17 = vld [vmem:[%s6251_s27 + $0xc4] sm:$0xf] }
  0x30   : > { %5101 = vmatpush3.bf16.msra.mxu0 %v5878_v20  ;;  %5654 = vmatpush3.bf16.msra.mxu1 %v6246_v19  ;;  %v4679_v20 = vld [vmem:[%s6251_s27 + $0x88] sm:$0xf] }
  0x31   : > { %5102 = vmatprep.subr.bf16.mxu0 %v5879_v21  ;;  %5647 = vmatprep.subr.bf16.mxu1 %v6262_v22  ;;  %v5886_v21 = vld [vmem:[%s8651_s1 + $0x8] sm:$0xff]   ;;  %v1614_v35 = vrot.slane %v4679_v20, 5  ;;  %v1103_v41 = vor.u32 %v1102_v29, %v1098_v28  ;;  %v6382_v57 = vsel %vm6306_vm5, %v1094_v50, %v1098_v28  ;;  %v1630_v28 = vrot.slane %v1628_v18, 4 }
  0x32   : > { %8724 = vst [vmem:[#allocation7_spill] sm:$0xff] %v6382_v57  ;;  %v1631_v29 = vrot.slane %v4702_v15, 5  ;;  %v1629_v38 = vsel %vm6290_vm4, %v4734_v27, %v1628_v18  ;;  %v5895_v50 = vld [vmem:[%s8651_s1 + $0x68] sm:$0xff]   ;;  %v4721_v27 = vld [vmem:[%s6251_s27 + $0xc0] sm:$0xe] }
  0x33   : > { %v1615_v45 = vsel %vm6290_vm4, %v4732_v33, %v1614_v35  ;;  %v1104_v51 = vrot.slane %v1103_v41, 4 }
  0x34   : > { %5103 = vmatpush3.bf16.msra.mxu0 %v5881_v36  ;;  %5655 = vmatpush3.bf16.msra.mxu1 %v6262_v22  ;;  %v1617_v36 = vrot.slane %v4700_v24, 5  ;;  %v1126_v24 = vrot.slane %v1124_v11, 4  ;;  %v1632_v41 = vsel %vm6290_vm4, %v1630_v28, %v1631_v29  ;;  %v1649_v28 = vrot.slane %v4689_v17, 5 }
  0x35   : > { %5496 = vmatprep.subr.bf16.mxu0 %v6167_v1  ;;  %5224 = vmatprep.subr.bf16.mxu1 %v5883_v46  ;;  %v1616_v46 = vrot.slane %v1614_v35, 4  ;;  %v6386_v58 = vsel %vm6306_vm5, %v1104_v51, %v1108_v32  ;;  %v4719_v35 = vld [vmem:[%s6251_s27 + $0xa8] sm:$0xe] }
  0x36   : > { %8725 = vst [vmem:[#allocation8_spill] sm:$0xff] %v6386_v58  ;;  %v1127_v33 = vor.u32 %v1126_v24, %v1122_v23  ;;  %v4735_v42 = vrot.slane %v4719_v35, 9  ;;  %v4705_v24 = vld [vmem:[%s6251_s27 + $0xc8] sm:$0x1]  ;;  %v5898_v35 = vld [vmem:[%s8651_s1 + $0x70] sm:$0xff]  }
  0x37   : > { %5529 = vmatmul.mubr.bf16.vlgmr.msra.gmra.mrb[0].mxu1 %v4779_v8  ;;  %2088 = vmatmul.mubr.bf16.vlgmr.msra.gmra.mrb[0].mxu0 %v4738_v2  ;;  %v1618_v54 = vsel %vm6290_vm4, %v1616_v46, %v1617_v36  ;;  %v6397_v2 = vld [vmem:[%s6251_s27 + $0x24] sm:$0xf]  ;;  %v1635_v36 = vrot.slane %v4685_v25, 5  ;;  %v1652_v29 = vrot.slane %v4705_v24, 5 }
  0x38   : > { %5225 = vmatpush3.bf16.msra.mxu1 %v5884_v59  ;;  %5497 = vmatpush3.bf16.msra.mxu0 %v6167_v1  ;;  %v5888_v1 = vld [vmem:[%s8651_s1 + $0x50] sm:$0xff]   ;;  %v4780_v59 = vcombine.low %v1615_v45, %v1618_v54  ;;  %v1111_v6 = vshrl.u32 %v6397_v2, 16  ;;  %v1114_v8 = vshll.u32 %v6397_v2, 16  ;;  %v1128_v44 = vrot.slane %v1127_v33, 4  ;;  %v5896_v54 = vld [vmem:[%s8651_s1 + $0x28] sm:$0xff]  }
  0x39   : > { %5226 = vmatprep.subr.bf16.mxu1 %v5885_v5  ;;  %5498 = vmatprep.subr.bf16.mxu0 %v6180_v4  ;;  %v4692_v5 = vld [vmem:[%s6251_s27 + $0x2c] sm:$0x1]  ;;  %v4782_v45 = vcombine.low %v1629_v38, %v1632_v41  ;;  %v1637_v46 = vrot.slane %v1635_v36, 4  ;;  %v4737_v33 = vrot.slane %v4721_v27, 9  ;;  %v1651_v38 = vrot.slane %v1649_v28, 4  ;;  %v5899_v41 = vld [vmem:[%s8651_s1 + $0x30] sm:$0xff]  }
  0x3a   : > { %5532 = vmatprep.mubr.bf16.mxu1 %v4780_v59  ;;  %v1130_v14 = vshll.u32 %v4692_v5, 16  ;;  %v1113_v20 = vrot.slane %v1111_v6, 4  ;;  %v6452_v59 = vld [vmem:[%s6251_s27 + $0x34] sm:$0xf]  ;;  %v1154_v5 = vshll.u32 %v4693_v61, 16 }
  0x3b   : > { %v4704_v6 = vld [vmem:[%s6251_s27 + $0xbc] sm:$0x1] }
  0x3c   : > { %5227 = vmatpush3.bf16.msra.mxu1 %v5886_v21  ;;  %5499 = vmatpush3.bf16.msra.mxu0 %v6180_v4  ;;  %v4755_v4 = vcombine.low %v6382_v57, %v6386_v58  ;;  %v1116_v21 = vrot.slane %v1114_v8, 5  ;;  %v1132_v26 = vrot.slane %v1130_v14, 5  ;;  %v4720_v8 = vld [vmem:[%s6251_s27 + $0xb4] sm:$0xe]  ;;  %v1156_v18 = vrot.slane %v1154_v5, 5 }
  0x3d   : > { %5228 = vmatprep.subr.bf16.mxu1 %v5888_v1  ;;  %5500 = vmatprep.subr.bf16.mxu0 %v6192_v7  ;;  %v4740_v1 = vcombine.low %v6397_v2, %v6400_v3  ;;  %v1148_v2 = vshrl.u32 %v6452_v59, 16  ;;  %v4687_v3 = vld [vmem:[%s6251_s27 + $0xb8] sm:$0xf] }
  0x3e   : > { %2095 = vmatprep.mubr.bf16.mxu0 %v4755_v4  ;;  %v1117_v32 = vor.u32 %v1116_v21, %v1113_v20  ;;  %v6439_v52 = vsel %vm6306_vm5, %v1128_v44, %v1132_v26  ;;  %v1138_v4 = vshll.u32 %v6449_v56, 16  ;;  %v1642_v9 = vrot.slane %v4687_v3, 5 }
  0x3f   : > { %5533 = vmatmul.mubr.bf16.gmra.mrb[4].mxu1 %v4781_v0  ;;  %2096 = vmatmul.mubr.bf16.gmra.mrb[4].mxu0 %v4739_v55  ;;  %8727 = vst [vmem:[#allocation10_spill] sm:$0xff] %v6439_v52  ;;  %v1144_v0 = vshll.u32 %v6452_v59, 16  ;;  %v1150_v15 = vrot.slane %v1148_v2, 4  ;;  %v4736_v20 = vrot.slane %v4720_v8, 9 }
  0x40   : > { %5229 = vmatpush3.bf16.msra.mxu1 %v5889_v49  ;;  %5501 = vmatpush3.bf16.msra.mxu0 %v6192_v7  ;;  %v1118_v7 = vrot.slane %v1117_v32, 4  ;;  %v1636_v49 = vsel %vm6290_vm4, %v4735_v42, %v1635_v36  ;;  %v1140_v12 = vrot.slane %v1138_v4, 5  ;;  %v1644_v21 = vrot.slane %v1642_v9, 4  ;;  %v175_v4 = vld [vmem:[%s6251_s27 + $0x8] sm:$0x1] }
  0x41   : > { %5230 = vmatprep.subr.bf16.mxu1 %v5890_v53  ;;  %5502 = vmatprep.subr.bf16.mxu0 %v6206_v10  ;;  %v1639_v53 = vsel %vm6290_vm4, %v1637_v46, %v1638_v37  ;;  %v1146_v14 = vrot.slane %v1144_v0, 5  ;;  %v1643_v30 = vsel %vm6290_vm4, %v4736_v20, %v1642_v9  ;;  %v4741_v42 = vcombine.low %v6449_v56, %v6452_v59  ;;  %v6514_v59 = vld [vmem:[%s6251_s27] sm:$0xf] }
  0x42   : > { %v6435_v51 = vsel %vm6306_vm5, %v1118_v7, %v1122_v23  ;;  %5536 = vmatprep.mubr.bf16.mxu1 %v4782_v45  ;;  %v4783_v55 = vcombine.low %v1636_v49, %v1639_v53  ;;  %v1645_v23 = vrot.slane %v4704_v6, 5  ;;  %v5900_v7 = vld [vmem:[%s8651_s1 + $0x78] sm:$0xff]   ;;  %v1653_v46 = vsel %vm6290_vm4, %v1651_v38, %v1652_v29  ;;  %v4694_v53 = vld [vmem:[%s6251_s27 + $0x44] sm:$0x1]  ;;  %v4695_v38 = vld [vmem:[%s6251_s27 + $0x50] sm:$0x1] }
  0x43   : > { %8726 = vst [vmem:[#allocation9_spill] sm:$0xff] %v6435_v51  ;;  %v1151_v26 = vor.u32 %v1150_v15, %v1146_v14  ;;  %v6502_v49 = vld [vmem:[%s6251_s27 + $0x3c] sm:$0xf]  ;;  %v1178_v61 = vshll.u32 %v4694_v53, 16  ;;  %v195_v0 = vshrl.u32 %v6514_v59, 16  ;;  %v6528_v20 = vld [vmem:[%s8651_s1 + $0x80] sm:$0xff]  }
  0x44   : > { %5231 = vmatpush3.bf16.msra.mxu1 %v5891_v62  ;;  %5503 = vmatpush3.bf16.msra.mxu0 %v6206_v10  ;;  %v4756_v10 = vcombine.low %v6435_v51, %v6439_v52  ;;  %v1135_v62 = vshrl.u32 %v6449_v56, 16  ;;  %v1646_v32 = vsel %vm6290_vm4, %v1644_v21, %v1645_v23  ;;  %v6531_v21 = vld [vmem:[%s6251_s27 + $0x48] sm:$0xf] }
  0x45   : > { %5232 = vmatprep.subr.bf16.mxu1 %v5893_v43  ;;  %5504 = vmatprep.subr.bf16.mxu0 %v6219_v13  ;;  %v4784_v37 = vcombine.low %v1643_v30, %v1646_v32  ;;  %v1650_v43 = vsel %vm6290_vm4, %v4737_v33, %v1649_v28  ;;  %v1180_v8 = vrot.slane %v1178_v61, 5  ;;  %v197_v9 = vrot.slane %v195_v0, 4  ;;  %v176_v61 = vld [vmem:[%s6251_s27 + $0x14] sm:$0x1] }
  0x46   : > { %2103 = vmatprep.mubr.bf16.mxu0 %v4756_v10  ;;  %v1137_v11 = vrot.slane %v1135_v62, 4  ;;  %v1162_v10 = vshll.u32 %v6502_v49, 16  ;;  %v6517_v62 = vld [vmem:[%s6251_s27 + $0x4] sm:$0xf]  ;;  %v1183_v32 = vshrl.u32 %v6531_v21, 16  ;;  %v1186_v33 = vshll.u32 %v6531_v21, 16 }
  0x47   : > { %5537 = vmatmul.mubr.bf16.gmra.mrb[8].mxu1 %v4783_v55  ;;  %2104 = vmatmul.mubr.bf16.gmra.mrb[8].mxu0 %v4740_v1  ;;  %v4785_v1 = vcombine.low %v1650_v43, %v1653_v46  ;;  %v208_v17 = vshrl.u32 %v6517_v62, 16  ;;  %v6562_v46 = vld [vmem:[%s6251_s27 + $0x10] sm:$0xf] }
  0x48   : > { %5233 = vmatpush3.bf16.msra.mxu1 %v5894_v48  ;;  %5505 = vmatpush3.bf16.msra.mxu0 %v6219_v13  ;;  %v1141_v25 = vor.u32 %v1140_v12, %v1137_v11  ;;  %v1152_v13 = vrot.slane %v1151_v26, 4  ;;  %v5901_v48 = vld [vmem:[%s8651_s1 + $0x38] sm:$0xff]   ;;  %v1164_v3 = vrot.slane %v1162_v10, 5  ;;  %v198_v11 = vshll.u32 %v6514_v59, 16 }
  0x49   : > { %5234 = vmatprep.subr.bf16.mxu1 %v5895_v50  ;;  %5506 = vmatprep.subr.bf16.mxu0 %v6233_v16  ;;  %v6505_v50 = vld [vmem:[%s6251_s27 + $0x40] sm:$0xf]  ;;  %v204_v12 = vshll.u32 %v6517_v62, 16  ;;  %v210_v28 = vrot.slane %v208_v17, 4  ;;  %v1202_v10 = vshll.u32 %v4695_v38, 16  ;;  %v238_v17 = vshll.u32 %v176_v61, 16 }
  0x4a   : > { %v1142_v36 = vrot.slane %v1141_v25, 4  ;;  %v6492_v45 = vsel %vm6306_vm5, %v1152_v13, %v1156_v18  ;;  %5540 = vmatprep.mubr.bf16.mxu1 %v4784_v37  ;;  %v1168_v55 = vshll.u32 %v6505_v50, 16  ;;  %v1172_v56 = vshrl.u32 %v6505_v50, 16  ;;  %v6537_v25 = vld [vmem:[%s6251_s27 + $0x4c] sm:$0xf] }
  0x4b   : > { %8729 = vst [vmem:[#allocation12_spill] sm:$0xff] %v6492_v45  ;;  %v214_v18 = vshll.u32 %v175_v4, 16  ;;  %v200_v23 = vrot.slane %v198_v11, 5  ;;  %v206_v24 = vrot.slane %v204_v12, 5  ;;  %v228_v4 = vshll.u32 %v6562_v46, 16 }
  0x4c   : > { %5235 = vmatpush3.bf16.msra.mxu1 %v5896_v54  ;;  %5507 = vmatpush3.bf16.msra.mxu0 %v6233_v16  ;;  %v6488_v44 = vsel %vm6306_vm5, %v1142_v36, %v1146_v14  ;;  %v1159_v54 = vshrl.u32 %v6502_v49, 16  ;;  %v1170_v5 = vrot.slane %v1168_v55, 5  ;;  %v1174_v6 = vrot.slane %v1172_v56, 4 }
  0x4d   : > { %5236 = vmatprep.subr.bf16.mxu1 %v5898_v35  ;;  %8728 = vst [vmem:[#allocation11_spill] sm:$0xff] %v6488_v44  ;;  %v4757_v16 = vcombine.low %v6488_v44, %v6492_v45  ;;  %5508 = vmatprep.subr.bf16.mxu0 %v6246_v19  ;;  %v216_v29 = vrot.slane %v214_v18, 5  ;;  %v201_v30 = vor.u32 %v200_v23, %v197_v9  ;;  %v1192_v35 = vshll.u32 %v6537_v25, 16 }
  0x4e   : > { %v1161_v2 = vrot.slane %v1159_v54, 4  ;;  %v1175_v15 = vor.u32 %v1174_v6, %v1170_v5  ;;  %v211_v37 = vor.u32 %v210_v28, %v206_v24  ;;  %v5909_v6 = vld [vmem:[%s8651_s1 + $0x88] sm:$0xff]   ;;  %v230_v11 = vrot.slane %v228_v4, 5  ;;  %v5934_v28 = vld [vmem:[%s8651_s1 + $0x1c0] sm:$0xff]   ;;  %v5919_v4 = vld [vmem:[%s8651_s1 + $0x98] sm:$0xff]  }
  0x4f   : > { %2111 = vmatprep.mubr.bf16.mxu0 %v4757_v16  ;;  %5541 = vmatmul.mubr.bf16.gmra.mrb[12].mxu1 %v4785_v1  ;;  %v1185_v1 = vrot.slane %v1183_v32, 4  ;;  %v232_v12 = vshrl.u32 %v6562_v46, 16  ;;  %v1268_v18 = vshrl.u32 %v6278_v31, 16 }
  0x50   : > { %5237 = vmatpush3.bf16.msra.mxu1 %v5899_v41  ;;  %2112 = vmatmul.mubr.bf16.gmra.mrb[12].mxu0 %v4741_v42  ;;  %v1165_v14 = vor.u32 %v1164_v3, %v1161_v2  ;;  %v1176_v27 = vrot.slane %v1175_v15, 4  ;;  %v1196_v41 = vshrl.u32 %v6537_v25, 16  ;;  %v6555_v42 = vld [vmem:[%s6251_s27 + $0xc] sm:$0xf]  ;;  %v212_v16 = vrot.slane %v211_v37, 4 }
  0x51   : > { %5238 = vmatprep.subr.bf16.mxu1 %v5900_v7  ;;  %5509 = vmatpush3.bf16.msra.mxu0 %v6246_v19  ;;  %v4742_v19 = vcombine.low %v6502_v49, %v6505_v50  ;;  %v202_v7 = vrot.slane %v201_v30, 4  ;;  %v1188_v49 = vrot.slane %v1186_v33, 5  ;;  %v1194_v50 = vrot.slane %v1192_v35, 5  ;;  %v4696_v33 = vld [vmem:[%s6251_s27 + $0x5c] sm:$0x1] }
  0x52   : > { %5510 = vmatprep.subr.bf16.mxu0 %v6262_v22  ;;  %v1166_v26 = vrot.slane %v1165_v14, 4  ;;  %v6550_v13 = vsel %vm6306_vm5, %v1176_v27, %v1180_v8  ;;  %v1198_v54 = vrot.slane %v1196_v41, 4  ;;  %v219_v55 = vshrl.u32 %v6555_v42, 16  ;;  %v6578_v14 = vld [vmem:[%s6251_s27 + $0x54] sm:$0xf] }
  0x53   : > { %8731 = vst [vmem:[#allocation14_spill] sm:$0xff] %v6550_v13  ;;  %v207_v53 = vsel %vm6306_vm5, %v202_v7, %v206_v24  ;;  %v217_v56 = vsel %vm6306_vm5, %v212_v16, %v216_v29  ;;  %v1204_v3 = vrot.slane %v1202_v10, 5  ;;  %v4743_v30 = vcombine.low %v6531_v21, %v6537_v25  ;;  %v6605_v37 = vld [vmem:[%s6251_s27 + $0x18] sm:$0xf]  ;;  %v6610_v7 = vld [vmem:[%s6251_s27 + $0x1c] sm:$0xf] }
  0x54   : > { %5239 = vmatpush3.bf16.msra.mxu1 %v5901_v48  ;;  %v6546_v36 = vsel %vm6306_vm5, %v1166_v26, %v1170_v5  ;;  %v1264_v48 = vshll.u32 %v6278_v31, 16  ;;  %v4626_v0 = vcombine.low %v207_v53, %v217_v56  ;;  %v1199_v2 = vor.u32 %v1198_v54, %v1194_v50  ;;  %v6586_v26 = vld [vmem:[%s6251_s27 + $0x58] sm:$0xf]  ;;  %v5914_v21 = vld [vmem:[%s8651_s1 + $0x90] sm:$0xff]  }
  0x55   : > { %5544 = vmatprep.subr.bf16.mxu1 %v6528_v20  ;;  %5511 = vmatpush3.bf16.msra.mxu0 %v6262_v22  ;;  %8730 = vst [vmem:[#allocation13_spill] sm:$0xff] %v6546_v36  ;;  %v4758_v43 = vcombine.low %v6546_v36, %v6550_v13  ;;  %v4610_v22 = vcombine.low %v6514_v59, %v6517_v62  ;;  %v222_v62 = vshll.u32 %v6555_v42, 16  ;;  %v221_v5 = vrot.slane %v219_v55, 4 }
  0x56   : > { %v1189_v59 = vor.u32 %v1188_v49, %v1185_v1  ;;  %2553 = vmatprep.mubr.bf16.mxu1 %v4626_v0  ;;  %v1200_v15 = vrot.slane %v1199_v2, 4  ;;  %v6588_v27 = vrot.slane %v1264_v48, 5  ;;  %v4611_v32 = vcombine.low %v6555_v42, %v6562_v46  ;;  %5360 = vmatprep.subr.bf16.mxu0 %v5934_v28  ;;  %v177_v48 = vld [vmem:[%s6251_s27 + $0x20] sm:$0x1] }
  0x57   : > { %2119 = vmatprep.mubr.bf16.mxu0 %v4758_v43  ;;  %v224_v9 = vrot.slane %v222_v62, 5  ;;  %2554 = vmatmul.mubr.bf16.vlgmr.msra.gmra.mrb[16].mxu1 %v4610_v22  ;;  %v1207_v35 = vshrl.u32 %v6578_v14, 16  ;;  %v240_v43 = vrot.slane %v238_v17, 5  ;;  %v1210_v42 = vshll.u32 %v6578_v14, 16 }
  0x58   : > { %2120 = vmatmul.mubr.bf16.gmra.mrb[16].mxu0 %v4742_v19  ;;  %v1190_v8 = vrot.slane %v1189_v59, 4  ;;  %v234_v19 = vrot.slane %v232_v12, 4  ;;  %5545 = vmatpush3.bf16.msra.mxu1 %v6528_v20  ;;  %v6596_v29 = vsel %vm6306_vm5, %v1200_v15, %v1204_v3  ;;  %v1216_v22 = vshll.u32 %v6586_v26, 16  ;;  %v6634_v12 = vld [vmem:[%s6251_s27 + $0x64] sm:$0xf] }
  0x59   : > { %v225_v24 = vor.u32 %v224_v9, %v221_v5  ;;  %8733 = vst [vmem:[#allocation16_spill] sm:$0xff] %v6596_v29  ;;  %5546 = vmatprep.subr.bf16.mxu1 %v5909_v6  ;;  %v1209_v25 = vrot.slane %v1207_v35, 4  ;;  %v1220_v46 = vshrl.u32 %v6586_v26, 16  ;;  %v1226_v49 = vshll.u32 %v4696_v33, 16  ;;  %v4697_v35 = vld [vmem:[%s6251_s27 + $0x68] sm:$0x1] }
  0x5a   : > { %v6583_v23 = vsel %vm6306_vm5, %v1190_v8, %v1194_v50  ;;  %v235_v41 = vor.u32 %v234_v19, %v230_v11  ;;  %v243_v50 = vshrl.u32 %v6605_v37, 16  ;;  %v1212_v53 = vrot.slane %v1210_v42, 5  ;;  %v6630_v8 = vld [vmem:[%s6251_s27 + $0x60] sm:$0xf]  ;;  %v6662_v42 = vld [vmem:[%s6251_s27 + $0x28] sm:$0xf] }
  0x5b   : > { %8732 = vst [vmem:[#allocation15_spill] sm:$0xff] %v6583_v23  ;;  %v4759_v38 = vcombine.low %v6583_v23, %v6596_v29  ;;  %v226_v20 = vrot.slane %v225_v24, 4  ;;  %v1218_v54 = vrot.slane %v1216_v22, 5  ;;  %v1222_v10 = vrot.slane %v1220_v46, 4  ;;  %v6030_v23 = vld [vmem:[%s6251_s27 + $0x74] sm:$0x1] }
  0x5c   : > { %v236_v1 = vrot.slane %v235_v41, 4  ;;  %v246_v55 = vshll.u32 %v6605_v37, 16  ;;  %5547 = vmatpush3.bf16.msra.mxu1 %v5909_v6  ;;  %v1228_v59 = vrot.slane %v1226_v49, 5  ;;  %v245_v61 = vrot.slane %v243_v50, 4 }
  0x5d   : > { %2127 = vmatprep.mubr.bf16.mxu0 %v4759_v38  ;;  %v231_v16 = vsel %vm6306_vm5, %v226_v20, %v230_v11  ;;  %v252_v62 = vshll.u32 %v6610_v7, 16  ;;  %5548 = vmatprep.subr.bf16.mxu1 %v5914_v21  ;;  %v1213_v2 = vor.u32 %v1212_v53, %v1209_v25  ;;  %v1223_v3 = vor.u32 %v1222_v10, %v1218_v54  ;;  %v5929_v10 = vld [vmem:[%s8651_s1 + $0xa8] sm:$0xff]  }
  0x5e   : > { %v241_v56 = vsel %vm6306_vm5, %v236_v1, %v240_v43  ;;  %v248_v5 = vrot.slane %v246_v55, 5  ;;  %v256_v9 = vshrl.u32 %v6610_v7, 16  ;;  %v262_v11 = vshll.u32 %v177_v48, 16 }
  0x5f   : > { %v4627_v0 = vcombine.low %v231_v16, %v241_v56  ;;  %v254_v6 = vrot.slane %v252_v62, 5  ;;  %v6636_v15 = vrot.slane %v1268_v18, 4  ;;  %v1274_v17 = vshll.u32 %v6281_v34, 16  ;;  %v5924_v34 = vld [vmem:[%s8651_s1 + $0xa0] sm:$0xff]   ;;  %v178_v56 = vld [vmem:[%s6251_s27 + $0x2c] sm:$0x1] }
  0x60   : > { %2128 = vmatmul.mubr.bf16.gmra.mrb[20].mxu0 %v4743_v30  ;;  %v1214_v24 = vrot.slane %v1213_v2, 4  ;;  %v1224_v19 = vrot.slane %v1223_v3, 4  ;;  %v249_v28 = vor.u32 %v248_v5, %v245_v61  ;;  %5549 = vmatpush3.bf16.msra.mxu1 %v5914_v21  ;;  %v258_v30 = vrot.slane %v256_v9, 4  ;;  %v6682_v5 = vld [vmem:[%s6251_s27 + $0x6c] sm:$0xf] }
  0x61   : > { %2561 = vmatprep.mubr.bf16.mxu1 %v4627_v0  ;;  %v4744_v33 = vcombine.low %v6578_v14, %v6586_v26  ;;  %v1231_v38 = vshrl.u32 %v6630_v8, 16  ;;  %v1234_v18 = vshll.u32 %v6630_v8, 16  ;;  %5550 = vmatprep.subr.bf16.mxu1 %v5919_v4  ;;  %v1240_v14 = vshll.u32 %v6634_v12, 16  ;;  %v6657_v26 = vld [vmem:[%s6251_s27 + $0x24] sm:$0xf] }
  0x62   : > { %2562 = vmatmul.mubr.bf16.gmra.mrb[20].mxu1 %v4611_v32  ;;  %v6649_v20 = vsel %vm6306_vm5, %v1214_v24, %v1218_v54  ;;  %v6653_v32 = vsel %vm6306_vm5, %v1224_v19, %v1228_v59  ;;  %v250_v41 = vrot.slane %v249_v28, 4  ;;  %v259_v21 = vor.u32 %v258_v30, %v254_v6 }
  0x63   : > { %8734 = vst [vmem:[#allocation17_spill] sm:$0xff] %v6649_v20  ;;  %8735 = vst [vmem:[#allocation18_spill] sm:$0xff] %v6653_v32  ;;  %v4760_v43 = vcombine.low %v6649_v20, %v6653_v32  ;;  %v264_v25 = vrot.slane %v262_v11, 5  ;;  %v1271_v22 = vor.u32 %v6636_v15, %v6588_v27  ;;  %v1233_v48 = vrot.slane %v1231_v38, 4  ;;  %v6029_v20 = vld [vmem:[%s6251_s27 + $0x70] sm:$0xf] }
  0x64   : > { %v255_v46 = vsel %vm6306_vm5, %v250_v41, %v254_v6  ;;  %v1236_v16 = vrot.slane %v1234_v18, 5  ;;  %v1242_v1 = vrot.slane %v1240_v14, 5  ;;  %5551 = vmatpush3.bf16.msra.mxu1 %v5919_v4  ;;  %v260_v49 = vrot.slane %v259_v21, 4  ;;  %v6691_v18 = vld [vmem:[%s6251_s27 + $0x30] sm:$0xf] }
  0x65   : > { %2135 = vmatprep.mubr.bf16.mxu0 %v4760_v43  ;;  %v1244_v50 = vshrl.u32 %v6634_v12, 16  ;;  %v1250_v53 = vshll.u32 %v4697_v35, 16  ;;  %v267_v54 = vshrl.u32 %v6657_v26, 16  ;;  %5552 = vmatprep.subr.bf16.mxu1 %v5924_v34  ;;  %v270_v59 = vshll.u32 %v6657_v26, 16 }
  0x66   : > { %v1237_v55 = vor.u32 %v1236_v16, %v1233_v48  ;;  %v276_v61 = vshll.u32 %v6662_v42, 16  ;;  %v280_v62 = vshrl.u32 %v6662_v42, 16  ;;  %v265_v4 = vsel %vm6306_vm5, %v260_v49, %v264_v25  ;;  %v6703_v48 = vld [vmem:[%s6251_s27 + $0x34] sm:$0xf]  ;;  %v5944_v49 = vld [vmem:[%s8651_s1 + $0xb8] sm:$0xff]  }
  0x67   : > { %v4612_v0 = vcombine.low %v6605_v37, %v6610_v7  ;;  %v1246_v2 = vrot.slane %v1244_v50, 4  ;;  %v269_v3 = vrot.slane %v267_v54, 4  ;;  %v4628_v6 = vcombine.low %v255_v46, %v265_v4  ;;  %v179_v54 = vld [vmem:[%s6251_s27 + $0x38] sm:$0x1] }
  0x68   : > { %2136 = vmatmul.mubr.bf16.gmra.mrb[24].mxu0 %v4744_v33  ;;  %v1238_v9 = vrot.slane %v1237_v55, 4  ;;  %v272_v11 = vrot.slane %v270_v59, 5  ;;  %v278_v15 = vrot.slane %v276_v61, 5  ;;  %5553 = vmatpush3.bf16.msra.mxu1 %v5924_v34  ;;  %v1252_v19 = vrot.slane %v1250_v53, 5  ;;  %v5933_v33 = vld [vmem:[%s8651_s1 + $0xb0] sm:$0xff]  }
  0x69   : > { %v1247_v24 = vor.u32 %v1246_v2, %v1242_v1  ;;  %v282_v28 = vrot.slane %v280_v62, 4  ;;  %v286_v30 = vshll.u32 %v178_v56, 16  ;;  %5554 = vmatprep.subr.bf16.mxu1 %v5929_v10  ;;  %v1276_v37 = vrot.slane %v1274_v17, 5  ;;  %2569 = vmatprep.mubr.bf16.mxu1 %v4628_v6  ;;  %v6720_v61 = vld [vmem:[%s6251_s27 + $0x78] sm:$0xf] }
  0x6a   : > { %v273_v7 = vor.u32 %v272_v11, %v269_v3  ;;  %v4745_v35 = vcombine.low %v6630_v8, %v6634_v12  ;;  %v1255_v38 = vshrl.u32 %v6682_v5, 16  ;;  %2570 = vmatmul.mubr.bf16.gmra.mrb[24].mxu1 %v4612_v0  ;;  %v6695_v34 = vsel %vm6306_vm5, %v1238_v9, %v1242_v1 }
  0x6b   : > { %8736 = vst [vmem:[#allocation19_spill] sm:$0xff] %v6695_v34  ;;  %v1248_v41 = vrot.slane %v1247_v24, 4  ;;  %v283_v14 = vor.u32 %v282_v28, %v278_v15  ;;  %v288_v43 = vrot.slane %v286_v30, 5  ;;  %v1258_v25 = vshll.u32 %v6682_v5, 16 }
  0x6c   : > { %v274_v17 = vrot.slane %v273_v7, 4  ;;  %v1257_v21 = vrot.slane %v1255_v38, 4  ;;  %v1272_v46 = vrot.slane %v1271_v22, 4  ;;  %5555 = vmatpush3.bf16.msra.mxu1 %v5929_v10  ;;  %v291_v16 = vshrl.u32 %v6691_v18, 16 }
  0x6d   : > { %v6700_v8 = vsel %vm6306_vm5, %v1248_v41, %v1252_v19  ;;  %v284_v12 = vrot.slane %v283_v14, 4  ;;  %v294_v1 = vshll.u32 %v6691_v18, 16  ;;  %5556 = vmatprep.subr.bf16.mxu1 %v5933_v33  ;;  %v1260_v53 = vrot.slane %v1258_v25, 5 }
  0x6e   : > { %8737 = vst [vmem:[#allocation20_spill] sm:$0xff] %v6700_v8  ;;  %v4761_v22 = vcombine.low %v6695_v34, %v6700_v8  ;;  %v279_v50 = vsel %vm6306_vm5, %v274_v17, %v278_v15  ;;  %v4613_v55 = vcombine.low %v6657_v26, %v6662_v42  ;;  %v293_v56 = vrot.slane %v291_v16, 4  ;;  %v6021_v34 = vld [vmem:[%s6251_s27 + $0x40] sm:$0xf] }
  0x6f   : > { %v289_v10 = vsel %vm6306_vm5, %v284_v12, %v288_v43  ;;  %v296_v59 = vrot.slane %v294_v1, 5  ;;  %v1261_v4 = vor.u32 %v1260_v53, %v1257_v21  ;;  %v300_v0 = vshll.u32 %v6703_v48, 16  ;;  %v5980_v21 = vld [vmem:[%s6251_s27 + $0x80] sm:$0x1]  ;;  %v6757_v1 = vld [vmem:[%s6251_s27 + $0x84] sm:$0xf] }
  0x70   : > { %2143 = vmatprep.mubr.bf16.mxu0 %v4761_v22  ;;  %v4629_v62 = vcombine.low %v279_v50, %v289_v10  ;;  %5557 = vmatpush3.bf16.msra.mxu1 %v5933_v33  ;;  %v6725_v2 = vsel %vm6306_vm5, %v1272_v46, %v1276_v37  ;;  %v304_v6 = vshrl.u32 %v6703_v48, 16  ;;  %v310_v26 = vshll.u32 %v179_v54, 16  ;;  %v6735_v33 = vld [vmem:[%s6251_s27 + $0x3c] sm:$0xf]  ;;  %v180_v46 = vld [vmem:[%s6251_s27 + $0x44] sm:$0x1] }
  0x71   : > { %2144 = vmatmul.mubr.bf16.gmra.mrb[28].mxu0 %v4745_v35  ;;  %8738 = vst [vmem:[#allocation21_spill] sm:$0xff] %v6725_v2  ;;  %v297_v3 = vor.u32 %v296_v59, %v293_v56  ;;  %5558 = vmatprep.subr.bf16.mxu1 %v5944_v49  ;;  %v1262_v42 = vrot.slane %v1261_v4, 4  ;;  %v302_v9 = vrot.slane %v300_v0, 5  ;;  %v4746_v11 = vcombine.low %v6682_v5, %v6278_v31  ;;  %v6745_v35 = vld [vmem:[%s6251_s27 + $0x40] sm:$0xf] }
  0x72   : > { %2577 = vmatprep.mubr.bf16.mxu1 %v4629_v62  ;;  %v1279_v15 = vshrl.u32 %v6720_v61, 16  ;;  %v306_v19 = vrot.slane %v304_v6, 4  ;;  %v4614_v28 = vcombine.low %v6691_v18, %v6703_v48  ;;  %v1282_v30 = vshll.u32 %v6720_v61, 16 }
  0x73   : > { %2578 = vmatmul.mubr.bf16.gmra.mrb[28].mxu1 %v4613_v55  ;;  %v298_v24 = vrot.slane %v297_v3, 4  ;;  %v6740_v37 = vsel %vm6306_vm5, %v1262_v42, %v6588_v27  ;;  %v1288_v5 = vshll.u32 %v6295_v40, 16  ;;  %v1292_v7 = vshrl.u32 %v6295_v40, 16  ;;  %v5955_v3 = vld [vmem:[%s8651_s1 + $0x200] sm:$0xff]  }
  0x74   : > { %8739 = vst [vmem:[#allocation22_spill] sm:$0xff] %v6740_v37  ;;  %v1281_v31 = vrot.slane %v1279_v15, 4  ;;  %5559 = vmatpush3.bf16.msra.mxu1 %v5944_v49  ;;  %v4762_v38 = vcombine.low %v6740_v37, %v6725_v2  ;;  %v307_v41 = vor.u32 %v306_v19, %v302_v9  ;;  %v312_v14 = vrot.slane %v310_v26, 5 }
  0x75   : > { %v303_v18 = vsel %vm6306_vm5, %v298_v24, %v302_v9  ;;  %v1284_v43 = vrot.slane %v1282_v30, 5  ;;  %v1290_v27 = vrot.slane %v1288_v5, 5  ;;  %v1294_v17 = vrot.slane %v1292_v7, 4  ;;  %5592 = vmatprep.subr.bf16.mxu1 %v5955_v3  ;;  %v5981_v30 = vld [vmem:[%s6251_s27 + $0x7c] sm:$0xf] }
  0x76   : > { %v1298_v25 = vshll.u32 %v5980_v21, 16  ;;  %2151 = vmatprep.mubr.bf16.mxu0 %v4762_v38  ;;  %v308_v40 = vrot.slane %v307_v41, 4  ;;  %v315_v12 = vshrl.u32 %v6735_v33, 16  ;;  %v318_v48 = vshll.u32 %v6735_v33, 16  ;;  %v6781_v7 = vld [vmem:[%s6251_s27 + $0x48] sm:$0xf] }
  0x77   : > { %v324_v16 = vshll.u32 %v6745_v35, 16  ;;  %v1285_v49 = vor.u32 %v1284_v43, %v1281_v31  ;;  %v1295_v22 = vor.u32 %v1294_v17, %v1290_v27  ;;  %v328_v53 = vshrl.u32 %v6745_v35, 16  ;;  %v5983_v21 = vld [vmem:[%s6251_s27 + $0x8c] sm:$0x1] }
  0x78   : > { %v1300_v50 = vrot.slane %v1298_v25, 5  ;;  %v313_v54 = vsel %vm6306_vm5, %v308_v40, %v312_v14  ;;  %v317_v10 = vrot.slane %v315_v12, 4  ;;  %v320_v55 = vrot.slane %v318_v48, 5  ;;  %v6785_v14 = vld [vmem:[%s6251_s27 + $0x4c] sm:$0xf] }
  0x79   : > { %2152 = vmatmul.mubr.bf16.gmra.mrb[32].mxu0 %v4746_v11  ;;  %v326_v56 = vrot.slane %v324_v16, 5  ;;  %v4630_v59 = vcombine.low %v303_v18, %v313_v54  ;;  %v1286_v62 = vrot.slane %v1285_v49, 4  ;;  %v1296_v4 = vrot.slane %v1295_v22, 4  ;;  %v6797_v48 = vld [vmem:[%s6251_s27 + $0x90] sm:$0xf] }
  0x7a   : > { %v330_v0 = vrot.slane %v328_v53, 4  ;;  %v321_v6 = vor.u32 %v320_v55, %v317_v10  ;;  %v334_v26 = vshll.u32 %v180_v46, 16  ;;  %v1303_v15 = vshrl.u32 %v6757_v1, 16 }
  0x7b   : > { %2585 = vmatprep.mubr.bf16.mxu1 %v4630_v59  ;;  %v6767_v42 = vsel %vm6306_vm5, %v1286_v62, %v1290_v27  ;;  %v6771_v9 = vsel %vm6306_vm5, %v1296_v4, %v1300_v50  ;;  %v4747_v31 = vcombine.low %v6720_v61, %v5981_v30  ;;  %v4615_v5 = vcombine.low %v6735_v33, %v6745_v35  ;;  %v5982_v27 = vld [vmem:[%s6251_s27 + $0x88] sm:$0xf]  ;;  %v181_v33 = vld [vmem:[%s6251_s27 + $0x50] sm:$0x1] }
  0x7c   : > { %8740 = vst [vmem:[#allocation23_spill] sm:$0xff] %v6767_v42  ;;  %8741 = vst [vmem:[#allocation24_spill] sm:$0xff] %v6771_v9  ;;  %v331_v11 = vor.u32 %v330_v0, %v326_v56  ;;  %2586 = vmatmul.mubr.bf16.gmra.mrb[32].mxu1 %v4614_v28  ;;  %v4763_v24 = vcombine.low %v6767_v42, %v6771_v9  ;;  %v322_v19 = vrot.slane %v321_v6, 4  ;;  %v336_v18 = vrot.slane %v334_v26, 5  ;;  %v6016_v9 = vld [vmem:[%s6251_s27 + $0x28] sm:$0xf] }
  0x7d   : > { %v1305_v41 = vrot.slane %v1303_v15, 4  ;;  %v1306_v28 = vshll.u32 %v6757_v1, 16  ;;  %v1312_v17 = vshll.u32 %v5982_v27, 16  ;;  %v1316_v61 = vshrl.u32 %v5982_v27, 16 }
  0x7e   : > { %v332_v38 = vrot.slane %v331_v11, 4  ;;  %2159 = vmatprep.mubr.bf16.mxu0 %v4763_v24  ;;  %v327_v43 = vsel %vm6306_vm5, %v322_v19, %v326_v56  ;;  %v1322_v25 = vshll.u32 %v5983_v21, 16  ;;  %v339_v40 = vshrl.u32 %v6781_v7, 16 }
  0x7f   : > { %v1308_v46 = vrot.slane %v1306_v28, 5  ;;  %v342_v12 = vshll.u32 %v6781_v7, 16  ;;  %v1314_v49 = vrot.slane %v1312_v17, 5  ;;  %v1318_v22 = vrot.slane %v1316_v61, 4  ;;  %v6817_v28 = vld [vmem:[%s6251_s27 + $0x54] sm:$0xf] }
  0x80   : > { %v337_v35 = vsel %vm6306_vm5, %v332_v38, %v336_v18  ;;  %v1324_v50 = vrot.slane %v1322_v25, 5  ;;  %v341_v54 = vrot.slane %v339_v40, 4  ;;  %v348_v55 = vshll.u32 %v6785_v14, 16 }
  0x81   : > { %v4631_v16 = vcombine.low %v327_v43, %v337_v35  ;;  %2160 = vmatmul.mubr.bf16.gmra.mrb[36].mxu0 %v4747_v31  ;;  %v1309_v53 = vor.u32 %v1308_v46, %v1305_v41  ;;  %v344_v10 = vrot.slane %v342_v12, 5  ;;  %v1319_v56 = vor.u32 %v1318_v22, %v1314_v49  ;;  %v6809_v31 = vld [vmem:[%s6251_s27 + $0x94] sm:$0xf]  ;;  %v6820_v43 = vld [vmem:[%s6251_s27 + $0x58] sm:$0xf] }
  0x82   : > { %v352_v59 = vshrl.u32 %v6785_v14, 16  ;;  %v358_v62 = vshll.u32 %v181_v33, 16  ;;  %v350_v3 = vrot.slane %v348_v55, 5  ;;  %v4748_v11 = vcombine.low %v6757_v1, %v5982_v27  ;;  %v5985_v46 = vld [vmem:[%s6251_s27 + $0x98] sm:$0x1] }
  0x83   : > { %2593 = vmatprep.mubr.bf16.mxu1 %v4631_v16  ;;  %v1310_v4 = vrot.slane %v1309_v53, 4  ;;  %v345_v0 = vor.u32 %v344_v10, %v341_v54  ;;  %v1320_v6 = vrot.slane %v1319_v56, 4  ;;  %v1327_v15 = vshrl.u32 %v6797_v48, 16  ;;  %v182_v12 = vld [vmem:[%s6251_s27 + $0x5c] sm:$0x1] }
  0x84   : > { %2594 = vmatmul.mubr.bf16.gmra.mrb[36].mxu1 %v4615_v5  ;;  %v354_v26 = vrot.slane %v352_v59, 4  ;;  %v1330_v30 = vshll.u32 %v6797_v48, 16  ;;  %v1336_v38 = vshll.u32 %v6809_v31, 16  ;;  %v360_v18 = vrot.slane %v358_v62, 5  ;;  %v6838_v10 = vld [vmem:[%s6251_s27 + $0x9c] sm:$0xf] }
  0x85   : > { %v6805_v24 = vsel %vm6306_vm5, %v1310_v4, %v1314_v49  ;;  %v346_v19 = vrot.slane %v345_v0, 4  ;;  %v6814_v5 = vsel %vm6306_vm5, %v1320_v6, %v1324_v50  ;;  %v1329_v41 = vrot.slane %v1327_v15, 4 }
  0x86   : > { %8742 = vst [vmem:[#allocation25_spill] sm:$0xff] %v6805_v24  ;;  %8743 = vst [vmem:[#allocation26_spill] sm:$0xff] %v6814_v5  ;;  %v355_v1 = vor.u32 %v354_v26, %v350_v3  ;;  %v4764_v27 = vcombine.low %v6805_v24, %v6814_v5  ;;  %v4616_v61 = vcombine.low %v6781_v7, %v6785_v14  ;;  %v1332_v21 = vrot.slane %v1330_v30, 5  ;;  %v6013_v5 = vld [vmem:[%s6251_s27 + $0x10] sm:$0xf] }
  0x87   : > { %v351_v17 = vsel %vm6306_vm5, %v346_v19, %v350_v3  ;;  %v1338_v33 = vrot.slane %v1336_v38, 5  ;;  %v1340_v35 = vshrl.u32 %v6809_v31, 16  ;;  %v1346_v40 = vshll.u32 %v5985_v46, 16 }
  0x88   : > { %v356_v25 = vrot.slane %v355_v1, 4  ;;  %2167 = vmatprep.mubr.bf16.mxu0 %v4764_v27  ;;  %v1333_v16 = vor.u32 %v1332_v21, %v1329_v41  ;;  %v363_v49 = vshrl.u32 %v6817_v28, 16  ;;  %v366_v22 = vshll.u32 %v6817_v28, 16  ;;  %v6849_v27 = vld [vmem:[%s6251_s27 + $0xa0] sm:$0xf] }
  0x89   : > { %v372_v50 = vshll.u32 %v6820_v43, 16  ;;  %2168 = vmatmul.mubr.bf16.gmra.mrb[40].mxu0 %v4748_v11  ;;  %v1342_v14 = vrot.slane %v1340_v35, 4  ;;  %v1348_v53 = vrot.slane %v1346_v40, 5  ;;  %v376_v54 = vshrl.u32 %v6820_v43, 16 }
  0x8a   : > { %v361_v7 = vsel %vm6306_vm5, %v356_v25, %v360_v18  ;;  %v1334_v56 = vrot.slane %v1333_v16, 4  ;;  %v365_v59 = vrot.slane %v363_v49, 4  ;;  %v368_v62 = vrot.slane %v366_v22, 5  ;;  %v6868_v16 = vld [vmem:[%s6251_s27 + $0x64] sm:$0xf] }
  0x8b   : > { %v4632_v55 = vcombine.low %v351_v17, %v361_v7  ;;  %v1343_v4 = vor.u32 %v1342_v14, %v1338_v33  ;;  %v374_v0 = vrot.slane %v372_v50, 5  ;;  %v378_v3 = vrot.slane %v376_v54, 4  ;;  %v183_v14 = vld [vmem:[%s6251_s27 + $0x68] sm:$0x1] }
  0x8c   : > { %v382_v6 = vshll.u32 %v182_v12, 16  ;;  %v6842_v26 = vsel %vm6306_vm5, %v1334_v56, %v1338_v33  ;;  %v369_v11 = vor.u32 %v368_v62, %v365_v59  ;;  %v4749_v38 = vcombine.low %v6797_v48, %v6809_v31  ;;  %v5987_v33 = vld [vmem:[%s6251_s27 + $0xa4] sm:$0x1]  ;;  %v6859_v31 = vld [vmem:[%s6251_s27 + $0x60] sm:$0xf] }
  0x8d   : > { %2601 = vmatprep.mubr.bf16.mxu1 %v4632_v55  ;;  %8744 = vst [vmem:[#allocation27_spill] sm:$0xff] %v6842_v26  ;;  %v1344_v15 = vrot.slane %v1343_v4, 4  ;;  %v379_v19 = vor.u32 %v378_v3, %v374_v0  ;;  %v1351_v18 = vshrl.u32 %v6838_v10, 16  ;;  %v1354_v41 = vshll.u32 %v6838_v10, 16  ;;  %v6876_v59 = vld [vmem:[%s6251_s27 + $0xa8] sm:$0xf] }
  0x8e   : > { %2602 = vmatmul.mubr.bf16.gmra.mrb[40].mxu1 %v4616_v61  ;;  %v384_v30 = vrot.slane %v382_v6, 5  ;;  %v370_v1 = vrot.slane %v369_v11, 4  ;;  %v1360_v17 = vshll.u32 %v6849_v27, 16  ;;  %v1364_v25 = vshrl.u32 %v6849_v27, 16 }
  0x8f   : > { %v6854_v61 = vsel %vm6306_vm5, %v1344_v15, %v1348_v53  ;;  %v380_v21 = vrot.slane %v379_v19, 4  ;;  %v1370_v48 = vshll.u32 %v5987_v33, 16  ;;  %v4617_v40 = vcombine.low %v6817_v28, %v6820_v43 }
  0x90   : > { %8745 = vst [vmem:[#allocation28_spill] sm:$0xff] %v6854_v61  ;;  %v4765_v35 = vcombine.low %v6842_v26, %v6854_v61  ;;  %v375_v46 = vsel %vm6306_vm5, %v370_v1, %v374_v0  ;;  %v1353_v12 = vrot.slane %v1351_v18, 4  ;;  %v1356_v22 = vrot.slane %v1354_v41, 5  ;;  %v6881_v1 = vld [vmem:[%s6251_s27 + $0x6c] sm:$0xf] }
  0x91   : > { %v385_v49 = vsel %vm6306_vm5, %v380_v21, %v384_v30  ;;  %v1362_v50 = vrot.slane %v1360_v17, 5  ;;  %v1366_v7 = vrot.slane %v1364_v25, 4  ;;  %v1372_v54 = vrot.slane %v1370_v48, 5  ;;  %v7192_v26 = vld [vmem:[%s6251_s27 + $0x18] sm:$0xf] }
  0x92   : > { %2175 = vmatprep.mubr.bf16.mxu0 %v4765_v35  ;;  %v4633_v53 = vcombine.low %v375_v46, %v385_v49  ;;  %v387_v55 = vshrl.u32 %v6859_v31, 16  ;;  %v390_v56 = vshll.u32 %v6859_v31, 16  ;;  %v1357_v28 = vor.u32 %v1356_v22, %v1353_v12  ;;  %v6900_v49 = vld [vmem:[%s6251_s27 + $0xac] sm:$0xf] }
  0x93   : > { %2176 = vmatmul.mubr.bf16.gmra.mrb[44].mxu0 %v4749_v38  ;;  %v1367_v43 = vor.u32 %v1366_v7, %v1362_v50  ;;  %v396_v62 = vshll.u32 %v6868_v16, 16  ;;  %v400_v4 = vshrl.u32 %v6868_v16, 16  ;;  %v406_v6 = vshll.u32 %v183_v14, 16  ;;  %v5989_v14 = vld [vmem:[%s6251_s27 + $0xb0] sm:$0x1] }
  0x94   : > { %2609 = vmatprep.mubr.bf16.mxu1 %v4633_v53  ;;  %v389_v0 = vrot.slane %v387_v55, 4  ;;  %v392_v3 = vrot.slane %v390_v56, 5  ;;  %v1358_v11 = vrot.slane %v1357_v28, 4  ;;  %v4750_v41 = vcombine.low %v6838_v10, %v6849_v27  ;;  %v184_v28 = vld [vmem:[%s6251_s27 + $0x74] sm:$0x1] }
  0x95   : > { %v1368_v15 = vrot.slane %v1367_v43, 4  ;;  %v398_v19 = vrot.slane %v396_v62, 5  ;;  %v402_v30 = vrot.slane %v400_v4, 4  ;;  %v408_v38 = vrot.slane %v406_v6, 5 }
  0x96   : > { %2610 = vmatmul.mubr.bf16.gmra.mrb[44].mxu1 %v4617_v40  ;;  %v393_v18 = vor.u32 %v392_v3, %v389_v0  ;;  %v1375_v17 = vshrl.u32 %v6876_v59, 16  ;;  %v6888_v21 = vsel %vm6306_vm5, %v1358_v11, %v1362_v50  ;;  %v1378_v48 = vshll.u32 %v6876_v59, 16 }
  0x97   : > { %8746 = vst [vmem:[#allocation29_spill] sm:$0xff] %v6888_v21  ;;  %v6892_v25 = vsel %vm6306_vm5, %v1368_v15, %v1372_v54  ;;  %v403_v33 = vor.u32 %v402_v30, %v398_v19  ;;  %v4618_v10 = vcombine.low %v6859_v31, %v6868_v16  ;;  %v1384_v22 = vshll.u32 %v6900_v49, 16  ;;  %v6908_v54 = vld [vmem:[%s6251_s27 + $0x70] sm:$0xf] }
  0x98   : > { %8747 = vst [vmem:[#allocation30_spill] sm:$0xff] %v6892_v25  ;;  %v4766_v35 = vcombine.low %v6888_v21, %v6892_v25  ;;  %v394_v46 = vrot.slane %v393_v18, 4  ;;  %v1377_v40 = vrot.slane %v1375_v17, 4  ;;  %v1380_v12 = vrot.slane %v1378_v48, 5 }
  0x99   : > { %v404_v27 = vrot.slane %v403_v33, 4  ;;  %v1388_v7 = vshrl.u32 %v6900_v49, 16  ;;  %v1394_v53 = vshll.u32 %v5989_v14, 16  ;;  %v411_v31 = vshrl.u32 %v6881_v1, 16 }
  0x9a   : > { %2183 = vmatprep.mubr.bf16.mxu0 %v4766_v35  ;;  %v399_v50 = vsel %vm6306_vm5, %v394_v46, %v398_v19  ;;  %v1381_v55 = vor.u32 %v1380_v12, %v1377_v40  ;;  %v1386_v56 = vrot.slane %v1384_v22, 5  ;;  %v414_v43 = vshll.u32 %v6881_v1, 16  ;;  %v6918_v19 = vld [vmem:[%s6251_s27 + $0xb4] sm:$0xf]  ;;  %v6928_v12 = vld [vmem:[%s6251_s27 + $0x78] sm:$0xf] }
  0x9b   : > { %v409_v16 = vsel %vm6306_vm5, %v404_v27, %v408_v38  ;;  %2184 = vmatmul.mubr.bf16.gmra.mrb[48].mxu0 %v4750_v41  ;;  %v1390_v4 = vrot.slane %v1388_v7, 4  ;;  %v413_v0 = vrot.slane %v411_v31, 4  ;;  %v420_v11 = vshll.u32 %v6908_v54, 16  ;;  %v6932_v7 = vld [vmem:[%s6251_s27 + $0xb8] sm:$0xf] }
  0x9c   : > { %v4634_v62 = vcombine.low %v399_v50, %v409_v16  ;;  %v1382_v3 = vrot.slane %v1381_v55, 4  ;;  %v416_v6 = vrot.slane %v414_v43, 5  ;;  %v424_v15 = vshrl.u32 %v6908_v54, 16  ;;  %v5991_v31 = vld [vmem:[%s6251_s27 + $0xbc] sm:$0x1] }
  0x9d   : > { %v1391_v30 = vor.u32 %v1390_v4, %v1386_v56  ;;  %v1396_v18 = vrot.slane %v1394_v53, 5  ;;  %v430_v38 = vshll.u32 %v184_v28, 16  ;;  %v422_v17 = vrot.slane %v420_v11, 5  ;;  %v6942_v55 = vld [vmem:[%s6251_s27 + $0x7c] sm:$0xf] }
  0x9e   : > { %2617 = vmatprep.mubr.bf16.mxu1 %v4634_v62  ;;  %v417_v41 = vor.u32 %v416_v6, %v413_v0  ;;  %v426_v33 = vrot.slane %v424_v15, 4  ;;  %v4751_v48 = vcombine.low %v6876_v59, %v6900_v49  ;;  %v6924_v35 = vsel %vm6306_vm5, %v1382_v3, %v1386_v56  ;;  %v6951_v11 = vld [vmem:[%s6251_s27 + $0x80] sm:$0x1] }
  0x9f   : > { %2618 = vmatmul.mubr.bf16.gmra.mrb[48].mxu1 %v4618_v10  ;;  %8748 = vst [vmem:[#allocation31_spill] sm:$0xff] %v6924_v35  ;;  %v1392_v46 = vrot.slane %v1391_v30, 4  ;;  %v432_v27 = vrot.slane %v430_v38, 5  ;;  %v1399_v40 = vshrl.u32 %v6918_v19, 16  ;;  %v1402_v50 = vshll.u32 %v6918_v19, 16 }
  0xa0   : > { %v418_v22 = vrot.slane %v417_v41, 4  ;;  %v427_v10 = vor.u32 %v426_v33, %v422_v17  ;;  %v1408_v59 = vshll.u32 %v6932_v7, 16  ;;  %v1412_v53 = vshrl.u32 %v6932_v7, 16  ;;  %v6959_v41 = vld [vmem:[%s6251_s27 + $0xc0] sm:$0xf] }
  0xa1   : > { %v6937_v49 = vsel %vm6306_vm5, %v1392_v46, %v1396_v18  ;;  %v1401_v14 = vrot.slane %v1399_v40, 4  ;;  %v1418_v16 = vshll.u32 %v5991_v31, 16  ;;  %v4619_v62 = vcombine.low %v6881_v1, %v6908_v54 }
  0xa2   : > { %8749 = vst [vmem:[#allocation32_spill] sm:$0xff] %v6937_v49  ;;  %v4767_v56 = vcombine.low %v6924_v35, %v6937_v49  ;;  %v423_v28 = vsel %vm6306_vm5, %v418_v22, %v422_v17  ;;  %v428_v43 = vrot.slane %v427_v10, 4  ;;  %v1404_v4 = vrot.slane %v1402_v50, 5  ;;  %v7101_v35 = vld [vmem:[%s6251_s27 + $0xa8] sm:$0xf] }
  0xa3   : > { %v1410_v0 = vrot.slane %v1408_v59, 5  ;;  %v1414_v3 = vrot.slane %v1412_v53, 4  ;;  %v1420_v6 = vrot.slane %v1418_v16, 5  ;;  %v435_v30 = vshrl.u32 %v6928_v12, 16 }
  0xa4   : > { %2191 = vmatprep.mubr.bf16.mxu0 %v4767_v56  ;;  %v433_v15 = vsel %vm6306_vm5, %v428_v43, %v432_v27  ;;  %v438_v18 = vshll.u32 %v6928_v12, 16  ;;  %v444_v38 = vshll.u32 %v6942_v55, 16  ;;  %v1405_v54 = vor.u32 %v1404_v4, %v1401_v14  ;;  %v6964_v27 = vld [vmem:[%s6251_s27 + $0x14] sm:$0x1] }
  0xa5   : > { %v4635_v1 = vcombine.low %v423_v28, %v433_v15  ;;  %2192 = vmatmul.mubr.bf16.gmra.mrb[52].mxu0 %v4751_v48  ;;  %v1415_v17 = vor.u32 %v1414_v3, %v1410_v0  ;;  %v448_v33 = vshrl.u32 %v6942_v55, 16  ;;  %v437_v46 = vrot.slane %v435_v30, 4  ;;  %v6980_v3 = vld [vmem:[%s6251_s27 + $0x84] sm:$0xf]  ;;  %v6983_v15 = vld [vmem:[%s6251_s27 + $0x20] sm:$0x1] }
  0xa6   : > { %v440_v40 = vrot.slane %v438_v18, 5  ;;  %v446_v22 = vrot.slane %v444_v38, 5  ;;  %v454_v10 = vshll.u32 %v6951_v11, 16  ;;  %v1406_v59 = vrot.slane %v1405_v54, 4 }
  0xa7   : > { %2625 = vmatprep.mubr.bf16.mxu1 %v4635_v1  ;;  %v1416_v53 = vrot.slane %v1415_v17, 4  ;;  %v450_v31 = vrot.slane %v448_v33, 4  ;;  %v4752_v16 = vcombine.low %v6918_v19, %v6932_v7  ;;  %v1423_v56 = vshrl.u32 %v6959_v41, 16  ;;  %v6991_v1 = vld [vmem:[%s6251_s27 + $0xc4] sm:$0xf] }
  0xa8   : > { %2626 = vmatmul.mubr.bf16.gmra.mrb[52].mxu1 %v4619_v62  ;;  %v441_v48 = vor.u32 %v440_v40, %v437_v46  ;;  %v456_v14 = vrot.slane %v454_v10, 5  ;;  %v6972_v28 = vsel %vm6306_vm5, %v1406_v59, %v1410_v0  ;;  %v1426_v62 = vshll.u32 %v6959_v41, 16  ;;  %v5995_v46 = vld [vmem:[%s6251_s27 + $0xc8] sm:$0x1] }
  0xa9   : > { %8750 = vst [vmem:[#allocation33_spill] sm:$0xff] %v6972_v28  ;;  %v6976_v43 = vsel %vm6306_vm5, %v1416_v53, %v1420_v6  ;;  %v451_v4 = vor.u32 %v450_v31, %v446_v22  ;;  %v4620_v30 = vcombine.low %v6928_v12, %v6942_v55  ;;  %v1425_v18 = vrot.slane %v1423_v56, 4  ;;  %v6999_v10 = vld [vmem:[%s6251_s27 + $0x88] sm:$0xf] }
  0xaa   : > { %8751 = vst [vmem:[#allocation34_spill] sm:$0xff] %v6976_v43  ;;  %v4768_v7 = vcombine.low %v6972_v28, %v6976_v43  ;;  %v442_v0 = vrot.slane %v441_v48, 4  ;;  %v1428_v38 = vrot.slane %v1426_v62, 5  ;;  %v1432_v54 = vshll.u32 %v6991_v1, 16  ;;  %v7005_v48 = vld [vmem:[%s6251_s27 + $0x8c] sm:$0x1] }
  0xab   : > { %v452_v6 = vrot.slane %v451_v4, 4  ;;  %v1436_v33 = vshrl.u32 %v6991_v1, 16  ;;  %v1442_v40 = vshll.u32 %v5995_v46, 16  ;;  %v459_v12 = vshrl.u32 %v6980_v3, 16 }
  0xac   : > { %2199 = vmatprep.mubr.bf16.mxu0 %v4768_v7  ;;  %v447_v17 = vsel %vm6306_vm5, %v442_v0, %v446_v22  ;;  %v1429_v53 = vor.u32 %v1428_v38, %v1425_v18  ;;  %v1434_v31 = vrot.slane %v1432_v54, 5  ;;  %v462_v22 = vshll.u32 %v6980_v3, 16  ;;  %v4706_v7 = vld [vmem:[%s6251_s27 + $0xc] sm:$0xe]  ;;  %v7017_v54 = vld [vmem:[%s6251_s27 + $0x90] sm:$0xf] }
  0xad   : > { %v457_v59 = vsel %vm6306_vm5, %v452_v6, %v456_v14  ;;  %2200 = vmatmul.mubr.bf16.gmra.mrb[56].mxu0 %v4752_v16  ;;  %v1438_v4 = vrot.slane %v1436_v33, 4  ;;  %v461_v62 = vrot.slane %v459_v12, 4  ;;  %v468_v19 = vshll.u32 %v6999_v10, 16  ;;  %v7012_v14 = vld [vmem:[%s6251_s27 + $0x14] sm:$0x1] }
  0xae   : > { %v4636_v56 = vcombine.low %v447_v17, %v457_v59  ;;  %v1430_v0 = vrot.slane %v1429_v53, 4  ;;  %v464_v46 = vrot.slane %v462_v22, 5  ;;  %v472_v50 = vshrl.u32 %v6999_v10, 16  ;;  %v7022_v53 = vld [vmem:[%s6251_s27 + $0x94] sm:$0xf] }
  0xaf   : > { %v1439_v6 = vor.u32 %v1438_v4, %v1434_v31  ;;  %v1444_v18 = vrot.slane %v1442_v40, 5  ;;  %v478_v38 = vshll.u32 %v7005_v48, 16  ;;  %v470_v33 = vrot.slane %v468_v19, 5  ;;  %v7029_v16 = vld [vmem:[%s6251_s27 + $0x98] sm:$0x1] }
  0xb0   : > { %2633 = vmatprep.mubr.bf16.mxu1 %v4636_v56  ;;  %v465_v17 = vor.u32 %v464_v46, %v461_v62  ;;  %v474_v12 = vrot.slane %v472_v50, 4  ;;  %v4753_v59 = vcombine.low %v6959_v41, %v6991_v1  ;;  %v7026_v22 = vsel %vm6306_vm5, %v1430_v0, %v1434_v31  ;;  %v5997_v62 = vld [vmem:[%s6251_s27 + $0x10] sm:$0xf] }
  0xb1   : > { %2634 = vmatmul.mubr.bf16.gmra.mrb[56].mxu1 %v4620_v30  ;;  %8752 = vst [vmem:[#allocation35_spill] sm:$0xff] %v7026_v22  ;;  %v1440_v56 = vrot.slane %v1439_v6, 4  ;;  %v480_v40 = vrot.slane %v478_v38, 5  ;;  %v4722_v4 = vrot.slane %v4706_v7, 9  ;;  %v1544_v19 = vrot.slane %v5997_v62, 5 }
  0xb2   : > { %v466_v43 = vrot.slane %v465_v17, 4  ;;  %v475_v30 = vor.u32 %v474_v12, %v470_v33  ;;  %v483_v50 = vshrl.u32 %v7017_v54, 16  ;;  %v486_v1 = vshll.u32 %v7017_v54, 16  ;;  %v4707_v17 = vld [vmem:[%s6251_s27 + $0x18] sm:$0xe] }
  0xb3   : > { %v7035_v41 = vsel %vm6306_vm5, %v1440_v56, %v1444_v18  ;;  %v492_v31 = vshll.u32 %v7022_v53, 16  ;;  %v496_v0 = vshrl.u32 %v7022_v53, 16  ;;  %v4621_v38 = vcombine.low %v6980_v3, %v6999_v10 }
  0xb4   : > { %8753 = vst [vmem:[#allocation36_spill] sm:$0xff] %v7035_v41  ;;  %v4769_v7 = vcombine.low %v7026_v22, %v7035_v41  ;;  %v471_v46 = vsel %vm6306_vm5, %v466_v43, %v470_v33  ;;  %v476_v6 = vrot.slane %v475_v30, 4  ;;  %v1545_v18 = vsel %vm6290_vm4, %v4722_v4, %v1544_v19  ;;  %v4708_v33 = vld [vmem:[%s6251_s27 + $0x24] sm:$0xe] }
  0xb5   : > { %v1546_v12 = vrot.slane %v1544_v19, 4  ;;  %v485_v56 = vrot.slane %v483_v50, 4  ;;  %v488_v62 = vrot.slane %v486_v1, 5  ;;  %v494_v22 = vrot.slane %v492_v31, 5 }
  0xb6   : > { %2207 = vmatprep.mubr.bf16.mxu0 %v4769_v7  ;;  %v481_v41 = vsel %vm6306_vm5, %v476_v6, %v480_v40  ;;  %v498_v28 = vrot.slane %v496_v0, 4  ;;  %v502_v43 = vshll.u32 %v7029_v16, 16  ;;  %v8754_v30 = vrot.slane %v6964_v27, 5  ;;  %v5998_v40 = vld [vmem:[%s6251_s27 + $0x1c] sm:$0xf] }
  0xb7   : > { %v4637_v3 = vcombine.low %v471_v46, %v481_v41  ;;  %2208 = vmatmul.mubr.bf16.gmra.mrb[60].mxu0 %v4753_v59  ;;  %v489_v19 = vor.u32 %v488_v62, %v485_v56  ;;  %v4723_v50 = vrot.slane %v4707_v17, 9  ;;  %v1551_v31 = vrot.slane %v5998_v40, 5  ;;  %v7059_v0 = vld [vmem:[%s6251_s27 + $0x9c] sm:$0xf]  ;;  %v5999_v41 = vld [vmem:[%s6251_s27 + $0x28] sm:$0xf] }
  0xb8   : > { %v1548_v4 = vsel %vm6290_vm4, %v1546_v12, %v8754_v30  ;;  %v499_v7 = vor.u32 %v498_v28, %v494_v22  ;;  %v504_v49 = vrot.slane %v502_v43, 5  ;;  %v4622_v59 = vcombine.low %v7017_v54, %v7022_v53  ;;  %v7065_v12 = vld [vmem:[%s6251_s27 + $0xa0] sm:$0xf]  ;;  %v6000_v62 = vld [vmem:[%s6251_s27 + $0x2c] sm:$0x1] }
  0xb9   : > { %v4770_v1 = vcombine.low %v1545_v18, %v1548_v4  ;;  %2641 = vmatprep.mubr.bf16.mxu1 %v4637_v3  ;;  %v490_v6 = vrot.slane %v489_v19, 4  ;;  %v4724_v27 = vrot.slane %v4708_v33, 9  ;;  %v1558_v46 = vrot.slane %v5999_v41, 5  ;;  %v5935_v56 = vld [vmem:[%s8651_s1 + $0x180] sm:$0xff]   ;;  %v4709_v4 = vld [vmem:[%s6251_s27 + $0x30] sm:$0xe] }
  0xba   : > { %2642 = vmatmul.mubr.bf16.gmra.mrb[60].mxu1 %v4621_v38  ;;  %v500_v28 = vrot.slane %v499_v7, 4  ;;  %v1552_v17 = vsel %vm6290_vm4, %v4723_v50, %v1551_v31  ;;  %v1553_v18 = vrot.slane %v1551_v31, 4  ;;  %v1561_v54 = vrot.slane %v6000_v62, 5  ;;  %v7078_v3 = vld [vmem:[%s6251_s27 + $0xa4] sm:$0x1] }
  0xbb   : > { %5512 = vmatprep.mubr.bf16.mxu0 %v4770_v1  ;;  %v495_v43 = vsel %vm6306_vm5, %v490_v6, %v494_v22  ;;  %v1559_v33 = vsel %vm6290_vm4, %v4724_v27, %v1558_v46  ;;  %v1560_v38 = vrot.slane %v1558_v46, 4  ;;  %v507_v30 = vshrl.u32 %v7059_v0, 16  ;;  %v5936_v6 = vld [vmem:[%s8651_s1 + $0x1c8] sm:$0xff]   ;;  %v4710_v27 = vld [vmem:[%s6251_s27 + $0x3c] sm:$0xe] }
  0xbc   : > { %v505_v19 = vsel %vm6306_vm5, %v500_v28, %v504_v49  ;;  %v8755_v50 = vrot.slane %v6983_v15, 5  ;;  %v510_v7 = vshll.u32 %v7059_v0, 16  ;;  %v516_v22 = vshll.u32 %v7065_v12, 16 }
  0xbd   : > { %v4638_v40 = vcombine.low %v495_v43, %v505_v19  ;;  %v1562_v49 = vsel %vm6290_vm4, %v1560_v38, %v1561_v54  ;;  %v509_v15 = vrot.slane %v507_v30, 4  ;;  %v526_v62 = vshll.u32 %v7078_v3, 16  ;;  %v6001_v43 = vld [vmem:[%s6251_s27 + $0x34] sm:$0xf]  ;;  %v5937_v54 = vld [vmem:[%s8651_s1 + $0x188] sm:$0xff]  }
  0xbe   : > { %v1555_v1 = vsel %vm6290_vm4, %v1553_v18, %v8755_v50  ;;  %v4772_v41 = vcombine.low %v1559_v33, %v1562_v49  ;;  %v512_v46 = vrot.slane %v510_v7, 5  ;;  %v518_v28 = vrot.slane %v516_v22, 5  ;;  %v6002_v50 = vld [vmem:[%s6251_s27 + $0x38] sm:$0x1] }
  0xbf   : > { %v4771_v31 = vcombine.low %v1552_v17, %v1555_v1  ;;  %v520_v18 = vshrl.u32 %v7065_v12, 16  ;;  %2649 = vmatprep.mubr.bf16.mxu1 %v4638_v40  ;;  %v4725_v17 = vrot.slane %v4709_v4, 9  ;;  %v1565_v19 = vrot.slane %v6001_v43, 5  ;;  %v5939_v40 = vld [vmem:[%s8651_s1 + $0x1d0] sm:$0xff]  }
  0xc0   : > { %v1568_v1 = vrot.slane %v6002_v50, 5  ;;  %v513_v33 = vor.u32 %v512_v46, %v509_v15  ;;  %v4623_v30 = vcombine.low %v7059_v0, %v7065_v12  ;;  %v4726_v4 = vrot.slane %v4710_v27, 9  ;;  %v6004_v46 = vld [vmem:[%s6251_s27 + $0x44] sm:$0x1]  ;;  %v7116_v27 = vld [vmem:[%s6251_s27 + $0xac] sm:$0xf] }
  0xc1   : > { %5513 = vmatmul.mubr.bf16.vlgmr.msra.gmra.mrb[64].mxu0 %v4771_v31  ;;  %v522_v38 = vrot.slane %v520_v18, 4  ;;  %v528_v7 = vrot.slane %v526_v62, 5  ;;  %v1566_v22 = vsel %vm6290_vm4, %v4725_v17, %v1565_v19  ;;  %v6003_v31 = vld [vmem:[%s6251_s27 + $0x40] sm:$0xf]  ;;  %v1575_v0 = vrot.slane %v6004_v46, 5 }
  0xc2   : > { %5361 = vmatpush3.bf16.msra.mxu0 %v5935_v56  ;;  %5516 = vmatprep.mubr.bf16.mxu0 %v4772_v41  ;;  %v1567_v56 = vrot.slane %v1565_v19, 4  ;;  %v1572_v49 = vrot.slane %v6003_v31, 5  ;;  %v514_v15 = vrot.slane %v513_v33, 4  ;;  %v7124_v43 = vld [vmem:[%s6251_s27 + $0xb0] sm:$0x1]  ;;  %v534_v19 = vshll.u32 %v7101_v35, 16 }
  0xc3   : > { %5362 = vmatprep.subr.bf16.mxu0 %v5936_v6  ;;  %2650 = vmatmul.mubr.bf16.gmra.mrb[64].mxu1 %v4622_v59  ;;  %v523_v41 = vor.u32 %v522_v38, %v518_v28  ;;  %v531_v6 = vshrl.u32 %v7101_v35, 16  ;;  %v4711_v59 = vld [vmem:[%s6251_s27 + $0x48] sm:$0xe]  ;;  %v4712_v46 = vld [vmem:[%s6251_s27 + $0x54] sm:$0xe]  ;;  %v654_v24 = vrot.slane %v6013_v5, 5 }
  0xc4   : > { %v1569_v18 = vsel %vm6290_vm4, %v1567_v56, %v1568_v1  ;;  %v1573_v62 = vsel %vm6290_vm4, %v4726_v4, %v1572_v49  ;;  %v1574_v17 = vrot.slane %v1572_v49, 4  ;;  %v519_v50 = vsel %vm6306_vm5, %v514_v15, %v518_v28  ;;  %v5940_v1 = vld [vmem:[%s8651_s1 + $0x190] sm:$0xff]   ;;  %v5941_v4 = vld [vmem:[%s8651_s1 + $0x1d8] sm:$0xff]  }
  0xc5   : > { %v524_v33 = vrot.slane %v523_v41, 4  ;;  %v4773_v38 = vcombine.low %v1566_v22, %v1569_v18  ;;  %v533_v56 = vrot.slane %v531_v6, 4  ;;  %v536_v31 = vrot.slane %v534_v19, 5  ;;  %v5942_v19 = vld [vmem:[%s8651_s1 + $0x198] sm:$0xff]  }
  0xc6   : > { %5363 = vmatpush3.bf16.msra.mxu0 %v5937_v54  ;;  %v1576_v54 = vsel %vm6290_vm4, %v1574_v17, %v1575_v0  ;;  %v540_v49 = vshll.u32 %v7116_v27, 16  ;;  %v544_v28 = vshrl.u32 %v7116_v27, 16  ;;  %v4727_v41 = vrot.slane %v4711_v59, 9  ;;  %v7145_v17 = vld [vmem:[%s6251_s27 + $0xb4] sm:$0xf] }
  0xc7   : > { %5364 = vmatprep.subr.bf16.mxu0 %v5939_v40  ;;  %v529_v22 = vsel %vm6306_vm5, %v524_v33, %v528_v7  ;;  %v4774_v15 = vcombine.low %v1573_v62, %v1576_v54  ;;  %v550_v40 = vshll.u32 %v7124_v43, 16  ;;  %v537_v18 = vor.u32 %v536_v31, %v533_v56  ;;  %v6005_v62 = vld [vmem:[%s6251_s27 + $0x4c] sm:$0xf]  ;;  %v6006_v59 = vld [vmem:[%s6251_s27 + $0x50] sm:$0x1] }
  0xc8   : > { %v4639_v6 = vcombine.low %v519_v50, %v529_v22  ;;  %v542_v25 = vrot.slane %v540_v49, 5  ;;  %v546_v0 = vrot.slane %v544_v28, 4  ;;  %v1579_v33 = vrot.slane %v6005_v62, 5  ;;  %v6007_v49 = vld [vmem:[%s6251_s27 + $0x58] sm:$0xf] }
  0xc9   : > { %5517 = vmatmul.mubr.bf16.gmra.mrb[68].mxu0 %v4773_v38  ;;  %v552_v7 = vrot.slane %v550_v40, 5  ;;  %v1582_v50 = vrot.slane %v6006_v59, 5  ;;  %v4624_v38 = vcombine.low %v7101_v35, %v7116_v27  ;;  %v538_v56 = vrot.slane %v537_v18, 4  ;;  %v7159_v22 = vld [vmem:[%s6251_s27 + $0xb8] sm:$0xf] }
  0xca   : > { %5365 = vmatpush3.bf16.msra.mxu0 %v5940_v1  ;;  %5520 = vmatprep.mubr.bf16.mxu0 %v4774_v15  ;;  %v547_v54 = vor.u32 %v546_v0, %v542_v25  ;;  %v5945_v1 = vld [vmem:[%s8651_s1 + $0x1e0] sm:$0xff]   ;;  %v4728_v31 = vrot.slane %v4712_v46, 9  ;;  %v1586_v28 = vrot.slane %v6007_v49, 5  ;;  %v1580_v15 = vsel %vm6290_vm4, %v4727_v41, %v1579_v33  ;;  %v6008_v40 = vld [vmem:[%s6251_s27 + $0x5c] sm:$0x1] }
  0xcb   : > { %2657 = vmatprep.mubr.bf16.mxu1 %v4639_v6  ;;  %5366 = vmatprep.subr.bf16.mxu0 %v5941_v4  ;;  %v1581_v35 = vrot.slane %v1579_v33, 4  ;;  %v1589_v4 = vrot.slane %v6008_v40, 5  ;;  %v555_v6 = vshrl.u32 %v7145_v17, 16  ;;  %v543_v18 = vsel %vm6306_vm5, %v538_v56, %v542_v25  ;;  %v7170_v59 = vld [vmem:[%s6251_s27 + $0xbc] sm:$0x1]  ;;  %v5946_v41 = vld [vmem:[%s8651_s1 + $0x1a0] sm:$0xff]  }
  0xcc   : > { %2658 = vmatmul.mubr.bf16.gmra.mrb[68].mxu1 %v4623_v30  ;;  %v548_v0 = vrot.slane %v547_v54, 4  ;;  %v1587_v46 = vsel %vm6290_vm4, %v4728_v31, %v1586_v28  ;;  %v1588_v62 = vrot.slane %v1586_v28, 4  ;;  %v558_v49 = vshll.u32 %v7145_v17, 16  ;;  %v4713_v56 = vld [vmem:[%s6251_s27 + $0x60] sm:$0xe] }
  0xcd   : > { %v1583_v30 = vsel %vm6290_vm4, %v1581_v35, %v1582_v50  ;;  %v557_v33 = vrot.slane %v555_v6, 4  ;;  %v564_v25 = vshll.u32 %v7159_v22, 16  ;;  %v568_v28 = vshrl.u32 %v7159_v22, 16  ;;  %v578_v35 = vld [vmem:[%s6251_s27] sm:$0xe] }
  0xce   : > { %5367 = vmatpush3.bf16.msra.mxu0 %v5942_v19  ;;  %v553_v54 = vsel %vm6306_vm5, %v548_v0, %v552_v7  ;;  %v4775_v31 = vcombine.low %v1580_v15, %v1583_v30  ;;  %v5947_v19 = vld [vmem:[%s8651_s1 + $0x1e8] sm:$0xff]   ;;  %v1590_v50 = vsel %vm6290_vm4, %v1588_v62, %v1589_v4  ;;  %v560_v21 = vrot.slane %v558_v49, 5  ;;  %v6009_v0 = vld [vmem:[%s6251_s27 + $0x64] sm:$0xf] }
  0xcf   : > { %5368 = vmatprep.subr.bf16.mxu0 %v5945_v1  ;;  %v4640_v40 = vcombine.low %v543_v18, %v553_v54  ;;  %v4776_v6 = vcombine.low %v1587_v46, %v1590_v50  ;;  %v566_v61 = vrot.slane %v564_v25, 5  ;;  %v570_v7 = vrot.slane %v568_v28, 4  ;;  %v5948_v4 = vld [vmem:[%s8651_s1 + $0x1a8] sm:$0xff]   ;;  %v6011_v28 = vld [vmem:[%s6251_s27 + $0x4] sm:$0xf] }
  0xd0   : > { %v574_v1 = vshll.u32 %v7170_v59, 16  ;;  %v4729_v15 = vrot.slane %v4713_v56, 9  ;;  %v1593_v30 = vrot.slane %v6009_v0, 5  ;;  %v561_v18 = vor.u32 %v560_v21, %v557_v33  ;;  %v6010_v46 = vld [vmem:[%s6251_s27 + $0x68] sm:$0x1]  ;;  %v5950_v21 = vld [vmem:[%s8651_s1 + $0x1f0] sm:$0xff]  }
  0xd1   : > { %5521 = vmatmul.mubr.bf16.gmra.mrb[72].mxu0 %v4775_v31  ;;  %2665 = vmatprep.mubr.bf16.mxu1 %v4640_v40  ;;  %v1596_v62 = vrot.slane %v6010_v46, 5  ;;  %v4625_v49 = vcombine.low %v7145_v17, %v7159_v22  ;;  %v4594_v25 = vrot.slane %v578_v35, 9  ;;  %v7201_v56 = vld [vmem:[%s6251_s27 + $0x1c] sm:$0xf]  ;;  %v571_v54 = vor.u32 %v570_v7, %v566_v61  ;;  %v6012_v35 = vld [vmem:[%s6251_s27 + $0x8] sm:$0x1] }
  0xd2   : > { %5369 = vmatpush3.bf16.msra.mxu0 %v5946_v41  ;;  %5524 = vmatprep.mubr.bf16.mxu0 %v4776_v6  ;;  %v576_v41 = vrot.slane %v574_v1, 5  ;;  %v1594_v31 = vsel %vm6290_vm4, %v4729_v15, %v1593_v30  ;;  %v1595_v50 = vrot.slane %v1593_v30, 4  ;;  %v562_v33 = vrot.slane %v561_v18, 4  ;;  %v7214_v1 = vld [vmem:[%s6251_s27 + $0x20] sm:$0x1]  ;;  %v5951_v18 = vld [vmem:[%s8651_s1 + $0x1b0] sm:$0xff]  }
  0xd3   : > { %5370 = vmatprep.subr.bf16.mxu0 %v5947_v19  ;;  %v647_v17 = vrot.slane %v6011_v28, 5  ;;  %v650_v40 = vrot.slane %v6012_v35, 5  ;;  %v2893_v19 = vshrl.u32 %v7192_v26, 16  ;;  %v572_v6 = vrot.slane %v571_v54, 4  ;;  %v579_v54 = vld [vmem:[%s6251_s27 + $0xc] sm:$0xe] }
  0xd4   : > { %2666 = vmatmul.mubr.bf16.gmra.mrb[72].mxu1 %v4624_v38  ;;  %v1597_v7 = vsel %vm6290_vm4, %v1595_v50, %v1596_v62  ;;  %v2896_v15 = vshll.u32 %v7192_v26, 16  ;;  %v2902_v0 = vshll.u32 %v7201_v56, 16  ;;  %v567_v38 = vsel %vm6306_vm5, %v562_v33, %v566_v61  ;;  %v5952_v61 = vld [vmem:[%s8651_s1 + $0x1f8] sm:$0xff]  }
  0xd5   : > { %v4777_v30 = vcombine.low %v1594_v31, %v1597_v7  ;;  %v648_v46 = vsel %vm6290_vm4, %v4594_v25, %v647_v17  ;;  %v649_v62 = vrot.slane %v647_v17, 4  ;;  %v577_v50 = vsel %vm6306_vm5, %v572_v6, %v576_v41  ;;  %v580_v28 = vld [vmem:[%s6251_s27 + $0x18] sm:$0xe] }
  0xd6   : > { %5371 = vmatpush3.bf16.msra.mxu0 %v5948_v4  ;;  %v2895_v4 = vrot.slane %v2893_v19, 4  ;;  %v2898_v31 = vrot.slane %v2896_v15, 5  ;;  %v2904_v33 = vrot.slane %v2902_v0, 5  ;;  %v4641_v35 = vcombine.low %v567_v38, %v577_v50  ;;  %v7238_v19 = vld [vmem:[%s6251_s27 + $0x24] sm:$0xf] }
  0xd7   : > { %5372 = vmatprep.subr.bf16.mxu0 %v5950_v21  ;;  %v651_v25 = vsel %vm6290_vm4, %v649_v62, %v650_v40  ;;  %v2906_v17 = vshrl.u32 %v7201_v56, 16  ;;  %v2912_v7 = vshll.u32 %v7214_v1, 16  ;;  %v4595_v6 = vrot.slane %v579_v54, 9  ;;  %v5953_v40 = vld [vmem:[%s8651_s1 + $0x1b8] sm:$0xff]  }
  0xd8   : > { %v4642_v41 = vcombine.low %v648_v46, %v651_v25  ;;  %v2899_v21 = vor.u32 %v2898_v31, %v2895_v4  ;;  %2673 = vmatprep.mubr.bf16.mxu1 %v4641_v35  ;;  %v4962_v38 = vcombine.low %v7192_v26, %v7201_v56  ;;  %v656_v62 = vrot.slane %v654_v24, 4  ;;  %v6014_v54 = vld [vmem:[%s6251_s27 + $0x1c] sm:$0xf]  ;;  %v6015_v31 = vld [vmem:[%s6251_s27 + $0x20] sm:$0x1] }
  0xd9   : > { %5525 = vmatmul.mubr.bf16.gmra.mrb[76].mxu0 %v4777_v30  ;;  %v2908_v15 = vrot.slane %v2906_v17, 4  ;;  %v2914_v0 = vrot.slane %v2912_v7, 5  ;;  %v4596_v30 = vrot.slane %v580_v28, 9  ;;  %v655_v5 = vsel %vm6290_vm4, %v4595_v6, %v654_v24  ;;  %v7253_v25 = vld [vmem:[%s6251_s27 + $0x2c] sm:$0x1] }
  0xda   : > { %5373 = vmatpush3.bf16.msra.mxu0 %v5951_v18  ;;  %v2900_v46 = vrot.slane %v2899_v21, 4  ;;  %v661_v50 = vrot.slane %v6014_v54, 5  ;;  %v7249_v18 = vld [vmem:[%s6251_s27 + $0x28] sm:$0xf]  ;;  %v664_v35 = vrot.slane %v6015_v31, 5  ;;  %v2917_v17 = vshrl.u32 %v7238_v19, 16 }
  0xdb   : > { %5374 = vmatprep.subr.bf16.mxu0 %v5952_v61  ;;  %v2909_v4 = vor.u32 %v2908_v15, %v2904_v33  ;;  %v2920_v26 = vshll.u32 %v7238_v19, 16  ;;  %v8756_v24 = vrot.slane %v7012_v14, 5  ;;  %v2930_v14 = vshrl.u32 %v7249_v18, 16 }
  0xdc   : > { %2674 = vmatmul.mubr.bf16.gmra.mrb[76].mxu1 %v4625_v49  ;;  %v2905_v61 = vsel %vm6306_vm5, %v2900_v46, %v2904_v33  ;;  %v662_v49 = vsel %vm6290_vm4, %v4596_v30, %v661_v50  ;;  %v663_v7 = vrot.slane %v661_v50, 4  ;;  %v2919_v15 = vrot.slane %v2917_v17, 4 }
  0xdd   : > { %5560 = vmatprep.mubr.bf16.mxu1 %v4642_v41  ;;  %v658_v28 = vsel %vm6290_vm4, %v656_v62, %v8756_v24  ;;  %v2910_v21 = vrot.slane %v2909_v4, 4  ;;  %v2922_v54 = vrot.slane %v2920_v26, 5  ;;  %v2926_v33 = vshll.u32 %v7249_v18, 16  ;;  %v581_v62 = vld [vmem:[%s6251_s27 + $0x24] sm:$0xe]  ;;  %v5957_v24 = vld [vmem:[%s8651_s1 + $0x208] sm:$0xff]  }
  0xde   : > { %5375 = vmatpush3.bf16.msra.mxu0 %v5953_v40  ;;  %v4643_v6 = vcombine.low %v655_v5, %v658_v28  ;;  %v665_v41 = vsel %vm6290_vm4, %v663_v7, %v664_v35  ;;  %v2936_v46 = vshll.u32 %v7253_v25, 16  ;;  %v582_v4 = vld [vmem:[%s6251_s27 + $0x30] sm:$0xe]  ;;  %v2932_v17 = vrot.slane %v2930_v14, 4 }
  0xdf   : > { %v2915_v30 = vsel %vm6306_vm5, %v2910_v21, %v2914_v0  ;;  %v4644_v40 = vcombine.low %v662_v49, %v665_v41  ;;  %v2923_v5 = vor.u32 %v2922_v54, %v2919_v15  ;;  %v2928_v35 = vrot.slane %v2926_v33, 5  ;;  %v6017_v49 = vld [vmem:[%s6251_s27 + $0x2c] sm:$0x1]  ;;  %v7281_v15 = vld [vmem:[%s6251_s27 + $0x30] sm:$0xf] }
  0xe0   : > { %v4978_v31 = vcombine.low %v2905_v61, %v2915_v30  ;;  %v2938_v26 = vrot.slane %v2936_v46, 5  ;;  %v4597_v7 = vrot.slane %v581_v62, 9  ;;  %v668_v0 = vrot.slane %v6016_v9, 5  ;;  %v6018_v33 = vld [vmem:[%s6251_s27 + $0x34] sm:$0xf] }
  0xe1   : > { %v2924_v28 = vrot.slane %v2923_v5, 4  ;;  %v671_v21 = vrot.slane %v6017_v49, 5  ;;  %v2933_v61 = vor.u32 %v2932_v17, %v2928_v35  ;;  %v4963_v54 = vcombine.low %v7238_v19, %v7249_v18  ;;  %v7287_v46 = vld [vmem:[%s6251_s27 + $0x34] sm:$0xf]  ;;  %v6019_v5 = vld [vmem:[%s6251_s27 + $0x38] sm:$0x1] }
  0xe2   : > { %3885 = vmatprep.mubr.bf16.mxu0 %v4978_v31  ;;  %v4598_v41 = vrot.slane %v582_v4, 9  ;;  %v675_v14 = vrot.slane %v6018_v33, 5  ;;  %v669_v62 = vsel %vm6290_vm4, %v4597_v7, %v668_v0  ;;  %v670_v30 = vrot.slane %v668_v0, 4  ;;  %v6020_v19 = vld [vmem:[%s8651_s1 + $0x200] sm:$0xff]   ;;  %v583_v49 = vld [vmem:[%s6251_s27 + $0x3c] sm:$0xe] }
  0xe3   : > { %3886 = vmatmul.mubr.bf16.vlgmr.msra.gmra.mrb[80].mxu0 %v4962_v38  ;;  %v2929_v9 = vsel %vm6306_vm5, %v2924_v28, %v2928_v35  ;;  %v678_v31 = vrot.slane %v6019_v5, 5  ;;  %v2934_v4 = vrot.slane %v2933_v61, 4  ;;  %v7300_v35 = vld [vmem:[%s6251_s27 + $0x38] sm:$0x1]  ;;  %v2941_v17 = vshrl.u32 %v7281_v15, 16  ;;  %v5959_v61 = vld [vmem:[%s8651_s1 + $0x210] sm:$0xff]  }
  0xe4   : > { %5561 = vmatmul.mubr.bf16.vlgmr.msra.gmra.mrb[80].mxu1 %v4643_v6  ;;  %v676_v38 = vsel %vm6290_vm4, %v4598_v41, %v675_v14  ;;  %v677_v6 = vrot.slane %v675_v14, 4  ;;  %v672_v28 = vsel %vm6290_vm4, %v670_v30, %v671_v21  ;;  %v2944_v7 = vshll.u32 %v7281_v15, 16  ;;  %v584_v30 = vld [vmem:[%s6251_s27 + $0x48] sm:$0xe] }
  0xe5   : > { %5593 = vmatpush3.bf16.msra.mxu1 %v6020_v19  ;;  %5564 = vmatprep.mubr.bf16.mxu1 %v4644_v40  ;;  %v2950_v0 = vshll.u32 %v7287_v46, 16  ;;  %v2954_v40 = vshrl.u32 %v7287_v46, 16  ;;  %v2939_v41 = vsel %vm6306_vm5, %v2934_v4, %v2938_v26  ;;  %v4645_v33 = vcombine.low %v669_v62, %v672_v28  ;;  %v7320_v26 = vld [vmem:[%s6251_s27 + $0x3c] sm:$0xf] }
  0xe6   : > { %5594 = vmatprep.subr.bf16.mxu1 %v5957_v24  ;;  %v679_v21 = vsel %vm6290_vm4, %v677_v6, %v678_v31  ;;  %v2943_v14 = vrot.slane %v2941_v17, 4  ;;  %v4979_v5 = vcombine.low %v2929_v9, %v2939_v41  ;;  %v2946_v50 = vrot.slane %v2944_v7, 5  ;;  %v6022_v31 = vld [vmem:[%s6251_s27 + $0x44] sm:$0x1]  ;;  %v5961_v6 = vld [vmem:[%s8651_s1 + $0x218] sm:$0xff]  }
  0xe7   : > { %v4646_v19 = vcombine.low %v676_v38, %v679_v21  ;;  %v2952_v42 = vrot.slane %v2950_v0, 5  ;;  %v2956_v2 = vrot.slane %v2954_v40, 4  ;;  %v2960_v37 = vshll.u32 %v7300_v35, 16  ;;  %v6023_v0 = vld [vmem:[%s6251_s27 + $0x4c] sm:$0xf] }
  0xe8   : > { %v4599_v8 = vrot.slane %v583_v49, 9  ;;  %v682_v32 = vrot.slane %v6021_v34, 5  ;;  %3893 = vmatprep.mubr.bf16.mxu0 %v4979_v5  ;;  %v2947_v62 = vor.u32 %v2946_v50, %v2943_v14  ;;  %v685_v4 = vrot.slane %v6022_v31, 5  ;;  %v6024_v40 = vld [vmem:[%s6251_s27 + $0x50] sm:$0x1] }
  0xe9   : > { %5595 = vmatpush3.bf16.msra.mxu1 %v5957_v24  ;;  %v4964_v9 = vcombine.low %v7281_v15, %v7287_v46  ;;  %v4600_v38 = vrot.slane %v584_v30, 9  ;;  %v7326_v24 = vld [vmem:[%s6251_s27 + $0x40] sm:$0xf]  ;;  %v2957_v34 = vor.u32 %v2956_v2, %v2952_v42  ;;  %v2962_v17 = vrot.slane %v2960_v37, 5  ;;  %v7339_v37 = vld [vmem:[%s6251_s27 + $0x44] sm:$0x1] }
  0xea   : > { %5596 = vmatprep.subr.bf16.mxu1 %v5959_v61  ;;  %v683_v50 = vsel %vm6290_vm4, %v4599_v8, %v682_v32  ;;  %v684_v28 = vrot.slane %v682_v32, 4  ;;  %v2948_v7 = vrot.slane %v2947_v62, 4  ;;  %v689_v15 = vrot.slane %v6023_v0, 5  ;;  %v585_v5 = vld [vmem:[%s6251_s27 + $0x54] sm:$0xe] }
  0xeb   : > { %3894 = vmatmul.mubr.bf16.gmra.mrb[84].mxu0 %v4963_v54  ;;  %v692_v49 = vrot.slane %v6024_v40, 5  ;;  %v2965_v41 = vshrl.u32 %v7320_v26, 16  ;;  %v2958_v21 = vrot.slane %v2957_v34, 4  ;;  %v2968_v32 = vshll.u32 %v7320_v26, 16  ;;  %v6025_v40 = vld [vmem:[%s6251_s27 + $0x58] sm:$0xf] }
  0xec   : > { %5565 = vmatmul.mubr.bf16.gmra.mrb[84].mxu1 %v4645_v33  ;;  %v686_v2 = vsel %vm6290_vm4, %v684_v28, %v685_v4  ;;  %v2974_v8 = vshll.u32 %v7326_v24, 16  ;;  %v2953_v54 = vsel %vm6306_vm5, %v2948_v7, %v2952_v42  ;;  %v690_v14 = vsel %vm6290_vm4, %v4600_v38, %v689_v15  ;;  %v586_v28 = vld [vmem:[%s6251_s27 + $0x60] sm:$0xe] }
  0xed   : > { %5568 = vmatprep.mubr.bf16.mxu1 %v4646_v19  ;;  %5597 = vmatpush3.bf16.msra.mxu1 %v5959_v61  ;;  %v4647_v33 = vcombine.low %v683_v50, %v686_v2  ;;  %v691_v30 = vrot.slane %v689_v15, 4  ;;  %v5963_v61 = vld [vmem:[%s8651_s1 + $0x220] sm:$0xff]   ;;  %v2963_v19 = vsel %vm6306_vm5, %v2958_v21, %v2962_v17  ;;  %v2967_v62 = vrot.slane %v2965_v41, 4  ;;  %v7360_v17 = vld [vmem:[%s6251_s27 + $0x48] sm:$0xf] }
  0xee   : > { %5598 = vmatprep.subr.bf16.mxu1 %v5961_v6  ;;  %v2970_v31 = vrot.slane %v2968_v32, 5  ;;  %v2976_v4 = vrot.slane %v2974_v8, 5  ;;  %v4980_v42 = vcombine.low %v2953_v54, %v2963_v19  ;;  %v2978_v34 = vshrl.u32 %v7326_v24, 16  ;;  %v7366_v54 = vld [vmem:[%s6251_s27 + $0x4c] sm:$0xf] }
  0xef   : > { %v693_v38 = vsel %vm6290_vm4, %v691_v30, %v692_v49  ;;  %v2984_v50 = vshll.u32 %v7339_v37, 16  ;;  %v4601_v15 = vrot.slane %v585_v5, 9  ;;  %v696_v2 = vrot.slane %v6025_v40, 5  ;;  %v6026_v49 = vld [vmem:[%s6251_s27 + $0x5c] sm:$0x1] }
  0xf0   : > { %v4648_v7 = vcombine.low %v690_v14, %v693_v38  ;;  %v2971_v0 = vor.u32 %v2970_v31, %v2967_v62  ;;  %3901 = vmatprep.mubr.bf16.mxu0 %v4980_v42  ;;  %v2980_v41 = vrot.slane %v2978_v34, 4  ;;  %v699_v32 = vrot.slane %v6026_v49, 5  ;;  %v5965_v14 = vld [vmem:[%s8651_s1 + $0x228] sm:$0xff]   ;;  %v6027_v31 = vld [vmem:[%s6251_s27 + $0x64] sm:$0xf] }
  0xf1   : > { %5599 = vmatpush3.bf16.msra.mxu1 %v5961_v6  ;;  %v2986_v21 = vrot.slane %v2984_v50, 5  ;;  %v4965_v8 = vcombine.low %v7320_v26, %v7326_v24  ;;  %v697_v30 = vsel %vm6290_vm4, %v4601_v15, %v696_v2  ;;  %v698_v5 = vrot.slane %v696_v2, 4  ;;  %v6028_v42 = vld [vmem:[%s6251_s27 + $0x68] sm:$0x1]  ;;  %v7381_v15 = vld [vmem:[%s6251_s27 + $0x50] sm:$0x1] }
  0xf2   : > { %5600 = vmatprep.subr.bf16.mxu1 %v5963_v61  ;;  %v2972_v6 = vrot.slane %v2971_v0, 4  ;;  %v4602_v19 = vrot.slane %v586_v28, 9  ;;  %v2981_v62 = vor.u32 %v2980_v41, %v2976_v4  ;;  %v703_v26 = vrot.slane %v6027_v31, 5  ;;  %v588_v31 = vld [vmem:[%s6251_s27 + $0x78] sm:$0xe] }
  0xf3   : > { %3902 = vmatmul.mubr.bf16.gmra.mrb[88].mxu0 %v4964_v9  ;;  %v706_v38 = vrot.slane %v6028_v42, 5  ;;  %v2989_v34 = vshrl.u32 %v7360_v17, 16  ;;  %v700_v0 = vsel %vm6290_vm4, %v698_v5, %v699_v32  ;;  %v2992_v28 = vshll.u32 %v7360_v17, 16 }
  0xf4   : > { %5569 = vmatmul.mubr.bf16.gmra.mrb[88].mxu1 %v4647_v33  ;;  %v2977_v50 = vsel %vm6306_vm5, %v2972_v6, %v2976_v4  ;;  %v2998_v9 = vshll.u32 %v7366_v54, 16  ;;  %v587_v33 = vld [vmem:[%s6251_s27 + $0x6c] sm:$0xe]  ;;  %v2982_v40 = vrot.slane %v2981_v62, 4  ;;  %v4649_v2 = vcombine.low %v697_v30, %v700_v0  ;;  %v5967_v4 = vld [vmem:[%s8651_s1 + $0x230] sm:$0xff]  }
  0xf5   : > { %5572 = vmatprep.mubr.bf16.mxu1 %v4648_v7  ;;  %5601 = vmatpush3.bf16.msra.mxu1 %v5963_v61  ;;  %v704_v7 = vsel %vm6290_vm4, %v4602_v19, %v703_v26  ;;  %v705_v41 = vrot.slane %v703_v26, 4  ;;  %v2991_v49 = vrot.slane %v2989_v34, 4  ;;  %v2994_v32 = vrot.slane %v2992_v28, 5  ;;  %v7399_v28 = vld [vmem:[%s6251_s27 + $0x54] sm:$0xf] }
  0xf6   : > { %5602 = vmatprep.subr.bf16.mxu1 %v5965_v14  ;;  %v3000_v6 = vrot.slane %v2998_v9, 5  ;;  %v3002_v5 = vshrl.u32 %v7366_v54, 16  ;;  %v2987_v61 = vsel %vm6306_vm5, %v2982_v40, %v2986_v21  ;;  %v3008_v19 = vshll.u32 %v7381_v15, 16 }
  0xf7   : > { %v707_v30 = vsel %vm6290_vm4, %v705_v41, %v706_v38  ;;  %v4603_v62 = vrot.slane %v587_v33, 9  ;;  %v4981_v26 = vcombine.low %v2977_v50, %v2987_v61  ;;  %v2995_v0 = vor.u32 %v2994_v32, %v2991_v49  ;;  %v5969_v50 = vld [vmem:[%s8651_s1 + $0x238] sm:$0xff]  }
  0xf8   : > { %v4650_v42 = vcombine.low %v704_v7, %v707_v30  ;;  %v3004_v34 = vrot.slane %v3002_v5, 4  ;;  %v3010_v9 = vrot.slane %v3008_v19, 5  ;;  %v710_v29 = vrot.slane %v6029_v20, 5  ;;  %v7410_v41 = vld [vmem:[%s6251_s27 + $0x58] sm:$0xf] }
  0xf9   : > { %5603 = vmatpush3.bf16.msra.mxu1 %v5965_v14  ;;  %v713_v21 = vrot.slane %v6030_v23, 5  ;;  %v4966_v38 = vcombine.low %v7360_v17, %v7366_v54  ;;  %3909 = vmatprep.mubr.bf16.mxu0 %v4981_v26  ;;  %v2996_v33 = vrot.slane %v2995_v0, 4  ;;  %v4604_v7 = vrot.slane %v588_v31, 9  ;;  %v7423_v61 = vld [vmem:[%s6251_s27 + $0x5c] sm:$0x1] }
  0xfa   : > { %5604 = vmatprep.subr.bf16.mxu1 %v5967_v4  ;;  %v3005_v40 = vor.u32 %v3004_v34, %v3000_v6  ;;  %v717_v14 = vrot.slane %v6942_v55, 5  ;;  %v711_v23 = vsel %vm6290_vm4, %v4603_v62, %v710_v29  ;;  %v712_v20 = vrot.slane %v710_v29, 4  ;;  %v590_v34 = vld [vmem:[%s6251_s27 + $0x90] sm:$0xe] }
  0xfb   : > { %3910 = vmatmul.mubr.bf16.gmra.mrb[92].mxu0 %v4965_v8  ;;  %v720_v17 = vrot.slane %v6951_v11, 5  ;;  %v3013_v49 = vshrl.u32 %v7399_v28, 16  ;;  %v3001_v5 = vsel %vm6306_vm5, %v2996_v33, %v3000_v6  ;;  %v3016_v19 = vshll.u32 %v7399_v28, 16  ;;  %v589_v6 = vld [vmem:[%s6251_s27 + $0x84] sm:$0xe] }
  0xfc   : > { %5573 = vmatmul.mubr.bf16.gmra.mrb[92].mxu1 %v4649_v2  ;;  %v3006_v55 = vrot.slane %v3005_v40, 4  ;;  %v718_v2 = vsel %vm6290_vm4, %v4604_v7, %v717_v14  ;;  %v719_v8 = vrot.slane %v717_v14, 4  ;;  %v714_v11 = vsel %vm6290_vm4, %v712_v20, %v713_v21 }
  0xfd   : > { %5576 = vmatprep.mubr.bf16.mxu1 %v4650_v42  ;;  %5605 = vmatpush3.bf16.msra.mxu1 %v5967_v4  ;;  %v3015_v30 = vrot.slane %v3013_v49, 4  ;;  %v3022_v62 = vshll.u32 %v7410_v41, 16  ;;  %v4651_v42 = vcombine.low %v711_v23, %v714_v11  ;;  %v3026_v0 = vshrl.u32 %v7410_v41, 16  ;;  %v7445_v23 = vld [vmem:[%s6251_s27 + $0x60] sm:$0xf] }
  0xfe   : > { %5606 = vmatprep.subr.bf16.mxu1 %v5969_v50  ;;  %v3011_v26 = vsel %vm6306_vm5, %v3006_v55, %v3010_v9  ;;  %v721_v4 = vsel %vm6290_vm4, %v719_v8, %v720_v17  ;;  %v3018_v7 = vrot.slane %v3016_v19, 5  ;;  %v3032_v49 = vshll.u32 %v7423_v61, 16 }
  0xff   : > { %v4982_v33 = vcombine.low %v3001_v5, %v3011_v26  ;;  %v4652_v40 = vcombine.low %v718_v2, %v721_v4  ;;  %v3024_v14 = vrot.slane %v3022_v62, 5  ;;  %v3028_v20 = vrot.slane %v3026_v0, 4  ;;  %v7451_v2 = vld [vmem:[%s6251_s27 + $0x64] sm:$0xf]  ;;  %v7461_v4 = vld [vmem:[%s6251_s27 + $0x68] sm:$0x1] }
 0x100   : > { %v4605_v13 = vrot.slane %v589_v6, 9  ;;  %v724_v9 = vrot.slane %v6999_v10, 5  ;;  %v3019_v17 = vor.u32 %v3018_v7, %v3015_v30  ;;  %v727_v55 = vrot.slane %v7005_v48, 5 }
 0x101   : > { %5607 = vmatpush3.bf16.msra.mxu1 %v5969_v50  ;;  %3917 = vmatprep.mubr.bf16.mxu0 %v4982_v33  ;;  %v4967_v8 = vcombine.low %v7399_v28, %v7410_v41  ;;  %v4606_v5 = vrot.slane %v590_v34, 9  ;;  %v3029_v11 = vor.u32 %v3028_v20, %v3024_v14  ;;  %v3034_v19 = vrot.slane %v3032_v49, 5  ;;  %v591_v34 = vld [vmem:[%s6251_s27 + $0x9c] sm:$0xe] }
 0x102   : > { %v725_v62 = vsel %vm6290_vm4, %v4605_v13, %v724_v9  ;;  %v726_v10 = vrot.slane %v724_v9, 4  ;;  %v3020_v50 = vrot.slane %v3019_v17, 4  ;;  %v731_v30 = vrot.slane %v7022_v53, 5 }
 0x103   : > { %3918 = vmatmul.mubr.bf16.gmra.mrb[96].mxu0 %v4966_v38  ;;  %v734_v48 = vrot.slane %v7029_v16, 5  ;;  %v3037_v28 = vshrl.u32 %v7445_v23, 16  ;;  %v3030_v6 = vrot.slane %v3029_v11, 4  ;;  %v3040_v13 = vshll.u32 %v7445_v23, 16 }
 0x104   : > { %5577 = vmatmul.mubr.bf16.gmra.mrb[0].mxu1 %v4651_v42  ;;  %v728_v26 = vsel %vm6290_vm4, %v726_v10, %v727_v55  ;;  %v3046_v42 = vshll.u32 %v7451_v2, 16  ;;  %v3025_v38 = vsel %vm6306_vm5, %v3020_v50, %v3024_v14  ;;  %v732_v16 = vsel %vm6290_vm4, %v4606_v5, %v731_v30 }
 0x105   : > { %5580 = vmatprep.mubr.bf16.mxu1 %v4652_v40  ;;  %v4653_v0 = vcombine.low %v725_v62, %v728_v26  ;;  %v733_v53 = vrot.slane %v731_v30, 4  ;;  %v3035_v40 = vsel %vm6306_vm5, %v3030_v6, %v3034_v19  ;;  %v3039_v7 = vrot.slane %v3037_v28, 4  ;;  %v592_v30 = vld [vmem:[%s6251_s27 + $0xa8] sm:$0xe] }
 0x106   : > { %v3042_v20 = vrot.slane %v3040_v13, 5  ;;  %v3048_v49 = vrot.slane %v3046_v42, 5  ;;  %v4983_v17 = vcombine.low %v3025_v38, %v3035_v40  ;;  %v3050_v55 = vshrl.u32 %v7451_v2, 16  ;;  %v7486_v42 = vld [vmem:[%s6251_s27 + $0x6c] sm:$0xf] }
 0x107   : > { %v735_v14 = vsel %vm6290_vm4, %v733_v53, %v734_v48  ;;  %v3056_v5 = vshll.u32 %v7461_v4, 16  ;;  %v4607_v50 = vrot.slane %v591_v34, 9  ;;  %v738_v19 = vrot.slane %v7065_v12, 5 }
 0x108   : > { %v4654_v62 = vcombine.low %v732_v16, %v735_v14  ;;  %v3043_v10 = vor.u32 %v3042_v20, %v3039_v7  ;;  %3925 = vmatprep.mubr.bf16.mxu0 %v4983_v17  ;;  %v3052_v6 = vrot.slane %v3050_v55, 4  ;;  %v741_v13 = vrot.slane %v7078_v3, 5  ;;  %v7500_v7 = vld [vmem:[%s6251_s27 + $0x70] sm:$0xf] }
 0x109   : > { %v3058_v26 = vrot.slane %v3056_v5, 5  ;;  %v4968_v48 = vcombine.low %v7445_v23, %v7451_v2  ;;  %v739_v16 = vsel %vm6290_vm4, %v4607_v50, %v738_v19  ;;  %v740_v12 = vrot.slane %v738_v19, 4 }
 0x10a   : > { %v7416_v32 = vpop.f32.mrb[0].mxu0  ;;  %v3044_v38 = vrot.slane %v3043_v10, 4  ;;  %v3053_v34 = vor.u32 %v3052_v6, %v3048_v49  ;;  %v4608_v23 = vrot.slane %v592_v30, 9  ;;  %v745_v40 = vrot.slane %v7116_v27, 5  ;;  %v7523_v30 = vld [vmem:[%s6251_s27 + $0x78] sm:$0xf] }
 0x10b   : > { %v7425_v29 = vpop.f32.mrb[1].mxu0  ;;  %3926 = vmatmul.mubr.bf16.gmra.mrb[100].mxu0 %v4967_v8  ;;  %v7508_v8 = vld [vmem:[%s6251_s27 + $0x74] sm:$0x1]  ;;  %v3070_v5 = vshll.u32 %v7500_v7, 16 }
 0x10c   : > { %v7432_v31 = vpop.f32.mrb[2].mxu0  ;;  %v7492_v53 = vadd.f32 %v7425_v29, %v7416_v32  ;;  %5581 = vmatmul.mubr.bf16.gmra.mrb[4].mxu1 %v4653_v0  ;;  %v3049_v20 = vsel %vm6306_vm5, %v3044_v38, %v3048_v49  ;;  %v742_v32 = vsel %vm6290_vm4, %v740_v12, %v741_v13  ;;  %v748_v29 = vrot.slane %v7124_v43, 5 }
 0x10d   : > { %v7440_v21 = vpop.f32.mrb[3].mxu0  ;;  %5584 = vmatprep.mubr.bf16.mxu1 %v4654_v62  ;;  %v3054_v0 = vrot.slane %v3053_v34, 4  ;;  %v4655_v17 = vcombine.low %v739_v16, %v742_v32  ;;  %v746_v27 = vsel %vm6290_vm4, %v4608_v23, %v745_v40  ;;  %v747_v14 = vrot.slane %v745_v40, 4  ;;  %v7526_v34 = vld [vmem:[%s6251_s27 + $0x7c] sm:$0xf] }
 0x10e   : > { %v7496_v3 = vadd.f32 %v7440_v21, %v7432_v31  ;;  %v3061_v31 = vshrl.u32 %v7486_v42, 16  ;;  %v593_v21 = vld [vmem:[%s6251_s27 + $0xb4] sm:$0xe]  ;;  %v3064_v49 = vshll.u32 %v7486_v42, 16  ;;  %v3074_v43 = vshrl.u32 %v7500_v7, 16 }
 0x10f   : > { %v3059_v62 = vsel %vm6306_vm5, %v3054_v0, %v3058_v26  ;;  %v749_v10 = vsel %vm6290_vm4, %v747_v14, %v748_v29  ;;  %v3080_v50 = vshll.u32 %v7508_v8, 16  ;;  %v4609_v19 = vrot.slane %v593_v21, 9  ;;  %v7539_v14 = vld [vmem:[%s6251_s27 + $0x80] sm:$0x1] }
 0x110   : > { %v3063_v55 = vrot.slane %v3061_v31, 4  ;;  %v4984_v13 = vcombine.low %v3049_v20, %v3059_v62  ;;  %v4656_v38 = vcombine.low %v746_v27, %v749_v10  ;;  %v3066_v16 = vrot.slane %v3064_v49, 5 }
 0x111   : > { %v3072_v12 = vrot.slane %v3070_v5, 5  ;;  %v3076_v40 = vrot.slane %v3074_v43, 4  ;;  %v3082_v32 = vrot.slane %v3080_v50, 5  ;;  %v752_v26 = vrot.slane %v7159_v22, 5 }
 0x112   : > { %v7470_v33 = vpop.f32.mrb[4].mxu0  ;;  %v755_v29 = vrot.slane %v7170_v59, 5  ;;  %3933 = vmatprep.mubr.bf16.mxu0 %v4984_v13  ;;  %v3067_v21 = vor.u32 %v3066_v16, %v3063_v55  ;;  %v4969_v0 = vcombine.low %v7486_v42, %v7500_v7  ;;  %v3085_v42 = vshrl.u32 %v7523_v30, 16 }
 0x113   : > { %v7474_v9 = vpop.f32.mrb[5].mxu0  ;;  %3934 = vmatmul.mubr.bf16.gmra.mrb[104].mxu0 %v4968_v48  ;;  %v3077_v22 = vor.u32 %v3076_v40, %v3072_v12  ;;  %v753_v59 = vsel %vm6290_vm4, %v4609_v19, %v752_v26  ;;  %v754_v55 = vrot.slane %v752_v26, 4  ;;  %v3104_v62 = vshll.u32 %v7539_v14, 16 }
 0x114   : > { %v5113_v11 = vpop.f32.mrb[6].mxu0  ;;  %v7534_v20 = vadd.f32 %v7474_v9, %v7470_v33  ;;  %5585 = vmatmul.mubr.bf16.gmra.mrb[8].mxu1 %v4655_v17  ;;  %v3068_v5 = vrot.slane %v3067_v21, 4  ;;  %v3088_v33 = vshll.u32 %v7523_v30, 16  ;;  %v3094_v9 = vshll.u32 %v7526_v34, 16 }
 0x115   : > { %v5114_v28 = vpop.f32.mrb[7].mxu0  ;;  %5588 = vmatprep.mubr.bf16.mxu1 %v4656_v38  ;;  %v3078_v43 = vrot.slane %v3077_v22, 4  ;;  %v756_v48 = vsel %vm6290_vm4, %v754_v55, %v755_v29  ;;  %v3087_v17 = vrot.slane %v3085_v42, 4  ;;  %v4931_v38 = vld [vmem:[%s6251_s27 + $0x24] sm:$0xe]  ;;  %v3106_v26 = vrot.slane %v3104_v62, 5 }
 0x116   : > { %v7536_v27 = vadd.f32 %v5114_v28, %v5113_v11  ;;  %v3098_v11 = vshrl.u32 %v7526_v34, 16  ;;  %v4930_v28 = vld [vmem:[%s6251_s27 + $0x18] sm:$0xe]  ;;  %v3073_v10 = vsel %vm6306_vm5, %v3068_v5, %v3072_v12  ;;  %v4657_v50 = vcombine.low %v753_v59, %v756_v48  ;;  %v7576_v62 = vld [vmem:[%s6251_s27 + $0x8c] sm:$0x1] }
 0x117   : > { %v3090_v19 = vrot.slane %v3088_v33, 5  ;;  %v3096_v13 = vrot.slane %v3094_v9, 5  ;;  %v3083_v16 = vsel %vm6306_vm5, %v3078_v43, %v3082_v32  ;;  %v4946_v21 = vrot.slane %v4930_v28, 9  ;;  %v7562_v33 = vld [vmem:[%s6251_s27 + $0x84] sm:$0xf] }
 0x118   : > { %v3100_v40 = vrot.slane %v3098_v11, 4  ;;  %v4985_v22 = vcombine.low %v3073_v10, %v3083_v16  ;;  %v3342_v55 = vrot.slane %v7201_v56, 5  ;;  %v3345_v42 = vrot.slane %v7214_v1, 5  ;;  %v7569_v1 = vld [vmem:[%s6251_s27 + $0x88] sm:$0xf] }
 0x119   : > { %v3091_v29 = vor.u32 %v3090_v19, %v3087_v17  ;;  %v4970_v12 = vcombine.low %v7523_v30, %v7526_v34  ;;  %v4947_v59 = vrot.slane %v4931_v38, 9  ;;  %v3349_v5 = vrot.slane %v7249_v18, 5 }
 0x11a   : > { %v5116_v6 = vpop.f32.mrb[8].mxu0  ;;  %v3101_v36 = vor.u32 %v3100_v40, %v3096_v13  ;;  %3941 = vmatprep.mubr.bf16.mxu0 %v4985_v22  ;;  %v3343_v11 = vsel %vm6290_vm4, %v4946_v21, %v3342_v55  ;;  %v3344_v28 = vrot.slane %v3342_v55, 4  ;;  %v8757_v38 = vrot.slane %v7253_v25, 5  ;;  %v4933_v55 = vld [vmem:[%s6251_s27 + $0x3c] sm:$0xe] }
 0x11b   : > { %v5117_v23 = vpop.f32.mrb[9].mxu0  ;;  %v3092_v9 = vrot.slane %v3091_v29, 4  ;;  %3942 = vmatmul.mubr.bf16.gmra.mrb[108].mxu0 %v4969_v0  ;;  %v3350_v18 = vsel %vm6290_vm4, %v4947_v59, %v3349_v5  ;;  %v3351_v48 = vrot.slane %v3349_v5, 4  ;;  %v4932_v0 = vld [vmem:[%s6251_s27 + $0x30] sm:$0xe]  ;;  %v3122_v59 = vshrl.u32 %v7569_v1, 16 }
 0x11c   : > { %v5119_v31 = vpop.f32.mrb[10].mxu0  ;;  %v7566_v56 = vadd.f32 %v5117_v23, %v5116_v6  ;;  %5589 = vmatmul.mubr.bf16.gmra.mrb[12].mxu1 %v4657_v50  ;;  %v3102_v30 = vrot.slane %v3101_v36, 4  ;;  %v3346_v23 = vsel %vm6290_vm4, %v3344_v28, %v3345_v42  ;;  %v3109_v50 = vshrl.u32 %v7562_v33, 16 }
 0x11d   : > { %v5120_v49 = vpop.f32.mrb[11].mxu0  ;;  %v3097_v6 = vsel %vm6306_vm5, %v3092_v9, %v3096_v13  ;;  %v3112_v36 = vshll.u32 %v7562_v33, 16  ;;  %v3353_v16 = vsel %vm6290_vm4, %v3351_v48, %v8757_v38  ;;  %v3118_v13 = vshll.u32 %v7569_v1, 16 }
 0x11e   : > { %v7573_v17 = vadd.f32 %v5120_v49, %v5119_v31  ;;  %v3107_v31 = vsel %vm6306_vm5, %v3102_v30, %v3106_v26  ;;  %v4994_v49 = vcombine.low %v3343_v11, %v3346_v23  ;;  %v4995_v21 = vcombine.low %v3350_v18, %v3353_v16  ;;  %v7601_v23 = vld [vmem:[%s6251_s27 + $0x90] sm:$0xf] }
 0x11f   : > { %v4986_v40 = vcombine.low %v3097_v6, %v3107_v31  ;;  %v3111_v22 = vrot.slane %v3109_v50, 4  ;;  %v3114_v29 = vrot.slane %v3112_v36, 5  ;;  %v3120_v42 = vrot.slane %v3118_v13, 5 }
 0x120   : > { %5608 = vmatprep.mubr.bf16.mxu1 %v4994_v49  ;;  %v3128_v26 = vshll.u32 %v7576_v62, 16  ;;  %v4948_v5 = vrot.slane %v4932_v0, 9  ;;  %v3356_v9 = vrot.slane %v7287_v46, 5  ;;  %v3359_v11 = vrot.slane %v7300_v35, 5 }
 0x121   : > { %3949 = vmatprep.mubr.bf16.mxu0 %v4986_v40  ;;  %v3115_v25 = vor.u32 %v3114_v29, %v3111_v22  ;;  %v4971_v28 = vcombine.low %v7562_v33, %v7569_v1  ;;  %v3124_v30 = vrot.slane %v3122_v59, 4  ;;  %v4949_v48 = vrot.slane %v4933_v55, 9 }
 0x122   : > { %v3130_v18 = vrot.slane %v3128_v26, 5  ;;  %v3363_v6 = vrot.slane %v7326_v24, 5  ;;  %v3357_v36 = vsel %vm6290_vm4, %v4948_v5, %v3356_v9  ;;  %v3358_v46 = vrot.slane %v3356_v9, 4  ;;  %v7611_v24 = vld [vmem:[%s6251_s27 + $0x94] sm:$0xf] }
 0x123   : > { %v5122_v32 = vpop.f32.mrb[12].mxu0  ;;  %v3116_v50 = vrot.slane %v3115_v25, 4  ;;  %v3366_v35 = vrot.slane %v7339_v37, 5  ;;  %3950 = vmatmul.mubr.bf16.gmra.mrb[112].mxu0 %v4970_v12  ;;  %v3125_v33 = vor.u32 %v3124_v30, %v3120_v42  ;;  %v7620_v37 = vld [vmem:[%s6251_s27 + $0x98] sm:$0x1]  ;;  %v3133_v12 = vshrl.u32 %v7601_v23, 16 }
 0x124   : > { %v5123_v43 = vpop.f32.mrb[13].mxu0  ;;  %5609 = vmatmul.mubr.bf16.vlgmr.msra.gmra.mrb[80].mxu1 %v4995_v21  ;;  %v3364_v0 = vsel %vm6290_vm4, %v4949_v48, %v3363_v6  ;;  %v3365_v31 = vrot.slane %v3363_v6, 4  ;;  %v3360_v13 = vsel %vm6290_vm4, %v3358_v46, %v3359_v11  ;;  %v4934_v21 = vld [vmem:[%s6251_s27 + $0x48] sm:$0xe]  ;;  %v3136_v55 = vshll.u32 %v7601_v23, 16 }
 0x125   : > { %v5125_v10 = vpop.f32.mrb[14].mxu0  ;;  %v7608_v49 = vadd.f32 %v5123_v43, %v5122_v32  ;;  %v3121_v16 = vsel %vm6306_vm5, %v3116_v50, %v3120_v42  ;;  %v3126_v32 = vrot.slane %v3125_v33, 4  ;;  %v4996_v43 = vcombine.low %v3357_v36, %v3360_v13  ;;  %v4935_v48 = vld [vmem:[%s6251_s27 + $0x54] sm:$0xe] }
 0x126   : > { %v5126_v19 = vpop.f32.mrb[15].mxu0  ;;  %v3367_v29 = vsel %vm6290_vm4, %v3365_v31, %v3366_v35  ;;  %v3135_v26 = vrot.slane %v3133_v12, 4  ;;  %v3138_v9 = vrot.slane %v3136_v55, 5  ;;  %v3152_v11 = vshll.u32 %v7620_v37, 16 }
 0x127   : > { %v7617_v40 = vadd.f32 %v5126_v19, %v5125_v10  ;;  %v4997_v59 = vcombine.low %v3364_v0, %v3367_v29  ;;  %v3142_v10 = vshll.u32 %v7611_v24, 16  ;;  %v3146_v19 = vshrl.u32 %v7611_v24, 16  ;;  %5612 = vmatprep.mubr.bf16.mxu1 %v4996_v43 }
 0x128   : > { %v3131_v25 = vsel %vm6306_vm5, %v3126_v32, %v3130_v18  ;;  %v4950_v30 = vrot.slane %v4934_v21, 9  ;;  %v3370_v35 = vrot.slane %v7366_v54, 5  ;;  %v3139_v0 = vor.u32 %v3138_v9, %v3135_v26 }
 0x129   : > { %v4987_v50 = vcombine.low %v3121_v16, %v3131_v25  ;;  %v3144_v36 = vrot.slane %v3142_v10, 5  ;;  %v3148_v46 = vrot.slane %v3146_v19, 4  ;;  %v3154_v31 = vrot.slane %v3152_v11, 5  ;;  %v7660_v11 = vld [vmem:[%s6251_s27 + $0xa4] sm:$0x1] }
 0x12a   : > { %v5240_v6 = vpop.f32.mrb[16].mxu1  ;;  %v3373_v13 = vrot.slane %v7381_v15, 5  ;;  %v4972_v18 = vcombine.low %v7601_v23, %v7611_v24  ;;  %v3371_v16 = vsel %vm6290_vm4, %v4950_v30, %v3370_v35  ;;  %v3372_v21 = vrot.slane %v3370_v35, 4  ;;  %v7644_v23 = vld [vmem:[%s6251_s27 + $0x9c] sm:$0xf] }
 0x12b   : > { %v5128_v38 = vpop.f32.mrb[16].mxu0  ;;  %v5241_v33 = vpop.f32.mrb[17].mxu1  ;;  %3957 = vmatprep.mubr.bf16.mxu0 %v4987_v50  ;;  %v3149_v32 = vor.u32 %v3148_v46, %v3144_v36  ;;  %v4951_v43 = vrot.slane %v4935_v48, 9  ;;  %v3140_v54 = vrot.slane %v3139_v0, 4  ;;  %v3377_v55 = vrot.slane %v7410_v41, 5 }
 0x12c   : > { %v5129_v22 = vpop.f32.mrb[17].mxu0  ;;  %v5243_v12 = vpop.f32.mrb[18].mxu1  ;;  %3958 = vmatmul.mubr.bf16.gmra.mrb[116].mxu0 %v4971_v28  ;;  %5613 = vmatmul.mubr.bf16.gmra.mrb[84].mxu1 %v4997_v59  ;;  %v3380_v15 = vrot.slane %v7423_v61, 5  ;;  %v3374_v19 = vsel %vm6290_vm4, %v3372_v21, %v3373_v13  ;;  %v7648_v25 = vadd.f32 %v5241_v33, %v5240_v6  ;;  %v7653_v28 = vld [vmem:[%s6251_s27 + $0xa0] sm:$0xf]  ;;  %v3160_v6 = vshll.u32 %v7644_v23, 16 }
 0x12d   : > { %v5131_v42 = vpop.f32.mrb[18].mxu0  ;;  %v5244_v29 = vpop.f32.mrb[19].mxu1  ;;  %v7641_v26 = vadd.f32 %v5129_v22, %v5128_v38  ;;  %v3150_v10 = vrot.slane %v3149_v32, 4  ;;  %v3145_v41 = vsel %vm6306_vm5, %v3140_v54, %v3144_v36  ;;  %v4998_v61 = vcombine.low %v3371_v16, %v3374_v19  ;;  %v4936_v50 = vld [vmem:[%s6251_s27 + $0x60] sm:$0xe] }
 0x12e   : > { %v5132_v5 = vpop.f32.mrb[19].mxu0  ;;  %v3378_v38 = vsel %vm6290_vm4, %v4951_v43, %v3377_v55  ;;  %v3379_v22 = vrot.slane %v3377_v55, 4  ;;  %v3166_v33 = vshll.u32 %v7653_v28, 16  ;;  %v3170_v0 = vshrl.u32 %v7653_v28, 16  ;;  %v4937_v21 = vld [vmem:[%s6251_s27 + $0x6c] sm:$0xe] }
 0x12f   : > { %v7650_v9 = vadd.f32 %v5132_v5, %v5131_v42  ;;  %v3155_v48 = vsel %vm6306_vm5, %v3150_v10, %v3154_v31  ;;  %v7664_v42 = vadd.f32 %v5244_v29, %v5243_v12  ;;  %v3157_v5 = vshrl.u32 %v7644_v23, 16  ;;  %5616 = vmatprep.mubr.bf16.mxu1 %v4998_v61 }
 0x130   : > { %v4988_v46 = vcombine.low %v3145_v41, %v3155_v48  ;;  %v3381_v35 = vsel %vm6290_vm4, %v3379_v22, %v3380_v15  ;;  %v3162_v12 = vrot.slane %v3160_v6, 5  ;;  %v3176_v16 = vshll.u32 %v7660_v11, 16 }
 0x131   : > { %v4999_v31 = vcombine.low %v3378_v38, %v3381_v35  ;;  %v3159_v32 = vrot.slane %v3157_v5, 4  ;;  %v3168_v43 = vrot.slane %v3166_v33, 5  ;;  %v3172_v29 = vrot.slane %v3170_v0, 4  ;;  %v7686_v33 = vld [vmem:[%s6251_s27 + $0xa8] sm:$0xf] }
 0x132   : > { %3965 = vmatprep.mubr.bf16.mxu0 %v4988_v46  ;;  %v4952_v54 = vrot.slane %v4936_v50, 9  ;;  %v3384_v55 = vrot.slane %v7451_v2, 5  ;;  %v3178_v15 = vrot.slane %v3176_v16, 5  ;;  %v3387_v41 = vrot.slane %v7461_v4, 5  ;;  %v7702_v16 = vld [vmem:[%s6251_s27 + $0xb0] sm:$0x1] }
 0x133   : > { %v5134_v59 = vpop.f32.mrb[20].mxu0  ;;  %v3163_v19 = vor.u32 %v3162_v12, %v3159_v32  ;;  %v4973_v61 = vcombine.low %v7644_v23, %v7653_v28  ;;  %v3173_v22 = vor.u32 %v3172_v29, %v3168_v43  ;;  %v4953_v6 = vrot.slane %v4937_v21, 9  ;;  %v7695_v12 = vld [vmem:[%s6251_s27 + $0xac] sm:$0xf] }
 0x134   : > { %v5135_v30 = vpop.f32.mrb[21].mxu0  ;;  %3966 = vmatmul.mubr.bf16.gmra.mrb[120].mxu0 %v4972_v18  ;;  %5617 = vmatmul.mubr.bf16.gmra.mrb[88].mxu1 %v4999_v31  ;;  %v3385_v48 = vsel %vm6290_vm4, %v4952_v54, %v3384_v55  ;;  %v3386_v5 = vrot.slane %v3384_v55, 4  ;;  %v3391_v46 = vrot.slane %v7500_v7, 5  ;;  %v3394_v4 = vrot.slane %v7508_v8, 5  ;;  %v4938_v55 = vld [vmem:[%s6251_s27 + $0x78] sm:$0xe] }
 0x135   : > { %v5137_v36 = vpop.f32.mrb[22].mxu0  ;;  %v5246_v10 = vpop.f32.mrb[20].mxu1  ;;  %v3164_v50 = vrot.slane %v3163_v19, 4  ;;  %v7683_v35 = vadd.f32 %v5135_v30, %v5134_v59  ;;  %v3174_v18 = vrot.slane %v3173_v22, 4 }
 0x136   : > { %v5138_v13 = vpop.f32.mrb[23].mxu0  ;;  %v5247_v38 = vpop.f32.mrb[21].mxu1  ;;  %v3388_v0 = vsel %vm6290_vm4, %v3386_v5, %v3387_v41  ;;  %v3392_v59 = vsel %vm6290_vm4, %v4953_v6, %v3391_v46  ;;  %v3393_v30 = vrot.slane %v3391_v46, 4  ;;  %v3190_v41 = vshll.u32 %v7695_v12, 16 }
 0x137   : > { %v5249_v2 = vpop.f32.mrb[22].mxu1  ;;  %v7690_v31 = vadd.f32 %v5247_v38, %v5246_v10  ;;  %v7692_v32 = vadd.f32 %v5138_v13, %v5137_v36  ;;  %v3169_v7 = vsel %vm6306_vm5, %v3164_v50, %v3168_v43  ;;  %v5000_v8 = vcombine.low %v3385_v48, %v3388_v0 }
 0x138   : > { %v5250_v23 = vpop.f32.mrb[23].mxu1  ;;  %v3179_v29 = vsel %vm6306_vm5, %v3174_v18, %v3178_v15  ;;  %v3181_v36 = vshrl.u32 %v7686_v33, 16  ;;  %v3184_v13 = vshll.u32 %v7686_v33, 16  ;;  %v3395_v19 = vsel %vm6290_vm4, %v3393_v30, %v3394_v4 }
 0x139   : > { %v7706_v54 = vadd.f32 %v5250_v23, %v5249_v2  ;;  %v4989_v10 = vcombine.low %v3169_v7, %v3179_v29  ;;  %5620 = vmatprep.mubr.bf16.mxu1 %v5000_v8  ;;  %v3194_v38 = vshrl.u32 %v7695_v12, 16  ;;  %v5001_v15 = vcombine.low %v3392_v59, %v3395_v19  ;;  %v4939_v2 = vld [vmem:[%s6251_s27 + $0x84] sm:$0xe] }
 0x13a   : > { %v3183_v48 = vrot.slane %v3181_v36, 4  ;;  %v3186_v5 = vrot.slane %v3184_v13, 5  ;;  %v3200_v6 = vshll.u32 %v7702_v16, 16  ;;  %v3192_v46 = vrot.slane %v3190_v41, 5 }
 0x13b   : > { %v5140_v21 = vpop.f32.mrb[24].mxu0  ;;  %3973 = vmatprep.mubr.bf16.mxu0 %v4989_v10  ;;  %v3196_v23 = vrot.slane %v3194_v38, 4  ;;  %v4954_v18 = vrot.slane %v4938_v55, 9  ;;  %v3398_v0 = vrot.slane %v7526_v34, 5  ;;  %v3401_v8 = vrot.slane %v7539_v14, 5 }
 0x13c   : > { %v5141_v43 = vpop.f32.mrb[25].mxu0  ;;  %3974 = vmatmul.mubr.bf16.gmra.mrb[124].mxu0 %v4973_v61  ;;  %5621 = vmatmul.mubr.bf16.gmra.mrb[92].mxu1 %v5001_v15  ;;  %v3187_v4 = vor.u32 %v3186_v5, %v3183_v48  ;;  %v3202_v7 = vrot.slane %v3200_v6, 5  ;;  %v4974_v59 = vcombine.low %v7686_v33, %v7695_v12  ;;  %v4955_v55 = vrot.slane %v4939_v2, 9  ;;  %v7728_v38 = vld [vmem:[%s6251_s27 + $0xb4] sm:$0xf] }
 0x13d   : > { %v5143_v22 = vpop.f32.mrb[26].mxu0  ;;  %v5252_v30 = vpop.f32.mrb[24].mxu1  ;;  %v3197_v29 = vor.u32 %v3196_v23, %v3192_v46  ;;  %v3399_v36 = vsel %vm6290_vm4, %v4954_v18, %v3398_v0  ;;  %v3400_v13 = vrot.slane %v3398_v0, 4  ;;  %v3405_v61 = vrot.slane %v7569_v1, 5  ;;  %v7737_v2 = vld [vmem:[%s6251_s27 + $0xb8] sm:$0xf] }
 0x13e   : > { %v5144_v50 = vpop.f32.mrb[27].mxu0  ;;  %v5253_v10 = vpop.f32.mrb[25].mxu1  ;;  %v3188_v34 = vrot.slane %v3187_v4, 4  ;;  %v3408_v19 = vrot.slane %v7576_v62, 5  ;;  %v7725_v41 = vadd.f32 %v5141_v43, %v5140_v21  ;;  %v7744_v23 = vld [vmem:[%s6251_s27 + $0xbc] sm:$0x1] }
 0x13f   : > { %v5255_v14 = vpop.f32.mrb[26].mxu1  ;;  %v3198_v33 = vrot.slane %v3197_v29, 4  ;;  %v3402_v15 = vsel %vm6290_vm4, %v3400_v13, %v3401_v8  ;;  %v7732_v48 = vadd.f32 %v5253_v10, %v5252_v30  ;;  %v7734_v5 = vadd.f32 %v5144_v50, %v5143_v22  ;;  %v4940_v4 = vld [vmem:[%s6251_s27 + $0x90] sm:$0xe] }
 0x140   : > { %v5256_v6 = vpop.f32.mrb[27].mxu1  ;;  %v3193_v1 = vsel %vm6306_vm5, %v3188_v34, %v3192_v46  ;;  %v5002_v62 = vcombine.low %v3399_v36, %v3402_v15  ;;  %v3406_v21 = vsel %vm6290_vm4, %v4955_v55, %v3405_v61  ;;  %v3407_v43 = vrot.slane %v3405_v61, 4  ;;  %v4941_v34 = vld [vmem:[%s6251_s27 + $0x9c] sm:$0xe] }
 0x141   : > { %v3203_v18 = vsel %vm6306_vm5, %v3198_v33, %v3202_v7  ;;  %v7748_v0 = vadd.f32 %v5256_v6, %v5255_v14  ;;  %v3205_v22 = vshrl.u32 %v7728_v38, 16  ;;  %v3208_v50 = vshll.u32 %v7728_v38, 16 }
 0x142   : > { %v4990_v8 = vcombine.low %v3193_v1, %v3203_v18  ;;  %5624 = vmatprep.mubr.bf16.mxu1 %v5002_v62  ;;  %v3409_v46 = vsel %vm6290_vm4, %v3407_v43, %v3408_v19  ;;  %v3214_v30 = vshll.u32 %v7737_v2, 16  ;;  %v3218_v29 = vshrl.u32 %v7737_v2, 16 }
 0x143   : > { %v5003_v13 = vcombine.low %v3406_v21, %v3409_v46  ;;  %v3207_v55 = vrot.slane %v3205_v22, 4  ;;  %v3210_v7 = vrot.slane %v3208_v50, 5  ;;  %v3224_v10 = vshll.u32 %v7744_v23, 16 }
 0x144   : > { %v5146_v36 = vpop.f32.mrb[28].mxu0  ;;  %3981 = vmatprep.mubr.bf16.mxu0 %v4990_v8  ;;  %v3216_v14 = vrot.slane %v3214_v30, 5  ;;  %v3220_v33 = vrot.slane %v3218_v29, 4  ;;  %v4956_v15 = vrot.slane %v4940_v4, 9  ;;  %v3412_v6 = vrot.slane %v7611_v24, 5 }
 0x145   : > { %v5147_v61 = vpop.f32.mrb[29].mxu0  ;;  %3982 = vmatmul.mubr.bf16.gmra.mrb[128].mxu0 %v4974_v59  ;;  %5625 = vmatmul.mubr.bf16.gmra.mrb[0].mxu1 %v5003_v13  ;;  %v3211_v62 = vor.u32 %v3210_v7, %v3207_v55  ;;  %v3226_v43 = vrot.slane %v3224_v10, 5  ;;  %v3415_v21 = vrot.slane %v7620_v37, 5  ;;  %v4975_v18 = vcombine.low %v7728_v38, %v7737_v2  ;;  %v7770_v38 = vld [vmem:[%s6251_s27 + $0xc0] sm:$0xf] }
 0x146   : > { %v5258_v1 = vpop.f32.mrb[28].mxu1  ;;  %v5149_v19 = vpop.f32.mrb[30].mxu0  ;;  %v3221_v8 = vor.u32 %v3220_v33, %v3216_v14  ;;  %v3413_v4 = vsel %vm6290_vm4, %v4956_v15, %v3412_v6  ;;  %v3414_v24 = vrot.slane %v3412_v6, 4  ;;  %v4957_v46 = vrot.slane %v4941_v34, 9  ;;  %v7779_v15 = vld [vmem:[%s6251_s27 + $0xc4] sm:$0xf] }
 0x147   : > { %v5259_v22 = vpop.f32.mrb[29].mxu1  ;;  %v5150_v50 = vpop.f32.mrb[31].mxu0  ;;  %v3212_v59 = vrot.slane %v3211_v62, 4  ;;  %v3419_v29 = vrot.slane %v7653_v28, 5  ;;  %v3422_v13 = vrot.slane %v7660_v11, 5  ;;  %v7767_v37 = vadd.f32 %v5147_v61, %v5146_v36 }
 0x148   : > { %v5261_v30 = vpop.f32.mrb[30].mxu1  ;;  %v3222_v7 = vrot.slane %v3221_v8, 4  ;;  %v3416_v10 = vsel %vm6290_vm4, %v3414_v24, %v3415_v21  ;;  %v7774_v33 = vadd.f32 %v5259_v22, %v5258_v1  ;;  %v7776_v34 = vadd.f32 %v5150_v50, %v5149_v19  ;;  %v7786_v6 = vld [vmem:[%s6251_s27 + $0xc8] sm:$0x1]  ;;  %v4942_v22 = vld [vmem:[%s6251_s27 + $0xa8] sm:$0xe] }
 0x149   : > { %v5262_v55 = vpop.f32.mrb[31].mxu1  ;;  %v3217_v28 = vsel %vm6306_vm5, %v3212_v59, %v3216_v14  ;;  %v5004_v11 = vcombine.low %v3413_v4, %v3416_v10  ;;  %v3420_v36 = vsel %vm6290_vm4, %v4957_v46, %v3419_v29  ;;  %v3421_v61 = vrot.slane %v3419_v29, 4 }
 0x14a   : > { %v3227_v62 = vsel %vm6306_vm5, %v3222_v7, %v3226_v43  ;;  %v7790_v1 = vadd.f32 %v5262_v55, %v5261_v30  ;;  %v3229_v19 = vshrl.u32 %v7770_v38, 16  ;;  %v3232_v21 = vshll.u32 %v7770_v38, 16  ;;  %v4943_v55 = vld [vmem:[%s6251_s27 + $0xb4] sm:$0xe] }
 0x14b   : > { %v4991_v14 = vcombine.low %v3217_v28, %v3227_v62  ;;  %5628 = vmatprep.mubr.bf16.mxu1 %v5004_v11  ;;  %v3423_v8 = vsel %vm6290_vm4, %v3421_v61, %v3422_v13  ;;  %v3238_v4 = vshll.u32 %v7779_v15, 16  ;;  %v3242_v24 = vshrl.u32 %v7779_v15, 16 }
 0x14c   : > { %v5152_v50 = vpop.f32.mrb[32].mxu0  ;;  %v5005_v43 = vcombine.low %v3420_v36, %v3423_v8  ;;  %v3231_v59 = vrot.slane %v3229_v19, 4  ;;  %v3234_v30 = vrot.slane %v3232_v21, 5  ;;  %v3248_v29 = vshll.u32 %v7786_v6, 16 }
 0x14d   : > { %v5153_v46 = vpop.f32.mrb[33].mxu0  ;;  %3989 = vmatprep.mubr.bf16.mxu0 %v4991_v14  ;;  %v3240_v10 = vrot.slane %v3238_v4, 5  ;;  %v3244_v45 = vrot.slane %v3242_v24, 4  ;;  %v4958_v28 = vrot.slane %v4942_v22, 9  ;;  %v3426_v11 = vrot.slane %v7695_v12, 5 }
 0x14e   : > { %v5155_v7 = vpop.f32.mrb[34].mxu0  ;;  %3990 = vmatmul.mubr.bf16.gmra.mrb[132].mxu0 %v4975_v18  ;;  %5629 = vmatmul.mubr.bf16.gmra.mrb[4].mxu1 %v5005_v43  ;;  %v3235_v13 = vor.u32 %v3234_v30, %v3231_v59  ;;  %v3250_v61 = vrot.slane %v3248_v29, 5  ;;  %v3429_v36 = vrot.slane %v7702_v16, 5  ;;  %v4976_v19 = vcombine.low %v7770_v38, %v7779_v15  ;;  %v7812_v30 = vld [vmem:[%s6251_s27 + $0xcc] sm:$0xf] }
 0x14f   : > { %v5156_v62 = vpop.f32.mrb[35].mxu0  ;;  %v5264_v21 = vpop.f32.mrb[32].mxu1  ;;  %v3245_v8 = vor.u32 %v3244_v45, %v3240_v10  ;;  %v3427_v14 = vsel %vm6290_vm4, %v4958_v28, %v3426_v11  ;;  %v3428_v22 = vrot.slane %v3426_v11, 4  ;;  %v4959_v4 = vrot.slane %v4943_v55, 9  ;;  %v7821_v11 = vld [vmem:[%s6251_s27 + $0xd0] sm:$0xf] }
 0x150   : > { %v5265_v12 = vpop.f32.mrb[33].mxu1  ;;  %v3236_v24 = vrot.slane %v3235_v13, 4  ;;  %v3433_v18 = vrot.slane %v7737_v2, 5  ;;  %v3436_v43 = vrot.slane %v7744_v23, 5  ;;  %v7809_v59 = vadd.f32 %v5153_v46, %v5152_v50  ;;  %v4929_v13 = vld [vmem:[%s6251_s27 + $0xd4] sm:$0x1] }
 0x151   : > { %v5267_v16 = vpop.f32.mrb[34].mxu1  ;;  %v3246_v38 = vrot.slane %v3245_v8, 4  ;;  %v3430_v45 = vsel %vm6290_vm4, %v3428_v22, %v3429_v36  ;;  %v7816_v29 = vadd.f32 %v5265_v12, %v5264_v21  ;;  %v7818_v55 = vadd.f32 %v5156_v62, %v5155_v7  ;;  %v4944_v22 = vld [vmem:[%s6251_s27 + $0xc0] sm:$0xe] }
 0x152   : > { %v5268_v28 = vpop.f32.mrb[35].mxu1  ;;  %v3241_v2 = vsel %vm6306_vm5, %v3236_v24, %v3240_v10  ;;  %v5006_v23 = vcombine.low %v3427_v14, %v3430_v45  ;;  %v3434_v50 = vsel %vm6290_vm4, %v4959_v4, %v3433_v18  ;;  %v3435_v46 = vrot.slane %v3433_v18, 4 }
 0x153   : > { %v3251_v36 = vsel %vm6306_vm5, %v3246_v38, %v3250_v61  ;;  %v7830_v21 = vadd.f32 %v5268_v28, %v5267_v16  ;;  %v3253_v7 = vshrl.u32 %v7812_v30, 16  ;;  %v3256_v62 = vshll.u32 %v7812_v30, 16  ;;  %v4945_v28 = vld [vmem:[%s6251_s27 + $0xcc] sm:$0xe]  ;;  %s134_s27 = sand.u32 1, %s6085_s10  }
 0x154   : > { %v5158_v8 = vpop.f32.mrb[36].mxu0  ;;  %v4992_v10 = vcombine.low %v3241_v2, %v3251_v36  ;;  %5632 = vmatprep.mubr.bf16.mxu1 %v5006_v23  ;;  %v3437_v14 = vsel %vm6290_vm4, %v3435_v46, %v3436_v43  ;;  %v3262_v4 = vshll.u32 %v7821_v11, 16  ;;  %v3266_v24 = vshrl.u32 %v7821_v11, 16  ;;  %s4592_s25 = sshll.u32 %s134_s27, 8  ;;  %s8609_s4 = scalar_lea.sflag [#allocation3], %s134_s27 }
 0x155   : > { %v5159_v12 = vpop.f32.mrb[37].mxu0  ;;  %v5007_v61 = vcombine.low %v3434_v50, %v3437_v14  ;;  %v3255_v38 = vrot.slane %v3253_v7, 4  ;;  %v3258_v16 = vrot.slane %v3256_v62, 5  ;;  %v3272_v45 = vshll.u32 %v4929_v13, 16  ;;  %s8421_s26 = scalar_lea.vmem [#allocation2], %s4592_s25 }
 0x156   : > { %v5161_v18 = vpop.f32.mrb[38].mxu0  ;;  %3997 = vmatprep.mubr.bf16.mxu0 %v4992_v10  ;;  %v3264_v52 = vrot.slane %v3262_v4, 5  ;;  %v3268_v51 = vrot.slane %v3266_v24, 4  ;;  %v4960_v58 = vrot.slane %v4944_v22, 9  ;;  %v3440_v2 = vrot.slane %v7779_v15, 5  ;;  %s4526_s29 = sshll.u32 %s8421_s26, 4  ;;  %s8585_s29 = int_to_ptr.vmem [resolvable:$true] %s4526_s29 }
 0x157   : > { %v5162_v44 = vpop.f32.mrb[39].mxu0  ;;  %v5270_v23 = vpop.f32.mrb[36].mxu1  ;;  %3998 = vmatmul.mubr.bf16.gmra.mrb[136].mxu0 %v4976_v19  ;;  %5633 = vmatmul.mubr.bf16.gmra.mrb[8].mxu1 %v5007_v61  ;;  %v3259_v43 = vor.u32 %v3258_v16, %v3255_v38  ;;  %v3274_v46 = vrot.slane %v3272_v45, 5  ;;  %v3443_v36 = vrot.slane %v7786_v6, 5  ;;  %v4961_v14 = vrot.slane %v4945_v28, 9  ;;  %s6031_s5 = scalar_lea.vmem %s8585_s29, 4096  ;;  %p6038_p0 = scmp.lt.s32.totalorder %s8585_s29, %s6036_s7 }
 0x158   : > { %v5271_v57 = vpop.f32.mrb[37].mxu1  ;;  %v3269_v50 = vor.u32 %v3268_v51, %v3264_v52  ;;  %v3441_v7 = vsel %vm6290_vm4, %v4960_v58, %v3440_v2  ;;  %v3442_v62 = vrot.slane %v3440_v2, 4  ;;  %v3447_v22 = vrot.slane %v7821_v11, 5  ;;  %p6032_p11 = scmp.ne.s32.totalorder %s8585_s29, %s6031_s5  ;;  %p6039_p1 = scmp.lt.s32.totalorder %s6037_s8, %s6031_s5 }
 0x159   : > { %v5273_v10 = vpop.f32.mrb[38].mxu1  ;;  %v3260_v4 = vrot.slane %v3259_v43, 4  ;;  %v3450_v24 = vrot.slane %v4929_v13, 5  ;;  %v7845_v15 = vadd.f32 %v5159_v12, %v5158_v8  ;;  %v7849_v6 = vadd.f32 %v5271_v57, %v5270_v23 }
 0x15a   : > { %v5274_v19 = vpop.f32.mrb[39].mxu1  ;;  %v3270_v61 = vrot.slane %v3269_v50, 4  ;;  %v3444_v38 = vsel %vm6290_vm4, %v3442_v62, %v3443_v36  ;;  %v7851_v51 = vadd.f32 %v5162_v44, %v5161_v18  ;;  %v3448_v45 = vsel %vm6290_vm4, %v4961_v14, %v3447_v22  ;;  %p6033_p12 = pnand %p6032_p11, %p6151_p5  ;;  %p6040_p2 = por %p6039_p1, %p6038_p0 }
 0x15b   : > { %v3265_v58 = vsel %vm6306_vm5, %v3260_v4, %v3264_v52  ;;  %v5008_v16 = vcombine.low %v3441_v7, %v3444_v38  ;;  %v3449_v28 = vrot.slane %v3447_v22, 4  ;;  %v4977_v8 = vcombine.low %v7812_v30, %v7821_v11 }
 0x15c   : > { %v3275_v13 = vsel %vm6306_vm5, %v3270_v61, %v3274_v46  ;;  %v7861_v12 = vadd.f32 %v5274_v19, %v5273_v10  ;;  %v5164_v57 = vpop.f32.mrb[40].mxu0  ;;  %p6034_p13 = pneg %p6033_p12 }
 0x15d   : > { %v4993_v2 = vcombine.low %v3265_v58, %v3275_v13  ;;  %5636 = vmatprep.mubr.bf16.mxu1 %v5008_v16  ;;  %v3451_v44 = vsel %vm6290_vm4, %v3449_v28, %v3450_v24  ;;  %v5165_v52 = vpop.f32.mrb[41].mxu0 }
 0x15e   : > { %v5009_v18 = vcombine.low %v3448_v45, %v3451_v44  ;;  %v7865_v23 = vadd.f32 %v5165_v52, %v5164_v57  ;;  %v5167_v43 = vpop.f32.mrb[42].mxu0  ;;  %p6041_p3 = pnand %p6040_p2, %p6034_p13 }
 0x15f   : > { %4005 = vmatprep.mubr.bf16.mxu0 %v4993_v2  ;;  %v5168_v36 = vpop.f32.mrb[43].mxu0 }
 0x160   : > { %4006 = vmatmul.mubr.bf16.gmra.mrb[140].mxu0 %v4977_v8  ;;  %5637 = vmatmul.mubr.bf16.gmra.mrb[12].mxu1 %v5009_v18  ;;  %v5169_v46 = vadd.f32 %v5168_v36, %v5167_v43 }
 0x161   : > { %v5276_v47 = vpop.f32.mrb[40].mxu1 }
 0x162   : > { %v5277_v30 = vpop.f32.mrb[41].mxu1 }
 0x163   : > { %v7867_v11 = vadd.f32 %v5277_v30, %v5276_v47  ;;  %v5279_v50 = vpop.f32.mrb[42].mxu1 }
 0x164   : > { %v5280_v7 = vpop.f32.mrb[43].mxu1 }
 0x165   : > { %v7869_v62 = vadd.f32 %v5280_v7, %v5279_v50 }
 0x166   : > { %v5170_v39 = vpop.f32.mrb[44].mxu0 }
 0x167   : > { %v5171_v14 = vpop.f32.mrb[45].mxu0 }
 0x168   : > { %v5172_v4 = vadd.f32 %v5171_v14, %v5170_v39  ;;  %v5173_v22 = vpop.f32.mrb[46].mxu0 }
 0x169   : > { %v5282_v10 = vpop.f32.mrb[44].mxu1  ;;  %v5174_v19 = vpop.f32.mrb[47].mxu0 }
 0x16a   : > { %v5283_v24 = vpop.f32.mrb[45].mxu1  ;;  %v5175_v58 = vadd.f32 %v5174_v19, %v5173_v22 }
 0x16b   : > { %v7871_v61 = vadd.f32 %v5283_v24, %v5282_v10  ;;  %v5285_v38 = vpop.f32.mrb[46].mxu1 }
 0x16c   : > { %v5286_v16 = vpop.f32.mrb[47].mxu1 }
 0x16d   : > { %v7873_v45 = vadd.f32 %v5286_v16, %v5285_v38 }
 0x16e   : > { %v5176_v28 = vpop.f32.mrb[48].mxu0 }
 0x16f   : > { %v5177_v13 = vpop.f32.mrb[49].mxu0 }
 0x170   : > { %v7875_v8 = vadd.f32 %v5177_v13, %v5176_v28  ;;  %v5179_v57 = vpop.f32.mrb[50].mxu0 }
 0x171   : > { %v5180_v2 = vpop.f32.mrb[51].mxu0 }
 0x172   : > { %v5288_v44 = vpop.f32.mrb[48].mxu1  ;;  %v7877_v52 = vadd.f32 %v5180_v2, %v5179_v57 }
 0x173   : > { %v5289_v18 = vpop.f32.mrb[49].mxu1 }
 0x174   : > { %v5290_v43 = vadd.f32 %v5289_v18, %v5288_v44  ;;  %v5291_v36 = vpop.f32.mrb[50].mxu1 }
 0x175   : > { %v5292_v47 = vpop.f32.mrb[51].mxu1 }
 0x176   : > { %v7880_v30 = vadd.f32 %v5290_v43, %v7809_v59  ;;  %v5293_v50 = vadd.f32 %v5292_v47, %v5291_v36 }
 0x178   : > { %v7883_v7 = vadd.f32 %v5293_v50, %v7818_v55  ;;  %v5182_v39 = vpop.f32.mrb[52].mxu0 }
 0x179   : > { %v5183_v14 = vpop.f32.mrb[53].mxu0 }
 0x17a   : > { %v7885_v10 = vadd.f32 %v5183_v14, %v5182_v39  ;;  %v5185_v22 = vpop.f32.mrb[54].mxu0 }
 0x17b   : > { %v5294_v24 = vpop.f32.mrb[52].mxu1  ;;  %v5186_v19 = vpop.f32.mrb[55].mxu0 }
 0x17c   : > { %v5295_v38 = vpop.f32.mrb[53].mxu1  ;;  %v7887_v16 = vadd.f32 %v5186_v19, %v5185_v22 }
 0x17d   : > { %v5296_v28 = vadd.f32 %v5295_v38, %v5294_v24  ;;  %v5297_v13 = vpop.f32.mrb[54].mxu1 }
 0x17e   : > { %v5298_v57 = vpop.f32.mrb[55].mxu1 }
 0x17f   : > { %v7890_v59 = vadd.f32 %v5296_v28, %v7845_v15  ;;  %v5299_v2 = vadd.f32 %v5298_v57, %v5297_v13 }
 0x180   : > { %v5188_v44 = vpop.f32.mrb[56].mxu0 }
 0x181   : > { %v7893_v55 = vadd.f32 %v5299_v2, %v7851_v51  ;;  %v5189_v18 = vpop.f32.mrb[57].mxu0 }
 0x182   : > { %v7895_v43 = vadd.f32 %v5189_v18, %v5188_v44  ;;  %v5191_v36 = vpop.f32.mrb[58].mxu0 }
 0x183   : > { %v5192_v47 = vpop.f32.mrb[59].mxu0 }
 0x184   : > { %v5300_v50 = vpop.f32.mrb[56].mxu1  ;;  %v7897_v39 = vadd.f32 %v5192_v47, %v5191_v36 }
 0x185   : > { %v5301_v14 = vpop.f32.mrb[57].mxu1 }
 0x186   : > { %v5302_v22 = vadd.f32 %v5301_v14, %v5300_v50  ;;  %v5303_v24 = vpop.f32.mrb[58].mxu1 }
 0x187   : > { %v5304_v19 = vpop.f32.mrb[59].mxu1 }
 0x188   : > { %v7900_v15 = vadd.f32 %v5302_v22, %v7865_v23  ;;  %v5305_v38 = vadd.f32 %v5304_v19, %v5303_v24 }
 0x18a   : > { %v7902_v28 = vadd.f32 %v5305_v38, %v5169_v46  ;;  %v5194_v51 = vpop.f32.mrb[60].mxu0 }
 0x18b   : > { %v5195_v13 = vpop.f32.mrb[61].mxu0 }
 0x18c   : > { %v7904_v57 = vadd.f32 %v5195_v13, %v5194_v51  ;;  %v5197_v2 = vpop.f32.mrb[62].mxu0 }
 0x18d   : > { %v5306_v44 = vpop.f32.mrb[60].mxu1  ;;  %v5198_v18 = vpop.f32.mrb[63].mxu0 }
 0x18e   : > { %v5307_v63 = vpop.f32.mrb[61].mxu1  ;;  %v7906_v36 = vadd.f32 %v5198_v18, %v5197_v2 }
 0x18f   : > { %v5308_v47 = vadd.f32 %v5307_v63, %v5306_v44  ;;  %v5309_v50 = vpop.f32.mrb[62].mxu1 }
 0x190   : > { %v5310_v14 = vpop.f32.mrb[63].mxu1 }
 0x191   : > { %v7908_v60 = vadd.f32 %v5308_v47, %v5172_v4  ;;  %v5311_v23 = vadd.f32 %v5310_v14, %v5309_v50 }
 0x193   : > { %v7910_v24 = vadd.f32 %v5311_v23, %v5175_v58 }
 0x194   : > { %v5514_v22 = vpop.f32.mrb[64].mxu0 }
 0x195   : > { %v2259_v46 = vadd.f32 %v5514_v22, %v7534_v20  ;;  %v2250_v19 = vpop.f32.mrb[65].mxu0 }
 0x196   : > { %v2251_v38 = vadd.f32 %v7492_v53, %v2250_v19  ;;  %v5515_v51 = vpop.f32.mrb[66].mxu0  ;;  %v5312_v2 = vpop.f32.mrb[64].mxu1 }
 0x197   : > { %v7915_v13 = vadd.f32 %v7690_v31, %v2259_v46  ;;  %v2262_v63 = vadd.f32 %v5515_v51, %v7536_v27  ;;  %v2253_v44 = vpop.f32.mrb[67].mxu0  ;;  %v5313_v18 = vpop.f32.mrb[65].mxu1 }
 0x198   : > { %v7919_v4 = vadd.f32 %v7648_v25, %v2251_v38  ;;  %v2254_v58 = vadd.f32 %v7496_v3, %v2253_v44  ;;  %v5314_v47 = vadd.f32 %v5313_v18, %v5312_v2  ;;  %v5315_v50 = vpop.f32.mrb[66].mxu1 }
 0x199   : > { %v7923_v20 = vadd.f32 %v7706_v54, %v2262_v63  ;;  %v5316_v31 = vpop.f32.mrb[67].mxu1 }
 0x19a   : > { %v7926_v53 = vadd.f32 %v7664_v42, %v2254_v58  ;;  %v7929_v14 = vadd.f32 %v5314_v47, %v7875_v8  ;;  %v5317_v27 = vadd.f32 %v5316_v31, %v5315_v50 }
 0x19c   : > { %v5518_v23 = vpop.f32.mrb[68].mxu0  ;;  %v7932_v25 = vadd.f32 %v5317_v27, %v7877_v52 }
 0x19d   : > { %v2275_v22 = vadd.f32 %v5518_v23, %v7608_v49  ;;  %v2266_v3 = vpop.f32.mrb[69].mxu0 }
 0x19e   : > { %v2267_v46 = vadd.f32 %v7566_v56, %v2266_v3  ;;  %v5519_v54 = vpop.f32.mrb[70].mxu0 }
 0x19f   : > { %v7937_v19 = vadd.f32 %v7774_v33, %v2275_v22  ;;  %v5318_v42 = vpop.f32.mrb[68].mxu1  ;;  %v2278_v38 = vadd.f32 %v5519_v54, %v7617_v40  ;;  %v2269_v51 = vpop.f32.mrb[71].mxu0 }
 0x1a0   : > { %v7941_v8 = vadd.f32 %v7732_v48, %v2267_v46  ;;  %v5319_v2 = vpop.f32.mrb[69].mxu1  ;;  %v2270_v52 = vadd.f32 %v7573_v17, %v2269_v51 }
 0x1a1   : > { %v5320_v63 = vadd.f32 %v5319_v2, %v5318_v42  ;;  %v7945_v49 = vadd.f32 %v7790_v1, %v2278_v38  ;;  %v5321_v44 = vpop.f32.mrb[70].mxu1 }
 0x1a2   : > { %v7948_v56 = vadd.f32 %v7748_v0, %v2270_v52  ;;  %v5322_v33 = vpop.f32.mrb[71].mxu1 }
 0x1a3   : > { %v7951_v18 = vadd.f32 %v5320_v63, %v7885_v10  ;;  %v5323_v40 = vadd.f32 %v5322_v33, %v5321_v44 }
 0x1a4   : > { %v5522_v58 = vpop.f32.mrb[72].mxu0 }
 0x1a5   : > { %v7954_v48 = vadd.f32 %v5323_v40, %v7887_v16  ;;  %v2291_v47 = vadd.f32 %v5522_v58, %v7683_v35  ;;  %v2282_v17 = vpop.f32.mrb[73].mxu0 }
 0x1a6   : > { %v2283_v50 = vadd.f32 %v7641_v26, %v2282_v17  ;;  %v5523_v1 = vpop.f32.mrb[74].mxu0 }
 0x1a7   : > { %v7959_v31 = vadd.f32 %v7849_v6, %v2291_v47  ;;  %v5324_v0 = vpop.f32.mrb[72].mxu1  ;;  %v2294_v27 = vadd.f32 %v5523_v1, %v7692_v32  ;;  %v2285_v23 = vpop.f32.mrb[75].mxu0 }
 0x1a8   : > { %v7963_v10 = vadd.f32 %v7816_v29, %v2283_v50  ;;  %v5325_v22 = vpop.f32.mrb[73].mxu1  ;;  %v2286_v16 = vadd.f32 %v7650_v9, %v2285_v23 }
 0x1a9   : > { %v5326_v3 = vadd.f32 %v5325_v22, %v5324_v0  ;;  %v7967_v35 = vadd.f32 %v7861_v12, %v2294_v27  ;;  %v5327_v46 = vpop.f32.mrb[74].mxu1 }
 0x1aa   : > { %v7970_v26 = vadd.f32 %v7830_v21, %v2286_v16  ;;  %v5328_v6 = vpop.f32.mrb[75].mxu1 }
 0x1ab   : > { %v7973_v54 = vadd.f32 %v5326_v3, %v7895_v43  ;;  %v5329_v32 = vadd.f32 %v5328_v6, %v5327_v46 }
 0x1ac   : > { %v5526_v42 = vpop.f32.mrb[76].mxu0 }
 0x1ad   : > { %v7976_v29 = vadd.f32 %v5329_v32, %v7897_v39  ;;  %v2307_v38 = vadd.f32 %v5526_v42, %v7767_v37  ;;  %v2298_v9 = vpop.f32.mrb[77].mxu0 }
 0x1ae   : > { %v2299_v51 = vadd.f32 %v7725_v41, %v2298_v9  ;;  %v5527_v12 = vpop.f32.mrb[78].mxu0 }
 0x1af   : > { %v7981_v2 = vadd.f32 %v7871_v61, %v2307_v38  ;;  %v5330_v21 = vpop.f32.mrb[76].mxu1  ;;  %v2310_v52 = vadd.f32 %v5527_v12, %v7776_v34  ;;  %v2301_v63 = vpop.f32.mrb[79].mxu0 }
 0x1b0   : > { %v7985_v43 = vadd.f32 %v7867_v11, %v2299_v51  ;;  %v5331_v44 = vpop.f32.mrb[77].mxu1  ;;  %v2302_v39 = vadd.f32 %v7734_v5, %v2301_v63 }
 0x1b1   : > { %v5332_v33 = vadd.f32 %v5331_v44, %v5330_v21  ;;  %v7989_v37 = vadd.f32 %v7873_v45, %v2310_v52  ;;  %v5333_v40 = vpop.f32.mrb[78].mxu1 }
 0x1b2   : > { %v2607_v41 = vadd.f32 %v7869_v62, %v2302_v39  ;;  %v5334_v58 = vpop.f32.mrb[79].mxu1 }
 0x1b3   : > { %v7993_v61 = vadd.f32 %v5332_v33, %v7904_v57  ;;  %v5335_v47 = vadd.f32 %v5334_v58, %v5333_v40 }
 0x1b5   : > { %v7996_v34 = vadd.f32 %v5335_v47, %v7906_v36 }
 0x1b6   : > { %v5376_v11 = vpop.f32.mrb[80].mxu0 }
 0x1b7   : > { %v5377_v17 = vpop.f32.mrb[81].mxu0 }
 0x1b8   : > { %v5378_v50 = vadd.f32 %v5377_v17, %v5376_v11  ;;  %v5379_v1 = vpop.f32.mrb[82].mxu0 }
 0x1b9   : > { %v5380_v5 = vpop.f32.mrb[83].mxu0 }
 0x1ba   : > { %v5381_v0 = vadd.f32 %v5380_v5, %v5379_v1  ;;  %v7999_v45 = vadd.f32 %v5378_v50, %v7919_v4 }
 0x1bc   : > { %v8002_v27 = vadd.f32 %v5381_v0, %v7926_v53 }
 0x1be   : > { %v5382_v62 = vpop.f32.mrb[84].mxu0 }
 0x1bf   : > { %v5383_v23 = vpop.f32.mrb[85].mxu0 }
 0x1c0   : > { %v5384_v57 = vadd.f32 %v5383_v23, %v5382_v62  ;;  %v5385_v22 = vpop.f32.mrb[86].mxu0 }
 0x1c1   : > { %v5386_v16 = vpop.f32.mrb[87].mxu0 }
 0x1c2   : > { %v5387_v3 = vadd.f32 %v5386_v16, %v5385_v22  ;;  %v5658_v36 = vadd.f32 %v5384_v57, %v7915_v13 }
 0x1c4   : > { %v5666_v46 = vadd.f32 %v5387_v3, %v7923_v20 }
 0x1c6   : > { %v5388_v6 = vpop.f32.mrb[88].mxu0 }
 0x1c7   : > { %v5389_v32 = vpop.f32.mrb[89].mxu0 }
 0x1c8   : > { %v5390_v42 = vadd.f32 %v5389_v32, %v5388_v6  ;;  %v5391_v38 = vpop.f32.mrb[90].mxu0 }
 0x1c9   : > { %v5392_v9 = vpop.f32.mrb[91].mxu0 }
 0x1ca   : > { %v5393_v4 = vadd.f32 %v5392_v9, %v5391_v38  ;;  %v8007_v51 = vadd.f32 %v5390_v42, %v7941_v8 }
 0x1cc   : > { %v8010_v53 = vadd.f32 %v5393_v4, %v7948_v56 }
 0x1ce   : > { %v5394_v12 = vpop.f32.mrb[92].mxu0 }
 0x1cf   : > { %v5395_v21 = vpop.f32.mrb[93].mxu0 }
 0x1d0   : > { %v5396_v52 = vadd.f32 %v5395_v21, %v5394_v12  ;;  %v5397_v63 = vpop.f32.mrb[94].mxu0 }
 0x1d1   : > { %v5398_v44 = vpop.f32.mrb[95].mxu0 }
 0x1d2   : > { %v5399_v13 = vadd.f32 %v5398_v44, %v5397_v63  ;;  %v5674_v20 = vadd.f32 %v5396_v52, %v7937_v19 }
 0x1d4   : > { %v8014_v39 = vadd.f32 %v5399_v13, %v7945_v49 }
 0x1d6   : > { %v5400_v33 = vpop.f32.mrb[96].mxu0 }
 0x1d7   : > { %v5401_v40 = vpop.f32.mrb[97].mxu0 }
 0x1d8   : > { %v5402_v58 = vadd.f32 %v5401_v40, %v5400_v33  ;;  %v5403_v47 = vpop.f32.mrb[98].mxu0 }
 0x1d9   : > { %v5404_v8 = vpop.f32.mrb[99].mxu0 }
 0x1da   : > { %v5405_v11 = vadd.f32 %v5404_v8, %v5403_v47  ;;  %v8017_v56 = vadd.f32 %v5402_v58, %v7963_v10 }
 0x1dc   : > { %v8020_v17 = vadd.f32 %v5405_v11, %v7970_v26 }
 0x1de   : > { %v5406_v50 = vpop.f32.mrb[100].mxu0 }
 0x1df   : > { %v5407_v1 = vpop.f32.mrb[101].mxu0 }
 0x1e0   : > { %v5408_v5 = vadd.f32 %v5407_v1, %v5406_v50  ;;  %v5409_v0 = vpop.f32.mrb[102].mxu0 }
 0x1e1   : > { %v5410_v19 = vpop.f32.mrb[103].mxu0 }
 0x1e2   : > { %v5411_v62 = vadd.f32 %v5410_v19, %v5409_v0  ;;  %v8023_v49 = vadd.f32 %v5408_v5, %v7959_v31 }
 0x1e4   : > { %v8026_v23 = vadd.f32 %v5411_v62, %v7967_v35 }
 0x1e6   : > { %v5412_v57 = vpop.f32.mrb[104].mxu0 }
 0x1e7   : > { %v5413_v22 = vpop.f32.mrb[105].mxu0 }
 0x1e8   : > { %v5414_v16 = vadd.f32 %v5413_v22, %v5412_v57  ;;  %v5415_v10 = vpop.f32.mrb[106].mxu0 }
 0x1e9   : > { %v5416_v3 = vpop.f32.mrb[107].mxu0 }
 0x1ea   : > { %v5417_v6 = vadd.f32 %v5416_v3, %v5415_v10  ;;  %v8029_v26 = vadd.f32 %v5414_v16, %v7985_v43 }
 0x1ec   : > { %v8031_v32 = vadd.f32 %v5417_v6, %v2607_v41 }
 0x1ee   : > { %v5418_v42 = vpop.f32.mrb[108].mxu0 }
 0x1ef   : > { %v5419_v38 = vpop.f32.mrb[109].mxu0 }
 0x1f0   : > { %v5420_v9 = vadd.f32 %v5419_v38, %v5418_v42  ;;  %v5421_v4 = vpop.f32.mrb[110].mxu0 }
 0x1f1   : > { %v5422_v31 = vpop.f32.mrb[111].mxu0 }
 0x1f2   : > { %v5423_v12 = vadd.f32 %v5422_v31, %v5421_v4  ;;  %v8034_v35 = vadd.f32 %v5420_v9, %v7981_v2 }
 0x1f4   : > { %v8037_v21 = vadd.f32 %v5423_v12, %v7989_v37 }
 0x1f6   : > { %v5424_v52 = vpop.f32.mrb[112].mxu0 }
 0x1f7   : > { %v5610_v63 = vpop.f32.mrb[80].mxu1  ;;  %v5425_v43 = vpop.f32.mrb[113].mxu0 }
 0x1f8   : > { %v8039_v44 = vadd.f32 %v5658_v36, %v5610_v63  ;;  %v4048_v13 = vpop.f32.mrb[81].mxu1  ;;  %v5426_v41 = vadd.f32 %v5425_v43, %v5424_v52  ;;  %v5427_v40 = vpop.f32.mrb[114].mxu0 }
 0x1f9   : > { %v8042_v33 = vadd.f32 %v7999_v45, %v4048_v13  ;;  %v5611_v58 = vpop.f32.mrb[82].mxu1  ;;  %v5428_v8 = vpop.f32.mrb[115].mxu0 }
 0x1fa   : > { %v8044_v47 = vadd.f32 %v5666_v46, %v5611_v58  ;;  %v4051_v2 = vpop.f32.mrb[83].mxu1  ;;  %v5429_v11 = vadd.f32 %v5428_v8, %v5427_v40  ;;  %v8050_v50 = vadd.f32 %v7880_v30, %v5426_v41  ;;  %v4247_v5 = vmul.f32 %v8039_v44, %v8039_v44 }
 0x1fb   : > { %v8047_v37 = vadd.f32 %v8002_v27, %v4051_v2  ;;  %v4245_v36 = vmul.f32 %v8042_v33, %v8042_v33 }
 0x1fc   : > { %v8059_v46 = vadd.f32 %v7883_v7, %v5429_v11  ;;  %v4248_v62 = vmul.f32 %v8044_v47, %v8044_v47 }
 0x1fd   : > { %v4207_v45 = vadd.f32 %v8047_v37, %v8042_v33  ;;  %v4246_v1 = vmul.f32 %v8047_v37, %v8047_v37 }
 0x1ff   : > { %v4208_v27 = vadd.f32 %v8039_v44, %v4207_v45  ;;  %v4277_v0 = vadd.f32 %v4246_v1, %v4245_v36  ;;  %v5430_v30 = vpop.f32.mrb[116].mxu0  ;;  %v5614_v19 = vpop.f32.mrb[84].mxu1 }
 0x200   : > { %v8066_v57 = vadd.f32 %v5674_v20, %v5614_v19  ;;  %v5431_v22 = vpop.f32.mrb[117].mxu0  ;;  %v4064_v16 = vpop.f32.mrb[85].mxu1 }
 0x201   : > { %v4278_v10 = vadd.f32 %v4277_v0, %v4247_v5  ;;  %v5432_v3 = vadd.f32 %v5431_v22, %v5430_v30  ;;  %v8069_v7 = vadd.f32 %v8007_v51, %v4064_v16  ;;  %v4209_v6 = vadd.f32 %v8044_v47, %v4208_v27  ;;  %v5433_v42 = vpop.f32.mrb[118].mxu0  ;;  %v5615_v38 = vpop.f32.mrb[86].mxu1 }
 0x202   : > { %v8073_v9 = vadd.f32 %v8014_v39, %v5615_v38  ;;  %v5434_v4 = vpop.f32.mrb[119].mxu0  ;;  %v4067_v31 = vpop.f32.mrb[87].mxu1  ;;  %v4251_v2 = vmul.f32 %v8066_v57, %v8066_v57 }
 0x203   : > { %v4210_v12 = vadd.f32 %v8069_v7, %v4209_v6  ;;  %v4249_v20 = vmul.f32 %v8069_v7, %v8069_v7  ;;  %v4279_v52 = vadd.f32 %v4278_v10, %v4248_v62  ;;  %v5435_v63 = vadd.f32 %v5434_v4, %v5433_v42 }
 0x204   : > { %v8079_v43 = vadd.f32 %v8010_v53, %v4067_v31  ;;  %v8082_v51 = vadd.f32 %v7890_v59, %v5432_v3  ;;  %v4252_v0 = vmul.f32 %v8073_v9, %v8073_v9 }
 0x205   : > { %v4280_v13 = vadd.f32 %v4279_v52, %v4249_v20  ;;  %v8085_v41 = vadd.f32 %v7893_v55, %v5435_v63 }
 0x206   : > { %v4211_v39 = vadd.f32 %v8079_v43, %v4210_v12  ;;  %v4250_v40 = vmul.f32 %v8079_v43, %v8079_v43 }
 0x207   : > { %v5436_v58 = vpop.f32.mrb[120].mxu0  ;;  %v5618_v8 = vpop.f32.mrb[88].mxu1 }
 0x208   : > { %v4212_v53 = vadd.f32 %v8066_v57, %v4211_v39  ;;  %v4281_v11 = vadd.f32 %v4280_v13, %v4250_v40  ;;  %v8094_v59 = vadd.f32 %v8023_v49, %v5618_v8  ;;  %v5437_v36 = vpop.f32.mrb[121].mxu0  ;;  %v4080_v45 = vpop.f32.mrb[89].mxu1 }
 0x209   : > { %v5438_v55 = vadd.f32 %v5437_v36, %v5436_v58  ;;  %v8097_v1 = vadd.f32 %v8017_v56, %v4080_v45  ;;  %v5439_v5 = vpop.f32.mrb[122].mxu0  ;;  %v5619_v27 = vpop.f32.mrb[90].mxu1 }
 0x20a   : > { %v4282_v30 = vadd.f32 %v4281_v11, %v4251_v2  ;;  %v4213_v19 = vadd.f32 %v8073_v9, %v4212_v53  ;;  %v8103_v62 = vadd.f32 %v8026_v23, %v5619_v27  ;;  %v5440_v22 = vpop.f32.mrb[123].mxu0  ;;  %v4083_v49 = vpop.f32.mrb[91].mxu1 }
 0x20b   : > { %v4253_v16 = vmul.f32 %v8097_v1, %v8097_v1  ;;  %v5441_v10 = vadd.f32 %v5440_v22, %v5439_v5  ;;  %v8108_v56 = vadd.f32 %v8020_v17, %v4083_v49  ;;  %v8111_v3 = vadd.f32 %v7900_v15, %v5438_v55 }
 0x20c   : > { %v4214_v6 = vadd.f32 %v8097_v1, %v4213_v19  ;;  %v4283_v42 = vadd.f32 %v4282_v30, %v4252_v0  ;;  %v4255_v17 = vmul.f32 %v8094_v59, %v8094_v59  ;;  %v4256_v2 = vmul.f32 %v8103_v62, %v8103_v62 }
 0x20d   : > { %v4254_v38 = vmul.f32 %v8108_v56, %v8108_v56  ;;  %v8117_v23 = vadd.f32 %v7902_v28, %v5441_v10 }
 0x20e   : > { %v4284_v4 = vadd.f32 %v4283_v42, %v4253_v16  ;;  %v4215_v31 = vadd.f32 %v8108_v56, %v4214_v6 }
 0x20f   : > { %v5442_v12 = vpop.f32.mrb[124].mxu0  ;;  %v5622_v20 = vpop.f32.mrb[92].mxu1 }
 0x210   : > { %v4216_v15 = vadd.f32 %v8094_v59, %v4215_v31  ;;  %v4285_v52 = vadd.f32 %v4284_v4, %v4254_v38  ;;  %v8124_v63 = vadd.f32 %v8034_v35, %v5622_v20  ;;  %v5443_v13 = vpop.f32.mrb[125].mxu0  ;;  %v4096_v39 = vpop.f32.mrb[93].mxu1 }
 0x211   : > { %v5444_v40 = vadd.f32 %v5443_v13, %v5442_v12  ;;  %v8127_v28 = vadd.f32 %v8029_v26, %v4096_v39  ;;  %v5445_v58 = vpop.f32.mrb[126].mxu0  ;;  %v5623_v8 = vpop.f32.mrb[94].mxu1 }
 0x212   : > { %v4286_v53 = vadd.f32 %v4285_v52, %v4255_v17  ;;  %v4217_v11 = vadd.f32 %v8103_v62, %v4216_v15  ;;  %v8133_v36 = vadd.f32 %v8037_v21, %v5623_v8  ;;  %v5446_v45 = vpop.f32.mrb[127].mxu0  ;;  %v4099_v35 = vpop.f32.mrb[95].mxu1  ;;  %v4259_v16 = vmul.f32 %v8124_v63, %v8124_v63 }
 0x213   : > { %v4257_v55 = vmul.f32 %v8127_v28, %v8127_v28  ;;  %v5447_v5 = vadd.f32 %v5446_v45, %v5445_v58  ;;  %v8138_v26 = vadd.f32 %v8031_v32, %v4099_v35  ;;  %v5733_v27 = vadd.f32 %v7908_v60, %v5444_v40 }
 0x214   : > { %v4218_v0 = vadd.f32 %v8127_v28, %v4217_v11  ;;  %v4287_v30 = vadd.f32 %v4286_v53, %v4256_v2  ;;  %v4260_v60 = vmul.f32 %v8133_v36, %v8133_v36 }
 0x215   : > { %v4258_v19 = vmul.f32 %v8138_v26, %v8138_v26  ;;  %v5739_v21 = vadd.f32 %v7910_v24, %v5447_v5 }
 0x216   : > { %v4288_v22 = vadd.f32 %v4287_v30, %v4257_v55  ;;  %v4219_v49 = vadd.f32 %v8138_v26, %v4218_v0 }
 0x218   : > { %v4220_v10 = vadd.f32 %v8124_v63, %v4219_v49  ;;  %v4289_v32 = vadd.f32 %v4288_v22, %v4258_v19  ;;  %v5448_v6 = vpop.f32.mrb[128].mxu0  ;;  %v5626_v42 = vpop.f32.mrb[0].mxu1 }
 0x219   : > { %v8152_v38 = vadd.f32 %v8082_v51, %v5626_v42  ;;  %v5449_v4 = vpop.f32.mrb[129].mxu0  ;;  %v4112_v31 = vpop.f32.mrb[1].mxu1 }
 0x21a   : > { %v4290_v24 = vadd.f32 %v4289_v32, %v4259_v16  ;;  %v5450_v12 = vadd.f32 %v5449_v4, %v5448_v6  ;;  %v8155_v20 = vadd.f32 %v8050_v50, %v4112_v31  ;;  %v4221_v17 = vadd.f32 %v8133_v36, %v4220_v10  ;;  %v5451_v15 = vpop.f32.mrb[130].mxu0  ;;  %v5627_v52 = vpop.f32.mrb[2].mxu1 }
 0x21b   : > { %v8159_v13 = vadd.f32 %v8085_v41, %v5627_v52  ;;  %v5452_v39 = vpop.f32.mrb[131].mxu0  ;;  %v4115_v40 = vpop.f32.mrb[3].mxu1  ;;  %v4263_v55 = vmul.f32 %v8152_v38, %v8152_v38 }
 0x21c   : > { %v4222_v58 = vadd.f32 %v8155_v20, %v4221_v17  ;;  %v4261_v51 = vmul.f32 %v8155_v20, %v8155_v20  ;;  %v4291_v8 = vadd.f32 %v4290_v24, %v4260_v60  ;;  %v5453_v2 = vadd.f32 %v5452_v39, %v5451_v15 }
 0x21d   : > { %v8165_v53 = vadd.f32 %v8059_v46, %v4115_v40  ;;  %v5748_v50 = vadd.f32 %v7929_v14, %v5450_v12  ;;  %v4264_v46 = vmul.f32 %v8159_v13, %v8159_v13 }
 0x21e   : > { %v4292_v11 = vadd.f32 %v4291_v8, %v4261_v51  ;;  %v5754_v45 = vadd.f32 %v7932_v25, %v5453_v2 }
 0x21f   : > { %v4223_v41 = vadd.f32 %v8165_v53, %v4222_v58  ;;  %v4262_v35 = vmul.f32 %v8165_v53, %v8165_v53 }
 0x221   : > { %v4224_v5 = vadd.f32 %v8152_v38, %v4223_v41  ;;  %v4293_v0 = vadd.f32 %v4292_v11, %v4262_v35  ;;  %v5454_v30 = vpop.f32.mrb[132].mxu0  ;;  %v5630_v19 = vpop.f32.mrb[4].mxu1 }
 0x222   : > { %v8177_v14 = vadd.f32 %v5733_v27, %v5630_v19  ;;  %v5455_v22 = vpop.f32.mrb[133].mxu0  ;;  %v4128_v25 = vpop.f32.mrb[5].mxu1 }
 0x223   : > { %v4294_v49 = vadd.f32 %v4293_v0, %v4263_v55  ;;  %v5456_v16 = vadd.f32 %v5455_v22, %v5454_v30  ;;  %v8180_v10 = vadd.f32 %v8111_v3, %v4128_v25  ;;  %v4225_v32 = vadd.f32 %v8159_v13, %v4224_v5  ;;  %v5457_v6 = vpop.f32.mrb[134].mxu0  ;;  %v5631_v42 = vpop.f32.mrb[6].mxu1 }
 0x224   : > { %v8183_v60 = vadd.f32 %v5739_v21, %v5631_v42  ;;  %v5458_v4 = vpop.f32.mrb[135].mxu0  ;;  %v4131_v31 = vpop.f32.mrb[7].mxu1  ;;  %v4267_v58 = vmul.f32 %v8177_v14, %v8177_v14 }
 0x225   : > { %v4226_v24 = vadd.f32 %v8180_v10, %v4225_v32  ;;  %v4265_v27 = vmul.f32 %v8180_v10, %v8180_v10  ;;  %v4295_v12 = vadd.f32 %v4294_v49, %v4264_v46  ;;  %v5459_v17 = vadd.f32 %v5458_v4, %v5457_v6 }
 0x226   : > { %v8189_v15 = vadd.f32 %v8117_v23, %v4131_v31  ;;  %v5745_v3 = vadd.f32 %v7951_v18, %v5456_v16  ;;  %v4268_v23 = vmul.f32 %v8183_v60, %v8183_v60 }
 0x227   : > { %v4296_v52 = vadd.f32 %v4295_v12, %v4265_v27  ;;  %v5751_v39 = vadd.f32 %v7954_v48, %v5459_v17 }
 0x228   : > { %v4227_v21 = vadd.f32 %v8189_v15, %v4226_v24  ;;  %v4266_v40 = vmul.f32 %v8189_v15, %v8189_v15 }
 0x22a   : > { %v4228_v51 = vadd.f32 %v8177_v14, %v4227_v21  ;;  %v4297_v8 = vadd.f32 %v4296_v52, %v4266_v40  ;;  %v5460_v2 = vpop.f32.mrb[136].mxu0  ;;  %v5634_v11 = vpop.f32.mrb[8].mxu1 }
 0x22b   : > { %v8201_v18 = vadd.f32 %v5745_v3, %v5634_v11  ;;  %v5461_v41 = vpop.f32.mrb[137].mxu0  ;;  %v4144_v48 = vpop.f32.mrb[9].mxu1 }
 0x22c   : > { %v4298_v35 = vadd.f32 %v4297_v8, %v4267_v58  ;;  %v5462_v55 = vadd.f32 %v5461_v41, %v5460_v2  ;;  %v8203_v5 = vadd.f32 %v5748_v50, %v4144_v48  ;;  %v4229_v0 = vadd.f32 %v8183_v60, %v4228_v51  ;;  %v5463_v30 = vpop.f32.mrb[138].mxu0  ;;  %v5635_v19 = vpop.f32.mrb[10].mxu1 }
 0x22d   : > { %v8206_v46 = vadd.f32 %v5751_v39, %v5635_v19  ;;  %v5464_v22 = vpop.f32.mrb[139].mxu0  ;;  %v4147_v25 = vpop.f32.mrb[11].mxu1  ;;  %v4271_v12 = vmul.f32 %v8201_v18, %v8201_v18 }
 0x22e   : > { %v4230_v49 = vadd.f32 %v8203_v5, %v4229_v0  ;;  %v4269_v16 = vmul.f32 %v8203_v5, %v8203_v5  ;;  %v4299_v32 = vadd.f32 %v4298_v35, %v4268_v23  ;;  %v5465_v6 = vadd.f32 %v5464_v22, %v5463_v30 }
 0x22f   : > { %v8211_v42 = vadd.f32 %v5754_v45, %v4147_v25  ;;  %v5760_v50 = vadd.f32 %v7973_v54, %v5462_v55  ;;  %v4272_v45 = vmul.f32 %v8206_v46, %v8206_v46 }
 0x230   : > { %v4300_v4 = vadd.f32 %v4299_v32, %v4269_v16  ;;  %v5766_v31 = vadd.f32 %v7976_v29, %v5465_v6 }
 0x231   : > { %v4231_v24 = vadd.f32 %v8211_v42, %v4230_v49  ;;  %v4270_v27 = vmul.f32 %v8211_v42, %v8211_v42 }
 0x233   : > { %v4232_v17 = vadd.f32 %v8201_v18, %v4231_v24  ;;  %v4301_v3 = vadd.f32 %v4300_v4, %v4270_v27  ;;  %v5466_v52 = vpop.f32.mrb[140].mxu0  ;;  %v5638_v39 = vpop.f32.mrb[12].mxu1 }
 0x234   : > { %v5467_v54 = vpop.f32.mrb[141].mxu0  ;;  %v4160_v21 = vpop.f32.mrb[13].mxu1 }
 0x235   : > { %v4302_v40 = vadd.f32 %v4301_v3, %v4271_v12  ;;  %v5468_v29 = vadd.f32 %v5467_v54, %v5466_v52  ;;  %v8223_v58 = vadd.f32 %v5760_v50, %v4160_v21  ;;  %v4233_v51 = vadd.f32 %v8206_v46, %v4232_v17  ;;  %v5469_v8 = vpop.f32.mrb[142].mxu0  ;;  %v5639_v2 = vpop.f32.mrb[14].mxu1 }
 0x236   : > { %v5470_v11 = vpop.f32.mrb[143].mxu0  ;;  %v4163_v23 = vpop.f32.mrb[15].mxu1 }
 0x237   : > { %v5757_v41 = vadd.f32 %v7993_v61, %v5468_v29  ;;  %v4234_v48 = vadd.f32 %v8223_v58, %v4233_v51  ;;  %v4273_v35 = vmul.f32 %v8223_v58, %v8223_v58  ;;  %v4303_v55 = vadd.f32 %v4302_v40, %v4272_v45 }
 0x238   : > { %v5471_v0 = vadd.f32 %v5470_v11, %v5469_v8  ;;  %v8230_v30 = vadd.f32 %v5766_v31, %v4163_v23 }
 0x239   : > { %v8232_v19 = vadd.f32 %v5757_v41, %v5638_v39  ;;  %v4304_v22 = vadd.f32 %v4303_v55, %v4273_v35  ;;  %v8758_v41 = vld [vmem:[#allocation5_spill] sm:$0xff]  ;;  %v8759_v35 = vld [vmem:[#allocation6_spill] sm:$0xff] }
 0x23a   : > { %v5763_v25 = vadd.f32 %v7996_v34, %v5471_v0  ;;  %v4235_v49 = vadd.f32 %v8230_v30, %v4234_v48  ;;  %v4274_v16 = vmul.f32 %v8230_v30, %v8230_v30 }
 0x23b   : > { %v4275_v61 = vmul.f32 %v8232_v19, %v8232_v19 }
 0x23c   : > { %v8240_v32 = vadd.f32 %v5763_v25, %v5639_v2  ;;  %v4236_v6 = vadd.f32 %v8232_v19, %v4235_v49  ;;  %v4305_v50 = vadd.f32 %v4304_v22, %v4274_v16  ;;  %v8760_v22 = vld [vmem:[#allocation7_spill] sm:$0xff]  ;;  %v8761_v49 = vld [vmem:[#allocation8_spill] sm:$0xff]  ;;  %v8782_v25 = vld [vmem:[#allocation29_spill] sm:$0xff] }
 0x23d   : > { %v8765_v16 = vld [vmem:[#allocation12_spill] sm:$0xff] }
 0x23e   : > { %v4276_v4 = vmul.f32 %v8240_v32, %v8240_v32  ;;  %v4237_v31 = vadd.f32 %v8240_v32, %v4236_v6  ;;  %v4306_v24 = vadd.f32 %v4305_v50, %v4275_v61  ;;  %v8762_v61 = vld [vmem:[#allocation9_spill] sm:$0xff]  ;;  %v8763_v50 = vld [vmem:[#allocation10_spill] sm:$0xff]  ;;  %v8781_v6 = vld [vmem:[#allocation28_spill] sm:$0xff] }
 0x240   : > { %v4238_v34 = vrot.slane %v4237_v31, 4  ;;  %v4307_v27 = vadd.f32 %v4306_v24, %v4276_v4  ;;  %v8764_v4 = vld [vmem:[#allocation11_spill] sm:$0xff] }
 0x242   : > { %v4239_v12 = vadd.f32 %v4238_v34, %v4237_v31  ;;  %v4308_v17 = vrot.slane %v4307_v27, 4 }
 0x244   : > { %v4240_v3 = vrot.slane %v4239_v12, 2  ;;  %v4309_v52 = vadd.f32 %v4308_v17, %v4307_v27  ;;  %v8783_v17 = vld [vmem:[#allocation30_spill] sm:$0xff] }
 0x246   : > { %v4241_v39 = vadd.f32 %v4240_v3, %v4239_v12  ;;  %v4310_v45 = vrot.slane %v4309_v52, 2  ;;  %v8784_v12 = vld [vmem:[#allocation31_spill] sm:$0xff] }
 0x248   : > { %v4242_v54 = vrot.slane %v4241_v39, 1  ;;  %v4311_v21 = vadd.f32 %v4310_v45, %v4309_v52 }
 0x24a   : > { %v4243_v40 = vadd.f32 %v4242_v54, %v4241_v39  ;;  %v4312_v29 = vrot.slane %v4311_v21, 1 }
 0x24c   : > { %v8246_v51 = vmul.f32 0.00390625, %v4243_v40  ;;  %v4313_v8 = vadd.f32 %v4312_v29, %v4311_v21  ;;  %v8779_v21 = vld [vmem:[#allocation26_spill] sm:$0xff]  ;;  %v8785_v29 = vld [vmem:[#allocation32_spill] sm:$0xff] }
 0x24e   : > { %v4314_v2 = vmul.f32 0.00390625, %v4313_v8  ;;  %v4315_v11 = vmul.f32 %v8246_v51, %v8246_v51  ;;  %v8767_v8 = vld [vmem:[#allocation14_spill] sm:$0xff]  ;;  %v4318_v45 = vsub.f32 %v8042_v33, %v8246_v51  ;;  %v4319_v3 = vsub.f32 %v8047_v37, %v8246_v51 }
 0x24f   : > { %v4320_v55 = vsub.f32 %v8039_v44, %v8246_v51  ;;  %v4321_v34 = vsub.f32 %v8044_v47, %v8246_v51  ;;  %v4323_v23 = vsub.f32 %v8079_v43, %v8246_v51  ;;  %v4325_v33 = vsub.f32 %v8073_v9, %v8246_v51 }
 0x250   : > { %v4316_v0 = vsub.f32 %v4314_v2, %v4315_v11  ;;  %v8787_v2 = vld [vmem:[#allocation34_spill] sm:$0xff]  ;;  %v4326_v37 = vsub.f32 %v8097_v1, %v8246_v51  ;;  %v4327_v44 = vsub.f32 %v8108_v56, %v8246_v51  ;;  %v4328_v47 = vsub.f32 %v8094_v59, %v8246_v51 }
 0x251   : > { %v4445_v24 = vunpack.c.l.bf16 %v8787_v2  ;;  %v4322_v2 = vsub.f32 %v8069_v7, %v8246_v51  ;;  %v4329_v7 = vsub.f32 %v8103_v62, %v8246_v51 }
 0x252   : > { %v4317_v31 = vmax.f32 %v4316_v0, 0.0  ;;  %v4324_v0 = vsub.f32 %v8066_v57, %v8246_v51  ;;  %v8790_v57 = vsub.f32 %v8230_v30, %v8246_v51 }
 0x254   : > { %v4350_v39 = vadd.f32 1e-05, %v4317_v31  ;;  %v8780_v31 = vld [vmem:[#allocation27_spill] sm:$0xff] }
 0x256   : > { %5978 = vrsqrt.f32 %v4350_v39  ;;  %v8766_v39 = vld [vmem:[#allocation13_spill] sm:$0xff] }
 0x260   : > { %v5979_v48 = vpop.eup %5978 }
 0x261   : > { %v4381_v43 = vmul.f32 %v5979_v48, %v8790_v57  ;;  %v8352_v9 = vmul.f32 %v5979_v48, %v4318_v45  ;;  %v8354_v52 = vmul.f32 %v5979_v48, %v4319_v3  ;;  %v8356_v1 = vmul.f32 %v5979_v48, %v4320_v55 }
 0x262   : > { %v8358_v54 = vmul.f32 %v5979_v48, %v4321_v34  ;;  %v8360_v56 = vmul.f32 %v5979_v48, %v4322_v2  ;;  %v8362_v59 = vmul.f32 %v5979_v48, %v4323_v23  ;;  %v8364_v40 = vmul.f32 %v5979_v48, %v4324_v0 }
 0x263   : > { %v4413_v62 = vmax.f32 %v4381_v43, 0.0  ;;  %v8366_v11 = vmul.f32 %v5979_v48, %v4325_v33  ;;  %v8368_v27 = vmul.f32 %v5979_v48, %v4326_v37  ;;  %v8370_v30 = vmul.f32 %v5979_v48, %v4327_v44 }
 0x264   : > { %v8372_v45 = vmul.f32 %v5979_v48, %v4328_v47  ;;  %v8374_v3 = vmul.f32 %v5979_v48, %v4329_v7  ;;  %v8791_v55 = vsub.f32 %v8127_v28, %v8246_v51  ;;  %v8792_v23 = vsub.f32 %v8138_v26, %v8246_v51 }
 0x265   : > { %v4477_v2 = vadd.f32 %v4445_v24, %v4413_v62  ;;  %v8793_v33 = vsub.f32 %v8124_v63, %v8246_v51  ;;  %v8794_v44 = vsub.f32 %v8133_v36, %v8246_v51  ;;  %v8795_v28 = vsub.f32 %v8155_v20, %v8246_v51 }
 0x266   : > { %v8379_v34 = vmul.f32 %v5979_v48, %v8791_v55  ;;  %v8384_v0 = vmul.f32 %v5979_v48, %v8792_v23  ;;  %v8796_v26 = vsub.f32 %v8165_v53, %v8246_v51  ;;  %v8797_v63 = vsub.f32 %v8152_v38, %v8246_v51 }
 0x267   : > { %v8389_v37 = vmul.f32 %v5979_v48, %v8793_v33  ;;  %v8394_v47 = vmul.f32 %v5979_v48, %v8794_v44  ;;  %v8399_v7 = vmul.f32 %v5979_v48, %v8795_v28  ;;  %v8798_v36 = vsub.f32 %v8159_v13, %v8246_v51  ;;  %4509 = vst [vmem:[%s8421_s26 + $0xe8] sm:$0xff] %v4477_v2 }
 0x268   : > { %v8404_v57 = vmul.f32 %v5979_v48, %v8796_v26  ;;  %v8409_v24 = vmul.f32 %v5979_v48, %v8797_v63  ;;  %v8799_v20 = vsub.f32 %v8180_v10, %v8246_v51  ;;  %v8800_v53 = vsub.f32 %v8189_v15, %v8246_v51 }
 0x269   : > { %v8414_v43 = vmul.f32 %v5979_v48, %v8798_v36  ;;  %v8801_v55 = vsub.f32 %v8177_v14, %v8246_v51  ;;  %v8802_v23 = vsub.f32 %v8183_v60, %v8246_v51  ;;  %v8803_v33 = vsub.f32 %v8203_v5, %v8246_v51 }
 0x26a   : > { %v8419_v62 = vmul.f32 %v5979_v48, %v8799_v20  ;;  %v8427_v38 = vmul.f32 %v5979_v48, %v8800_v53  ;;  %v8804_v15 = vsub.f32 %v8211_v42, %v8246_v51  ;;  %v8805_v14 = vsub.f32 %v8201_v18, %v8246_v51 }
 0x26b   : > { %v8432_v13 = vmul.f32 %v5979_v48, %v8801_v55  ;;  %v8437_v10 = vmul.f32 %v5979_v48, %v8802_v23  ;;  %v8442_v44 = vmul.f32 %v5979_v48, %v8803_v33  ;;  %v8806_v60 = vsub.f32 %v8206_v46, %v8246_v51 }
 0x26c   : > { %v8447_v2 = vmul.f32 %v5979_v48, %v8804_v15  ;;  %v8452_v28 = vmul.f32 %v5979_v48, %v8805_v14  ;;  %v8807_v5 = vsub.f32 %v8223_v58, %v8246_v51  ;;  %v8808_v42 = vsub.f32 %v8232_v19, %v8246_v51 }
 0x26d   : > { %v8457_v26 = vmul.f32 %v5979_v48, %v8806_v60  ;;  %v8809_v18 = vsub.f32 %v8240_v32, %v8246_v51  ;;  %v4384_v53 = vmax.f32 %v8352_v9, 0.0  ;;  %v4385_v46 = vmax.f32 %v8354_v52, 0.0 }
 0x26e   : > { %v8462_v63 = vmul.f32 %v5979_v48, %v8807_v5  ;;  %v8467_v36 = vmul.f32 %v5979_v48, %v8808_v42  ;;  %v4386_v55 = vmax.f32 %v8356_v1, 0.0  ;;  %v4387_v58 = vmax.f32 %v8358_v54, 0.0 }
 0x26f   : > { %v8472_v20 = vmul.f32 %v5979_v48, %v8809_v18  ;;  %v4388_v23 = vmax.f32 %v8360_v56, 0.0  ;;  %v4389_v33 = vmax.f32 %v8362_v59, 0.0  ;;  %v4390_v19 = vmax.f32 %v8364_v40, 0.0 }
 0x270   : > { %v4391_v15 = vmax.f32 %v8366_v11, 0.0  ;;  %v4392_v32 = vmax.f32 %v8368_v27, 0.0  ;;  %v4393_v51 = vmax.f32 %v8370_v30, 0.0  ;;  %v4394_v48 = vmax.f32 %v8372_v45, 0.0 }
 0x271   : > { %v4395_v52 = vmax.f32 %v8374_v3, 0.0  ;;  %v4396_v9 = vmax.f32 %v8379_v34, 0.0  ;;  %v4397_v54 = vmax.f32 %v8384_v0, 0.0  ;;  %v4398_v1 = vmax.f32 %v8389_v37, 0.0 }
 0x272   : > { %v4399_v56 = vmax.f32 %v8394_v47, 0.0  ;;  %v4400_v40 = vmax.f32 %v8399_v7, 0.0  ;;  %v4401_v11 = vmax.f32 %v8404_v57, 0.0  ;;  %v4402_v27 = vmax.f32 %v8409_v24, 0.0 }
 0x273   : > { %v4403_v59 = vmax.f32 %v8414_v43, 0.0  ;;  %v4404_v30 = vmax.f32 %v8419_v62, 0.0  ;;  %v4405_v45 = vmax.f32 %v8427_v38, 0.0  ;;  %v4406_v3 = vmax.f32 %v8432_v13, 0.0 }
 0x274   : > { %v4407_v34 = vmax.f32 %v8437_v10, 0.0  ;;  %v4408_v0 = vmax.f32 %v8442_v44, 0.0  ;;  %v4409_v37 = vmax.f32 %v8447_v2, 0.0  ;;  %v4410_v47 = vmax.f32 %v8452_v28, 0.0 }
 0x275   : > { %v4411_v7 = vmax.f32 %v8457_v26, 0.0  ;;  %v4412_v57 = vmax.f32 %v8462_v63, 0.0  ;;  %v4414_v24 = vmax.f32 %v8467_v36, 0.0  ;;  %v4415_v43 = vmax.f32 %v8472_v20, 0.0  ;;  %v8820_v20 = vld [vmem:[#allocation15_spill] sm:$0xff] }
 0x276   : > { %v8810_v62 = vunpack.c.l.bf16 %v8758_v41  ;;  %v8811_v13 = vunpack.c.l.bf16 %v8759_v35  ;;  %v8812_v44 = vunpack.c.l.bf16 %v8760_v22  ;;  %v8813_v14 = vunpack.c.l.bf16 %v8761_v49 }
 0x277   : > { %v8814_v60 = vunpack.c.l.bf16 %v8762_v61  ;;  %v8815_v5 = vunpack.c.l.bf16 %v8763_v50  ;;  %v8816_v41 = vunpack.c.l.bf16 %v8764_v4  ;;  %v8817_v42 = vunpack.c.l.bf16 %v8765_v16  ;;  %v8822_v4 = vld [vmem:[#allocation16_spill] sm:$0xff] }
 0x278   : > { %v4448_v38 = vadd.f32 %v8810_v62, %v4384_v53  ;;  %v4449_v10 = vadd.f32 %v8811_v13, %v4385_v46  ;;  %v4450_v2 = vadd.f32 %v8812_v44, %v4386_v55  ;;  %v4451_v28 = vadd.f32 %v8813_v14, %v4387_v58  ;;  %v8824_v55 = vld [vmem:[#allocation17_spill] sm:$0xff]  ;;  %v8838_v14 = vld [vmem:[#allocation24_spill] sm:$0xff] }
 0x279   : > { %v4452_v26 = vadd.f32 %v8814_v60, %v4388_v23  ;;  %v4453_v63 = vadd.f32 %v8815_v5, %v4389_v33  ;;  %v4454_v35 = vadd.f32 %v8816_v41, %v4390_v19  ;;  %v4455_v22 = vadd.f32 %v8817_v42, %v4391_v15  ;;  %v8826_v23 = vld [vmem:[#allocation18_spill] sm:$0xff]  ;;  %v8828_v19 = vld [vmem:[#allocation19_spill] sm:$0xff]  ;;  %v8840_v60 = vld [vmem:[#allocation25_spill] sm:$0xff] }
 0x27a   : > { %v8818_v49 = vunpack.c.l.bf16 %v8766_v39  ;;  %v8819_v61 = vunpack.c.l.bf16 %v8767_v8  ;;  %v8821_v53 = vunpack.c.l.bf16 %v8820_v20  ;;  %4480 = vst [vmem:[%s8421_s26] sm:$0xff] %v4448_v38  ;;  %4481 = vst [vmem:[%s8421_s26 + $0x8] sm:$0xff] %v4449_v10  ;;  %v8823_v46 = vunpack.c.l.bf16 %v8822_v4 }
 0x27b   : > { %4482 = vst [vmem:[%s8421_s26 + $0x10] sm:$0xff] %v4450_v2  ;;  %v8825_v58 = vunpack.c.l.bf16 %v8824_v55  ;;  %v8827_v33 = vunpack.c.l.bf16 %v8826_v23  ;;  %v8829_v15 = vunpack.c.l.bf16 %v8828_v19  ;;  %4483 = vst [vmem:[%s8421_s26 + $0x18] sm:$0xff] %v4451_v28  ;;  %v8839_v28 = vunpack.c.l.bf16 %v8838_v14 }
 0x27c   : > { %v4456_v36 = vadd.f32 %v8818_v49, %v4392_v32  ;;  %v4457_v18 = vadd.f32 %v8819_v61, %v4393_v51  ;;  %v4458_v50 = vadd.f32 %v8821_v53, %v4394_v48  ;;  %v4459_v16 = vadd.f32 %v8823_v46, %v4395_v52  ;;  %4484 = vst [vmem:[%s8421_s26 + $0x20] sm:$0xff] %v4452_v26  ;;  %v8830_v51 = vld [vmem:[#allocation20_spill] sm:$0xff] }
 0x27d   : > { %v4460_v39 = vadd.f32 %v8825_v58, %v4396_v9  ;;  %v4461_v8 = vadd.f32 %v8827_v33, %v4397_v54  ;;  %v4462_v32 = vadd.f32 %v8829_v15, %v4398_v1  ;;  %4485 = vst [vmem:[%s8421_s26 + $0x28] sm:$0xff] %v4453_v63  ;;  %4486 = vst [vmem:[%s8421_s26 + $0x30] sm:$0xff] %v4454_v35  ;;  %v8831_v48 = vunpack.c.l.bf16 %v8830_v51  ;;  %v8832_v9 = vld [vmem:[#allocation22_spill] sm:$0xff]  ;;  %v8834_v54 = vld [vmem:[#allocation21_spill] sm:$0xff] }
 0x27e   : > { %v8833_v62 = vunpack.c.l.bf16 %v8832_v9  ;;  %v8835_v13 = vunpack.c.l.bf16 %v8834_v54  ;;  %v8836_v1 = vld [vmem:[#allocation23_spill] sm:$0xff]  ;;  %4487 = vst [vmem:[%s8421_s26 + $0x38] sm:$0xff] %v4455_v22  ;;  %4488 = vst [vmem:[%s8421_s26 + $0x40] sm:$0xff] %v4456_v36  ;;  %v8841_v26 = vunpack.c.l.bf16 %v8840_v60  ;;  %v8842_v5 = vunpack.c.l.bf16 %v8779_v21 }
 0x27f   : > { %v4463_v52 = vadd.f32 %v8831_v48, %v4399_v56  ;;  %v8837_v44 = vunpack.c.l.bf16 %v8836_v1  ;;  %4489 = vst [vmem:[%s8421_s26 + $0x48] sm:$0xff] %v4457_v18  ;;  %4490 = vst [vmem:[%s8421_s26 + $0x50] sm:$0xff] %v4458_v50  ;;  %v4467_v56 = vadd.f32 %v8839_v28, %v4403_v59  ;;  %v8843_v63 = vunpack.c.l.bf16 %v8780_v31 }
 0x280   : > { %v4464_v38 = vadd.f32 %v8833_v62, %v4400_v40  ;;  %v4465_v10 = vadd.f32 %v8835_v13, %v4401_v11  ;;  %v4468_v40 = vadd.f32 %v8841_v26, %v4404_v30  ;;  %v4469_v11 = vadd.f32 %v8842_v5, %v4405_v45  ;;  %4491 = vst [vmem:[%s8421_s26 + $0x58] sm:$0xff] %v4459_v16 }
 0x281   : > { %v4466_v2 = vadd.f32 %v8837_v44, %v4402_v27  ;;  %v4470_v27 = vadd.f32 %v8843_v63, %v4406_v3  ;;  %4492 = vst [vmem:[%s8421_s26 + $0x60] sm:$0xff] %v4460_v39  ;;  %4493 = vst [vmem:[%s8421_s26 + $0x68] sm:$0xff] %v4461_v8  ;;  %v8844_v41 = vunpack.c.l.bf16 %v8781_v6  ;;  %v8845_v59 = vunpack.c.l.bf16 %v8782_v25 }
 0x282   : > { %4494 = vst [vmem:[%s8421_s26 + $0x70] sm:$0xff] %v4462_v32  ;;  %v8846_v30 = vunpack.c.l.bf16 %v8783_v17  ;;  %v8847_v31 = vunpack.c.l.bf16 %v8784_v12  ;;  %4495 = vst [vmem:[%s8421_s26 + $0x78] sm:$0xff] %v4463_v52  ;;  %v8848_v25 = vunpack.c.l.bf16 %v8785_v29  ;;  %v8849_v12 = vld [vmem:[#allocation33_spill] sm:$0xff] }
 0x283   : > { %v4471_v35 = vadd.f32 %v8844_v41, %v4407_v34  ;;  %v4472_v42 = vadd.f32 %v8845_v59, %v4408_v0  ;;  %4496 = vst [vmem:[%s8421_s26 + $0x80] sm:$0xff] %v4464_v38  ;;  %4497 = vst [vmem:[%s8421_s26 + $0x88] sm:$0xff] %v4465_v10  ;;  %v8850_v17 = vunpack.c.l.bf16 %v8849_v12  ;;  %v8851_v34 = vld [vmem:[#allocation35_spill] sm:$0xff] }
 0x284   : > { %v4473_v21 = vadd.f32 %v8846_v30, %v4409_v37  ;;  %v4474_v45 = vadd.f32 %v8847_v31, %v4410_v47  ;;  %4498 = vst [vmem:[%s8421_s26 + $0x90] sm:$0xff] %v4466_v2  ;;  %v4475_v6 = vadd.f32 %v8848_v25, %v4411_v7  ;;  %v8852_v0 = vunpack.c.l.bf16 %v8851_v34  ;;  %v8853_v47 = vld [vmem:[#allocation36_spill] sm:$0xff]  ;;  %4499 = vst [vmem:[%s8421_s26 + $0x98] sm:$0xff] %v4467_v56 }
 0x285   : > { %v4476_v3 = vadd.f32 %v8850_v17, %v4412_v57  ;;  %v8854_v22 = vunpack.c.l.bf16 %v8853_v47  ;;  %4500 = vst [vmem:[%s8421_s26 + $0xa0] sm:$0xff] %v4468_v40  ;;  %4501 = vst [vmem:[%s8421_s26 + $0xa8] sm:$0xff] %v4469_v11 }
 0x286   : > { %v4478_v37 = vadd.f32 %v8852_v0, %v4414_v24  ;;  %4502 = vst [vmem:[%s8421_s26 + $0xb0] sm:$0xff] %v4470_v27  ;;  %4503 = vst [vmem:[%s8421_s26 + $0xb8] sm:$0xff] %v4471_v35 }
 0x287   : > { %v4479_v49 = vadd.f32 %v8854_v22, %v4415_v43  ;;  %4504 = vst [vmem:[%s8421_s26 + $0xc0] sm:$0xff] %v4472_v42  ;;  %4505 = vst [vmem:[%s8421_s26 + $0xc8] sm:$0xff] %v4473_v21 }
 0x288   : > { %4506 = vst [vmem:[%s8421_s26 + $0xd0] sm:$0xff] %v4474_v45  ;;  %4507 = vst [vmem:[%s8421_s26 + $0xd8] sm:$0xff] %v4475_v6 }
 0x289   : > { %4508 = vst [vmem:[%s8421_s26 + $0xe0] sm:$0xff] %v4476_v3  ;;  %4510 = vst [vmem:[%s8421_s26 + $0xf0] sm:$0xff] %v4478_v37 }
 0x28a   : > { %4511 = vst [vmem:[%s8421_s26 + $0xf8] sm:$0xff] %v4479_v49 }
 0x28b   : > { %6044 = shalt.err (!%p6041_p3)
}
 0x28c   : > { %s6045_s14 = scalar_lea.hbm %s8583_s3, 4096  ;;  %s6049_s21 = scalar_lea.hbm %s8652_s2, 8192 }
 0x28d   : > { %p6046_p4 = scmp.ne.s32.totalorder %s8583_s3, %s6045_s14  ;;  %p6050_p9 = scmp.lt.u32.totalorder %s8583_s3, %s8652_s2 }
 0x28e   : > { %p6051_p10 = scmp.lt.u32.totalorder %s6049_s21, %s6045_s14  ;;  %p6053_p12 = scmp.lt.u32.totalorder %s6045_s14, %s8583_s3 }
 0x28f   : > { %p6047_p7 = pnand %p6046_p4, %p6151_p5 }
 0x290   : > { %p6052_p11 = por %p6051_p10, %p6050_p9 }
 0x291   : > { %p6048_p8 = pneg %p6047_p7 }
 0x292   : > { %p6054_p13 = por %p6053_p12, %p6052_p11 }
 0x294   : > { %p6055_p0 = pnand %p6054_p13, %p6048_p8 }
 0x296   : > { %6058 = shalt.err (!%p6055_p0)
}
 0x297   : > { %s6096_s24 = smov 128   ;;  %s6097_s27 = smov 8  }
 0x298   : > { %5817 = dma.vmem_to_hbm [thread:$0]  (%p6151_p5), %s8585_s29, 4096, %s8583_s3, %s8609_s4, %s6096_s24, %s6096_s24, %s6097_s27  }
 0x299 PF: > { %p5823_p1 = scmp.ge.s32.totalorder %s6093_s12, 2  ;;  %s4541_s25 = sand.u32 1, %s6081_s9  }
 0x29a   : > { %s4542_s26 = scalar_lea.sflag [#allocation3], %s4541_s25 }
 0x29b   : > { %p5820_p2 = pnand %p5823_p1, %p6155_p6 }
 0x29d   : > { %6076 = dma.done.wait (!%p5820_p2), %s4542_s26, 4096  }
 0x29e   : > { %6078 = vsyncadd (!%p5820_p2), %s4542_s26, 4294963200  ;;  %p12_p3 = scmp.ge.s32.totalorder %s6138_s15, 4   ;;  %s8855_s9 = smov %s6085_s10 }
 0x29f   : > { %s8856_s10 = smov %s6089_s11  ;;  %s8857_s11 = smov %s6149_s18 }
 0x2a0   : > { %s8858_s12 = smov %s6138_s15  ;;  %14 = sbr.rel (!%p12_p3) target bundleno = 3 (0x3), region = 67 }
 0x2a7   :  { %4547 = vsyncpa [#allocation3], 1 }
 0x2a8   :  { %4549 = vsyncpa [#allocation3 + $0x1], 1 }

</bundles_post_ra>
